<compile_context>
chip_gen: v5e
topology: v5e:2x2
jax: 0.10.0
libtpu: 0.0.40
codegen_flags: <defaults>
</compile_context>

<pallas_src>
import functools
import math
from dataclasses import dataclass

import jax
import jax.numpy as jnp
from jax.experimental import pallas as pl
from jax.experimental.pallas import tpu as pltpu

BN_EPS = 1e-5
LANE = 128
_MIB = 1024 * 1024


@dataclass
class StageConfig:
    depth: int
    groups: int
    out_channels: int
    bottleneck_ratio: int


def _round_up(x: int, m: int) -> int:
    return ((x + m - 1) // m) * m


def _cpad(c: int) -> int:
    return _round_up(max(c, LANE), LANE)


# ----------------------------------------------------------------------------
# Single-buffering of grid-invariant operands (probed once, safe fallback)
# ----------------------------------------------------------------------------
_BUFFERED_OK = None


def _probe_single_buffering():
    """Check this JAX/Mosaic build accepts pl.Buffered(1) single-buffered
    BlockSpecs (used for grid-invariant weights); fall back silently if not."""
    global _BUFFERED_OK
    if _BUFFERED_OK is not None:
        return
    try:
        def k(x_ref, o_ref):
            o_ref[...] = x_ref[...]

        f = pl.pallas_call(
            k,
            out_shape=jax.ShapeDtypeStruct((8, LANE), jnp.float32),
            grid=(2,),
            in_specs=[pl.BlockSpec((8, LANE), lambda i: (0, 0),
                                   pipeline_mode=pl.Buffered(1))],
            out_specs=pl.BlockSpec((8, LANE), lambda i: (0, 0)),
        )
        jax.block_until_ready(f(jnp.zeros((8, LANE), jnp.float32)))
        _BUFFERED_OK = True
    except Exception:
        _BUFFERED_OK = False


def _const_spec(shape, index_map):
    """BlockSpec for a grid-invariant operand: single-buffer it if supported
    (saves a VMEM copy of the multi-MiB weights at real RegNet widths)."""
    if _BUFFERED_OK:
        return pl.BlockSpec(shape, index_map, pipeline_mode=pl.Buffered(1))
    return pl.BlockSpec(shape, index_map)


def _cparams(dims, est_bytes):
    """Compiler params with an explicit scoped-VMEM limit sized to the blocks."""
    limit = int(min(64 * _MIB, max(32 * _MIB, 2 * est_bytes)))
    return pltpu.CompilerParams(dimension_semantics=dims, vmem_limit_bytes=limit)


def _pick_row_tile(hwo, k_pad, cout_pad, has_id, budget=8 * _MIB):
    """Largest multiple-of-8 divisor of hwo whose block footprint (input+output
    double-buffered + f32 accumulator) stays under `budget`; else full extent."""
    per_row = 4 * k_pad + 8 * cout_pad + (4 * cout_pad if has_id else 0)
    target = max(8, (budget // per_row) // 8 * 8)
    if target >= hwo:
        return hwo
    for cand in range(target, 7, -8):
        if hwo % cand == 0:
            return cand
    return hwo


# ----------------------------------------------------------------------------
# Pallas kernels
# ----------------------------------------------------------------------------
def _conv_kernel(*refs, taps, acc_rows, cout, relu, residual, slab):
    """Fused conv + folded-BN bias + (residual add) + (ReLU).

    refs = (x, w, b[, identity], out)
      x:   (1, n_var, rows_in, K_pad)  bf16  (flat padded slab / tap variants /
                                              row tile of a 1x1 / im2col LHS)
      w:   (n_taps, K_pad, Cout_pad)   bf16  BN-scale folded, groups block-diag
      b:   (1, Cout_pad)               f32
      id:  (1, acc_rows, Cout_pad)     bf16  (only when residual=True)
      out: (1, acc_rows, Cout_pad) or (1, Ho, Wo, Cout_pad) for slab mode

    Each weight tap is an MXU matmul against a static contiguous row slice of
    the x block; the accumulator is initialized from the first tap's dot.
    """
    if residual:
        x_ref, w_ref, b_ref, id_ref, o_ref = refs
    else:
        x_ref, w_ref, b_ref, o_ref = refs
        id_ref = None

    v0, off0 = taps[0]
    acc = jnp.dot(x_ref[0, v0, off0:off0 + acc_rows, :], w_ref[0],
                  preferred_element_type=jnp.float32)
    for t in range(1, len(taps)):                      # static unroll over taps
        v, off = taps[t]
        acc = acc + jnp.dot(x_ref[0, v, off:off + acc_rows, :], w_ref[t],
                            preferred_element_type=jnp.float32)

    y = acc + b_ref[...]                               # f32 epilogue
    if residual:
        y = y + id_ref[0].astype(jnp.float32)
    if relu:
        y = jnp.maximum(y, 0.0)
    if slab is not None:                               # drop wrap-around columns
        ho, row_w, wo = slab
        y = y.reshape(ho, row_w, cout)[:, :wo, :]
    o_ref[0] = y.astype(o_ref.dtype)


def _head_kernel(x_ref, w_ref, b_ref, o_ref, *, inv_hw):
    """Fused global-average-pool + Linear over a tile of images.

      x: (bt, HW, Cpad) bf16   w: (Cpad, Npad) f32   b: (1, Npad) f32
      o: (bt, Npad) f32   -- one batched MXU matmul instead of M=1 per image.
    """
    pooled = jnp.sum(x_ref[...].astype(jnp.float32), axis=1) * inv_hw
    o_ref[...] = (jnp.dot(pooled, w_ref[...], preferred_element_type=jnp.float32)
                  + b_ref[...])


# ----------------------------------------------------------------------------
# Wrapper-side LHS construction
# ----------------------------------------------------------------------------
def _build_im2col(x, kh, kw, s, p, Ho, Wo, k_pad):
    """im2col LHS (B, 1, Ho*Wo, k_pad) with K = kh*kw*Cin zero-padded to 128."""
    B, _, _, cin = x.shape
    if p:
        x = jnp.pad(x, ((0, 0), (p, p), (p, p), (0, 0)))
    cols = [x[:, di::s, dj::s, :][:, :Ho, :Wo, :]
            for di in range(kh) for dj in range(kw)]
    col = jnp.concatenate(cols, axis=-1)               # (B, Ho, Wo, kh*kw*cin)
    col = jnp.pad(col, ((0, 0), (0, 0), (0, 0), (0, k_pad - kh * kw * cin)))
    return col.reshape(B, 1, Ho * Wo, k_pad)


def _build_tap_variants(x, kh, kw, s, p, Ho, Wo, Hs, n_ph):
    """(B, kw*n_ph, Hs*Wo, C) column-tap / row-phase variants for strided convs.

    Tap (di, dj) is the flat-row slice [(di//s)*Wo : (di//s)*Wo + Ho*Wo) of
    variant (dj*n_ph + di % s)."""
    if p:
        x = jnp.pad(x, ((0, 0), (p, p), (p, p), (0, 0)))
    variants = []
    for dj in range(kw):
        for ph in range(n_ph):
            v = x[:, ph::s, dj::s, :][:, :Hs, :Wo, :]
            if v.shape[1] < Hs:                        # uniformize row count
                v = jnp.pad(v, ((0, 0), (0, Hs - v.shape[1]), (0, 0), (0, 0)))
            variants.append(v)
    xv = jnp.stack(variants, axis=1)                   # (B, n_var, Hs, Wo, C)
    B, n_var, _, _, C = xv.shape
    return xv.reshape(B, n_var, Hs * Wo, C)


# ----------------------------------------------------------------------------
# Fused Conv + BN (+ residual) (+ ReLU)
# ----------------------------------------------------------------------------
def conv_bn_act(x_bhwc, p, *, relu, identity=None):
    """x: (B, H, W, Cin[_pad]) bf16 -> (B, Ho, Wo, Cout_pad) bf16 (1 pallas_call)."""
    mode, s, pad = p["mode"], p["stride"], p["padding"]
    kh, kw = p["kh"], p["kw"]
    w_packed, bias = p["w"], p["b"]
    n_taps, k_pad, cout_pad = w_packed.shape
    B, H, W, _ = x_bhwc.shape
    Ho = (H + 2 * pad - kh) // s + 1
    Wo = (W + 2 * pad - kw) // s + 1
    hwo = Ho * Wo
    residual = identity is not None

    if mode != "im2col" and x_bhwc.shape[-1] < k_pad:  # lane-pad (raw input only)
        x_bhwc = jnp.pad(x_bhwc, ((0, 0), (0, 0), (0, 0),
                                  (0, k_pad - x_bhwc.shape[-1])))

    slab = None
    if mode in ("matmul", "im2col"):
        # 1x1 conv / single-tap im2col: plain matmul, row-tiled over Ho*Wo.
        if mode == "matmul":
            xs = x_bhwc if s == 1 else x_bhwc[:, ::s, ::s, :][:, :Ho, :Wo, :]
            xv = xs.reshape(B, 1, hwo, k_pad)
        else:
            xv = _build_im2col(x_bhwc[..., :p["cin"]], kh, kw, s, pad, Ho, Wo, k_pad)
        taps = ((0, 0),)
        tile = _pick_row_tile(hwo, k_pad, cout_pad, residual)
        acc_rows = tile
        grid = (B, hwo // tile)
        dims = ("parallel", "parallel")                # row-tile axis feeds 2nd TC
        in_specs = [pl.BlockSpec((1, 1, tile, k_pad), lambda b, t: (b, 0, t, 0)),
                    _const_spec((n_taps, k_pad, cout_pad), lambda b, t: (0, 0, 0)),
                    _const_spec((1, cout_pad), lambda b, t: (0, 0))]
        out_spec = pl.BlockSpec((1, tile, cout_pad), lambda b, t: (b, t, 0))
        out_shape = (B, hwo, cout_pad)
        if residual:
            in_specs.append(pl.BlockSpec((1, tile, cout_pad), lambda b, t: (b, t, 0)))
        est = (4 * tile * k_pad + 8 * tile * cout_pad
               + (4 * tile * cout_pad if residual else 0)
               + 2 * n_taps * k_pad * cout_pad + 4 * cout_pad)
    elif mode == "slab":
        # stride-1 kxk: one zero-padded slab; taps = static contiguous row
        # slices of the flat (Hp*Wp, Cin_pad) block (no kw-fold HBM variants).
        assert not residual
        Wp = W + 2 * pad
        xp = jnp.pad(x_bhwc, ((0, 0), (pad, pad + 1), (pad, pad), (0, 0)))
        rows_in = xp.shape[1] * Wp                     # +1 zero guard row
        xv = xp.reshape(B, 1, rows_in, k_pad)
        taps = tuple((0, di * Wp + dj) for di in range(kh) for dj in range(kw))
        acc_rows = Ho * Wp                             # "wide" output rows
        slab = (Ho, Wp, Wo)
        grid = (B,)
        dims = ("parallel",)
        in_specs = [pl.BlockSpec((1, 1, rows_in, k_pad), lambda b: (b, 0, 0, 0)),
                    _const_spec((n_taps, k_pad, cout_pad), lambda b: (0, 0, 0)),
                    _const_spec((1, cout_pad), lambda b: (0, 0))]
        out_spec = pl.BlockSpec((1, Ho, Wo, cout_pad), lambda b: (b, 0, 0, 0))
        out_shape = (B, Ho, Wo, cout_pad)
        est = (4 * rows_in * k_pad + 4 * hwo * cout_pad + 4 * acc_rows * cout_pad
               + 2 * n_taps * k_pad * cout_pad + 4 * cout_pad)
    else:
        # strided kxk ("variants"): kw*min(kh,s) stride-phase variants, one image
        # per grid step (only the per-stage downsampling 3x3 uses this path).
        assert not residual
        n_ph = min(kh, s)
        Hs = Ho + (kh - 1) // s
        xv = _build_tap_variants(x_bhwc, kh, kw, s, pad, Ho, Wo, Hs, n_ph)
        n_var = kw * n_ph
        taps = tuple((dj * n_ph + (di % s), (di // s) * Wo)
                     for di in range(kh) for dj in range(kw))
        acc_rows = hwo
        grid = (B,)
        dims = ("parallel",)
        in_specs = [pl.BlockSpec((1, n_var, Hs * Wo, k_pad), lambda b: (b, 0, 0, 0)),
                    _const_spec((n_taps, k_pad, cout_pad), lambda b: (0, 0, 0)),
                    _const_spec((1, cout_pad), lambda b: (0, 0))]
        out_spec = pl.BlockSpec((1, hwo, cout_pad), lambda b: (b, 0, 0))
        out_shape = (B, hwo, cout_pad)
        est = (4 * n_var * Hs * Wo * k_pad + 8 * hwo * cout_pad
               + 2 * n_taps * k_pad * cout_pad + 4 * cout_pad)

    kernel = functools.partial(_conv_kernel, taps=taps, acc_rows=acc_rows,
                               cout=cout_pad, relu=relu, residual=residual,
                               slab=slab)
    args = [xv, w_packed, bias]
    if residual:
        args.append(identity.reshape(B, hwo, cout_pad))

    out = pl.pallas_call(
        kernel,
        out_shape=jax.ShapeDtypeStruct(out_shape, jnp.bfloat16),
        grid=grid,
        in_specs=in_specs,
        out_specs=out_spec,
        compiler_params=_cparams(dims, est),
    )(*args)
    return out.reshape(B, Ho, Wo, cout_pad)


# ----------------------------------------------------------------------------
# Parameter init: kaiming fan_out convs, BN folded & packed once at init
# ----------------------------------------------------------------------------
def _kaiming_conv(key, cout, cin_g, kh, kw):
    fan_out = cout * kh * kw
    std = math.sqrt(2.0 / fan_out)
    return std * jax.random.normal(key, (cout, cin_g, kh, kw), jnp.float32)


def _pack_conv(w_oihw, groups, cin, cout, kh, kw, stride, padding):
    """Fold eval-mode BN scale, pick the kernel mode, block-diagonalize groups,
    pad to lane multiples, cast to bf16 — all once at init."""
    cin_g = cin // groups
    cin_pad, cout_pad = _cpad(cin), _cpad(cout)
    bn_scale = 1.0 / math.sqrt(1.0 + BN_EPS)           # gamma=1, mean=0, var=1

    if kh == 1 and kw == 1:
        mode = "matmul"
    elif groups == 1 and kh * kw * cin <= LANE:
        mode = "im2col"                                # stem: K fits one lane tile
    elif stride == 1 and padding == (kh - 1) // 2 and padding == (kw - 1) // 2:
        mode = "slab"
    else:
        mode = "variants"

    if mode == "im2col":
        w = jnp.transpose(w_oihw, (2, 3, 1, 0)).reshape(kh * kw * cin, cout) * bn_scale
        w = jnp.pad(w, ((0, LANE - kh * kw * cin), (0, cout_pad - cout)))[None]
    else:
        w = jnp.transpose(w_oihw, (2, 3, 1, 0)).reshape(kh * kw, cin_g, cout) * bn_scale
        full = jnp.zeros((kh * kw, cin, cout), jnp.float32)
        cout_g = cout // groups
        for g in range(groups):
            full = full.at[:, g * cin_g:(g + 1) * cin_g,
                           g * cout_g:(g + 1) * cout_g].set(
                               w[:, :, g * cout_g:(g + 1) * cout_g])
        w = jnp.pad(full, ((0, 0), (0, cin_pad - cin), (0, cout_pad - cout)))
    return {
        "mode": mode,
        "w": w.astype(jnp.bfloat16),
        "b": jnp.zeros((1, cout_pad), jnp.float32),    # BN beta=0, running_mean=0
        "kh": kh, "kw": kw, "stride": stride, "padding": padding,
        "cin": cin, "cin_pad": cin_pad, "groups": groups,
        "w_raw": w_oihw,                               # pure-JAX reference only
    }


def _make_conv(key, cin, cout, kh, kw, stride, padding, groups):
    assert cin % groups == 0 and cout % groups == 0, (cin, cout, groups)
    w = _kaiming_conv(key, cout, cin // groups, kh, kw)
    return _pack_conv(w, groups, cin, cout, kh, kw, stride, padding)


def _init_block(key, cin, cout, stride, groups, bottleneck_ratio):
    bott = cout // bottleneck_ratio
    k1, k2, k3, k4 = jax.random.split(key, 4)
    blk = {
        "conv1": _make_conv(k1, cin, bott, 1, 1, 1, 0, 1),
        "conv2": _make_conv(k2, bott, bott, 3, 3, stride, 1, groups),
        "conv3": _make_conv(k3, bott, cout, 1, 1, 1, 0, 1),
    }
    if stride != 1 or cin != cout:
        blk["shortcut"] = _make_conv(k4, cin, cout, 1, 1, stride, 0, 1)
    return blk


def init_anynet(key, in_channels, stem_out_channels, num_classes, arch_params):
    _probe_single_buffering()                          # runs eagerly (outside jit)
    n_blocks = sum(c.depth for c in arch_params)
    keys = jax.random.split(key, 2 + n_blocks)
    ki = 0
    params = {"stem": _make_conv(keys[ki], in_channels, stem_out_channels,
                                 3, 3, 2, 1, 1)}
    ki += 1
    stages = []
    cin = stem_out_channels
    for cfg in arch_params:
        blocks = []
        for d in range(cfg.depth):
            stride = 2 if d == 0 else 1
            blk_in = cin if d == 0 else cfg.out_channels
            blocks.append(_init_block(keys[ki], blk_in, cfg.out_channels, stride,
                                      cfg.groups, cfg.bottleneck_ratio))
            ki += 1
        stages.append(blocks)
        cin = cfg.out_channels
    params["stages"] = stages

    bound = 1.0 / math.sqrt(cin)
    kw_, kb_ = jax.random.split(keys[ki], 2)
    head_w = jax.random.uniform(kw_, (cin, num_classes), jnp.float32, -bound, bound)
    head_b = jax.random.uniform(kb_, (num_classes,), jnp.float32, -bound, bound)
    cpad, npad = _cpad(cin), _cpad(num_classes)
    params["head_w"] = jnp.pad(head_w, ((0, cpad - cin), (0, npad - num_classes)))
    params["head_b"] = jnp.pad(head_b, (0, npad - num_classes)).reshape(1, npad)
    params["head_w_raw"] = head_w
    params["head_b_raw"] = head_b
    params["num_classes"] = num_classes
    return params


# ----------------------------------------------------------------------------
# Forward pass
# ----------------------------------------------------------------------------
def _block_forward(blk, x):
    out = conv_bn_act(x, blk["conv1"], relu=True)
    out = conv_bn_act(out, blk["conv2"], relu=True)
    if "shortcut" in blk:
        identity = conv_bn_act(x, blk["shortcut"], relu=False)
    else:
        identity = x
    # conv3 with fused BN + residual-add + ReLU epilogue (no separate add_relu)
    return conv_bn_act(out, blk["conv3"], relu=True, identity=identity)


def anynet_forward(params, x_nchw):
    x = jnp.transpose(x_nchw, (0, 2, 3, 1)).astype(jnp.bfloat16)    # NHWC bf16
    x = conv_bn_act(x, params["stem"], relu=True)
    for stage in params["stages"]:
        for blk in stage:
            x = _block_forward(blk, x)

    # fused global-average-pool + Linear head (batched MXU matmul)
    B, H, W, cpad = x.shape
    hw = H * W
    npad = params["head_w"].shape[1]
    if B * hw * cpad * 2 <= 8 * _MIB:
        bt = B
    else:
        bt = min(B, max(8, (8 * _MIB // (hw * cpad * 2)) // 8 * 8))
    est = 4 * bt * hw * cpad + 4 * cpad * npad + 8 * bt * npad + 4 * npad
    logits = pl.pallas_call(
        functools.partial(_head_kernel, inv_hw=1.0 / hw),
        out_shape=jax.ShapeDtypeStruct((B, npad), jnp.float32),
        grid=(pl.cdiv(B, bt),),
        in_specs=[
            pl.BlockSpec((bt, hw, cpad), lambda i: (i, 0, 0)),
            _const_spec((cpad, npad), lambda i: (0, 0)),
            _const_spec((1, npad), lambda i: (0, 0)),
        ],
        out_specs=pl.BlockSpec((bt, npad), lambda i: (i, 0)),
        compiler_params=_cparams(("parallel",), est),
    )(x.reshape(B, hw, cpad), params["head_w"], params["head_b"])
    return logits[:, :params["num_classes"]]


# ----------------------------------------------------------------------------
# Pure-JAX reference (mimics the kernel's bf16 inter-layer storage rounding)
# ----------------------------------------------------------------------------
def _ref_forward(params, x_nchw):
    def q(v):                                          # storage rounding
        return v.astype(jnp.bfloat16).astype(jnp.float32)

    bn_scale = 1.0 / math.sqrt(1.0 + BN_EPS)

    def conv(x, p, relu, identity=None):
        w = jnp.transpose(p["w_raw"], (2, 3, 1, 0)) * bn_scale       # HWIO
        w = w.astype(jnp.bfloat16).astype(jnp.float32)
        y = jax.lax.conv_general_dilated(
            x, w, (p["stride"], p["stride"]),
            [(p["padding"], p["padding"])] * 2,
            dimension_numbers=("NHWC", "HWIO", "NHWC"),
            feature_group_count=p["groups"])
        if identity is not None:
            y = y + identity
        if relu:
            y = jnp.maximum(y, 0.0)
        return q(y)

    x = q(jnp.transpose(x_nchw, (0, 2, 3, 1)).astype(jnp.float32))
    x = conv(x, params["stem"], relu=True)
    for stage in params["stages"]:
        for blk in stage:
            out = conv(x, blk["conv1"], relu=True)
            out = conv(out, blk["conv2"], relu=True)
            identity = conv(x, blk["shortcut"], relu=False) if "shortcut" in blk else x
            x = conv(out, blk["conv3"], relu=True, identity=identity)
    pooled = jnp.mean(x, axis=(1, 2))
    return jnp.dot(pooled, params["head_w_raw"],
                   precision=jax.lax.Precision.HIGHEST) + params["head_b_raw"]


# ----------------------------------------------------------------------------
if __name__ == "__main__":
    key = jax.random.PRNGKey(0)
    kx, kp = jax.random.split(key)

    in_channels = 4
    stem_out_channels = 8
    num_classes = 10
    arch_params = [
        StageConfig(depth=1, groups=2, out_channels=16, bottleneck_ratio=2),
        StageConfig(depth=2, groups=4, out_channels=32, bottleneck_ratio=2),
    ]

    x = jax.random.normal(kx, (2, in_channels, 16, 16), jnp.float32)   # NCHW
    params = init_anynet(kp, in_channels, stem_out_channels, num_classes, arch_params)

    fwd = jax.jit(functools.partial(anynet_forward, params))
    logits = fwd(x)
    jax.block_until_ready(logits)
    assert logits.shape == (2, num_classes), logits.shape

    ref = _ref_forward(params, x)
    err = float(jnp.max(jnp.abs(logits - ref)))
    assert err < 2e-2, f"max abs error vs reference: {err}"
    print("KERNEL_OK")
</pallas_src>

<mosaic_0001>
module attributes {stable_mosaic.version = 11 : i64} {
  func.func @k(%arg0: i32, %arg1: memref<8x128xf32, #tpu.memory_space<vmem>>, %arg2: memref<8x128xf32, #tpu.memory_space<vmem>>) attributes {dimension_semantics = [#tpu.dimension_semantics<arbitrary>], iteration_bounds = array<i64: 2>, scalar_prefetch = 0 : i64, scratch_operands = 0 : i64, tpu.core_type = #tpu.core_type<tc>, window_params = [{pipeline_mode = #tpu.pipeline_mode<synchronous>, transform_indices = @transform_0, window_bounds = array<i64: 8, 128>}, {pipeline_mode = #tpu.pipeline_mode<synchronous>, transform_indices = @transform_1, window_bounds = array<i64: 8, 128>}]} {
    %c0 = arith.constant 0 : index
    %c0_0 = arith.constant 0 : index
    %0 = vector.load %arg1[%c0, %c0_0] : memref<8x128xf32, #tpu.memory_space<vmem>>, vector<8x128xf32>
    %c0_1 = arith.constant 0 : index
    %c0_2 = arith.constant 0 : index
    %1 = vector.load %arg2[%c0_1, %c0_2] : memref<8x128xf32, #tpu.memory_space<vmem>>, vector<8x128xf32>
    tpu.vector_store %arg2[%c0_1, %c0_2], %0 {strides = array<i32>} : memref<8x128xf32, #tpu.memory_space<vmem>>, vector<8x128xf32>,
    return
  }
  func.func @transform_0(%arg0: i32) -> (i32, i32) {
    %c0_i32 = arith.constant 0 : i32
    %c0_i32_0 = arith.constant 0 : i32
    %c0_i32_1 = arith.constant 0 : i32
    return %c0_i32, %c0_i32_0 : i32, i32
  }
  func.func @transform_1(%arg0: i32) -> (i32, i32) {
    %c0_i32 = arith.constant 0 : i32
    %c0_i32_0 = arith.constant 0 : i32
    %c0_i32_1 = arith.constant 0 : i32
    return %c0_i32, %c0_i32_0 : i32, i32
  }
}

module attributes {stable_mosaic.version = 11 : i64} {
  func.func @_conv_kernel(%arg0: i32, %arg1: i32, %arg2: memref<1x1x64x128xbf16, #tpu.memory_space<vmem>>, %arg3: memref<1x128x128xbf16, #tpu.memory_space<vmem>>, %arg4: memref<1x128xf32, #tpu.memory_space<vmem>>, %arg5: memref<1x64x128xbf16, #tpu.memory_space<vmem>>) attributes {dimension_semantics = [#tpu.dimension_semantics<parallel>, #tpu.dimension_semantics<parallel>], iteration_bounds = array<i64: 2, 1>, scalar_prefetch = 0 : i64, scratch_operands = 0 : i64, tpu.core_type = #tpu.core_type<tc>, window_params = [{transform_indices = @transform_0, window_bounds = array<i64: 1, 1, 64, 128>}, {pipeline_mode = #tpu.pipeline_mode<synchronous>, transform_indices = @transform_1, window_bounds = array<i64: 1, 128, 128>}, {pipeline_mode = #tpu.pipeline_mode<synchronous>, transform_indices = @transform_2, window_bounds = array<i64: 1, 128>}, {transform_indices = @transform_3, window_bounds = array<i64: 1, 64, 128>}]} {
    %c0 = arith.constant 0 : index
    %c0_0 = arith.constant 0 : index
    %c0_1 = arith.constant 0 : index
    %c0_2 = arith.constant 0 : index
    %0 = vector.load %arg2[%c0, %c0_0, %c0_1, %c0_2] : memref<1x1x64x128xbf16, #tpu.memory_space<vmem>>, vector<1x1x64x128xbf16>
    %1 = vector.shape_cast %0 : vector<1x1x64x128xbf16> to vector<64x128xbf16>
    %c0_3 = arith.constant 0 : index
    %c0_4 = arith.constant 0 : index
    %c0_5 = arith.constant 0 : index
    %2 = vector.load %arg3[%c0_3, %c0_4, %c0_5] : memref<1x128x128xbf16, #tpu.memory_space<vmem>>, vector<1x128x128xbf16>
    %3 = vector.shape_cast %2 : vector<1x128x128xbf16> to vector<128x128xbf16>
    %cst = arith.constant dense<0.000000e+00> : vector<64x128xf32>
    %4 = tpu.matmul %1, %3, %cst {dimension_numbers = #tpu.dot_dimension_numbers<[1], [0], [0], [1], [0, 0, 1, 1], [], []>} : vector<64x128xbf16>, vector<128x128xbf16>, vector<64x128xf32> -> vector<64x128xf32>
    %c0_6 = arith.constant 0 : index
    %c0_7 = arith.constant 0 : index
    %5 = vector.load %arg4[%c0_6, %c0_7] : memref<1x128xf32, #tpu.memory_space<vmem>>, vector<1x128xf32>
    %6 = vector.broadcast %5 : vector<1x128xf32> to vector<64x128xf32>
    %7 = arith.addf %4, %6 : vector<64x128xf32>
    %cst_8 = arith.constant 0.000000e+00 : f32
    %8 = vector.broadcast %cst_8 : f32 to vector<64x128xf32>
    %9 = arith.maximumf %7, %8 : vector<64x128xf32>
    %10 = arith.truncf %9 : vector<64x128xf32> to vector<64x128xbf16>
    %c0_9 = arith.constant 0 : index
    %c0_10 = arith.constant 0 : index
    %c0_11 = arith.constant 0 : index
    %11 = vector.load %arg5[%c0_9, %c0_10, %c0_11] : memref<1x64x128xbf16, #tpu.memory_space<vmem>>, vector<1x64x128xbf16>
    %12 = vector.shape_cast %11 : vector<1x64x128xbf16> to vector<64x128xbf16>
    %13 = vector.shape_cast %10 : vector<64x128xbf16> to vector<1x64x128xbf16>
    tpu.vector_store %arg5[%c0_9, %c0_10, %c0_11], %13 {strides = array<i32>} : memref<1x64x128xbf16, #tpu.memory_space<vmem>>, vector<1x64x128xbf16>,
    return
  }
  func.func @transform_0(%arg0: i32, %arg1: i32) -> (i32, i32, i32, i32) {
    %c0_i32 = arith.constant 0 : i32
    %c0_i32_0 = arith.constant 0 : i32
    %c0_i32_1 = arith.constant 0 : i32
    return %arg0, %c0_i32, %arg1, %c0_i32_0 : i32, i32, i32, i32
  }
  func.func @transform_1(%arg0: i32, %arg1: i32) -> (i32, i32, i32) {
    %c0_i32 = arith.constant 0 : i32
    %c0_i32_0 = arith.constant 0 : i32
    %c0_i32_1 = arith.constant 0 : i32
    %c0_i32_2 = arith.constant 0 : i32
    return %c0_i32, %c0_i32_0, %c0_i32_1 : i32, i32, i32
  }
  func.func @transform_2(%arg0: i32, %arg1: i32) -> (i32, i32) {
    %c0_i32 = arith.constant 0 : i32
    %c0_i32_0 = arith.constant 0 : i32
    %c0_i32_1 = arith.constant 0 : i32
    return %c0_i32, %c0_i32_0 : i32, i32
  }
  func.func @transform_3(%arg0: i32, %arg1: i32) -> (i32, i32, i32) {
    %c0_i32 = arith.constant 0 : i32
    %c0_i32_0 = arith.constant 0 : i32
    return %arg0, %arg1, %c0_i32 : i32, i32, i32
  }
}

module attributes {stable_mosaic.version = 11 : i64} {
  func.func @_conv_kernel(%arg0: i32, %arg1: memref<1x6x20x128xbf16, #tpu.memory_space<vmem>>, %arg2: memref<9x128x128xbf16, #tpu.memory_space<vmem>>, %arg3: memref<1x128xf32, #tpu.memory_space<vmem>>, %arg4: memref<1x16x128xbf16, #tpu.memory_space<vmem>>) attributes {dimension_semantics = [#tpu.dimension_semantics<parallel>], iteration_bounds = array<i64: 2>, scalar_prefetch = 0 : i64, scratch_operands = 0 : i64, tpu.core_type = #tpu.core_type<tc>, window_params = [{transform_indices = @transform_0, window_bounds = array<i64: 1, 6, 20, 128>}, {pipeline_mode = #tpu.pipeline_mode<synchronous>, transform_indices = @transform_1, window_bounds = array<i64: 9, 128, 128>}, {pipeline_mode = #tpu.pipeline_mode<synchronous>, transform_indices = @transform_2, window_bounds = array<i64: 1, 128>}, {transform_indices = @transform_3, window_bounds = array<i64: 1, 16, 128>}]} {
    %c0 = arith.constant 0 : index
    %c0_0 = arith.constant 0 : index
    %c0_1 = arith.constant 0 : index
    %c0_2 = arith.constant 0 : index
    %0 = vector.load %arg1[%c0, %c0_0, %c0_1, %c0_2] : memref<1x6x20x128xbf16, #tpu.memory_space<vmem>>, vector<1x1x16x128xbf16>
    %1 = vector.shape_cast %0 : vector<1x1x16x128xbf16> to vector<16x128xbf16>
    %c0_3 = arith.constant 0 : index
    %c0_4 = arith.constant 0 : index
    %c0_5 = arith.constant 0 : index
    %2 = vector.load %arg2[%c0_3, %c0_4, %c0_5] : memref<9x128x128xbf16, #tpu.memory_space<vmem>>, vector<1x128x128xbf16>
    %3 = vector.shape_cast %2 : vector<1x128x128xbf16> to vector<128x128xbf16>
    %cst = arith.constant dense<0.000000e+00> : vector<16x128xf32>
    %4 = tpu.matmul %1, %3, %cst {dimension_numbers = #tpu.dot_dimension_numbers<[1], [0], [0], [1], [0, 0, 1, 1], [], []>} : vector<16x128xbf16>, vector<128x128xbf16>, vector<16x128xf32> -> vector<16x128xf32>
    %c0_6 = arith.constant 0 : index
    %c2 = arith.constant 2 : index
    %c0_7 = arith.constant 0 : index
    %c0_8 = arith.constant 0 : index
    %5 = vector.load %arg1[%c0_6, %c2, %c0_7, %c0_8] : memref<1x6x20x128xbf16, #tpu.memory_space<vmem>>, vector<1x1x16x128xbf16>
    %6 = vector.shape_cast %5 : vector<1x1x16x128xbf16> to vector<16x128xbf16>
    %c1 = arith.constant 1 : index
    %c0_9 = arith.constant 0 : index
    %c0_10 = arith.constant 0 : index
    %7 = vector.load %arg2[%c1, %c0_9, %c0_10] : memref<9x128x128xbf16, #tpu.memory_space<vmem>>, vector<1x128x128xbf16>
    %8 = vector.shape_cast %7 : vector<1x128x128xbf16> to vector<128x128xbf16>
    %cst_11 = arith.constant dense<0.000000e+00> : vector<16x128xf32>
    %9 = tpu.matmul %6, %8, %cst_11 {dimension_numbers = #tpu.dot_dimension_numbers<[1], [0], [0], [1], [0, 0, 1, 1], [], []>} : vector<16x128xbf16>, vector<128x128xbf16>, vector<16x128xf32> -> vector<16x128xf32>
    %10 = arith.addf %4, %9 : vector<16x128xf32>
    %c0_12 = arith.constant 0 : index
    %c4 = arith.constant 4 : index
    %c0_13 = arith.constant 0 : index
    %c0_14 = arith.constant 0 : index
    %11 = vector.load %arg1[%c0_12, %c4, %c0_13, %c0_14] : memref<1x6x20x128xbf16, #tpu.memory_space<vmem>>, vector<1x1x16x128xbf16>
    %12 = vector.shape_cast %11 : vector<1x1x16x128xbf16> to vector<16x128xbf16>
    %c2_15 = arith.constant 2 : index
    %c0_16 = arith.constant 0 : index
    %c0_17 = arith.constant 0 : index
    %13 = vector.load %arg2[%c2_15, %c0_16, %c0_17] : memref<9x128x128xbf16, #tpu.memory_space<vmem>>, vector<1x128x128xbf16>
    %14 = vector.shape_cast %13 : vector<1x128x128xbf16> to vector<128x128xbf16>
    %cst_18 = arith.constant dense<0.000000e+00> : vector<16x128xf32>
    %15 = tpu.matmul %12, %14, %cst_18 {dimension_numbers = #tpu.dot_dimension_numbers<[1], [0], [0], [1], [0, 0, 1, 1], [], []>} : vector<16x128xbf16>, vector<128x128xbf16>, vector<16x128xf32> -> vector<16x128xf32>
    %16 = arith.addf %10, %15 : vector<16x128xf32>
    %c0_19 = arith.constant 0 : index
    %c1_20 = arith.constant 1 : index
    %c0_21 = arith.constant 0 : index
    %c0_22 = arith.constant 0 : index
    %17 = vector.load %arg1[%c0_19, %c1_20, %c0_21, %c0_22] : memref<1x6x20x128xbf16, #tpu.memory_space<vmem>>, vector<1x1x16x128xbf16>
    %18 = vector.shape_cast %17 : vector<1x1x16x128xbf16> to vector<16x128xbf16>
    %c3 = arith.constant 3 : index
    %c0_23 = arith.constant 0 : index
    %c0_24 = arith.constant 0 : index
    %19 = vector.load %arg2[%c3, %c0_23, %c0_24] : memref<9x128x128xbf16, #tpu.memory_space<vmem>>, vector<1x128x128xbf16>
    %20 = vector.shape_cast %19 : vector<1x128x128xbf16> to vector<128x128xbf16>
    %cst_25 = arith.constant dense<0.000000e+00> : vector<16x128xf32>
    %21 = tpu.matmul %18, %20, %cst_25 {dimension_numbers = #tpu.dot_dimension_numbers<[1], [0], [0], [1], [0, 0, 1, 1], [], []>} : vector<16x128xbf16>, vector<128x128xbf16>, vector<16x128xf32> -> vector<16x128xf32>
    %22 = arith.addf %16, %21 : vector<16x128xf32>
    %c0_26 = arith.constant 0 : index
    %c3_27 = arith.constant 3 : index
    %c0_28 = arith.constant 0 : index
    %c0_29 = arith.constant 0 : index
    %23 = vector.load %arg1[%c0_26, %c3_27, %c0_28, %c0_29] : memref<1x6x20x128xbf16, #tpu.memory_space<vmem>>, vector<1x1x16x128xbf16>
    %24 = vector.shape_cast %23 : vector<1x1x16x128xbf16> to vector<16x128xbf16>
    %c4_30 = arith.constant 4 : index
    %c0_31 = arith.constant 0 : index
    %c0_32 = arith.constant 0 : index
    %25 = vector.load %arg2[%c4_30, %c0_31, %c0_32] : memref<9x128x128xbf16, #tpu.memory_space<vmem>>, vector<1x128x128xbf16>
    %26 = vector.shape_cast %25 : vector<1x128x128xbf16> to vector<128x128xbf16>
    %cst_33 = arith.constant dense<0.000000e+00> : vector<16x128xf32>
    %27 = tpu.matmul %24, %26, %cst_33 {dimension_numbers = #tpu.dot_dimension_numbers<[1], [0], [0], [1], [0, 0, 1, 1], [], []>} : vector<16x128xbf16>, vector<128x128xbf16>, vector<16x128xf32> -> vector<16x128xf32>
    %28 = arith.addf %22, %27 : vector<16x128xf32>
    %c0_34 = arith.constant 0 : index
    %c5 = arith.constant 5 : index
    %c0_35 = arith.constant 0 : index
    %c0_36 = arith.constant 0 : index
    %29 = vector.load %arg1[%c0_34, %c5, %c0_35, %c0_36] : memref<1x6x20x128xbf16, #tpu.memory_space<vmem>>, vector<1x1x16x128xbf16>
    %30 = vector.shape_cast %29 : vector<1x1x16x128xbf16> to vector<16x128xbf16>
    %c5_37 = arith.constant 5 : index
    %c0_38 = arith.constant 0 : index
    %c0_39 = arith.constant 0 : index
    %31 = vector.load %arg2[%c5_37, %c0_38, %c0_39] : memref<9x128x128xbf16, #tpu.memory_space<vmem>>, vector<1x128x128xbf16>
    %32 = vector.shape_cast %31 : vector<1x128x128xbf16> to vector<128x128xbf16>
    %cst_40 = arith.constant dense<0.000000e+00> : vector<16x128xf32>
    %33 = tpu.matmul %30, %32, %cst_40 {dimension_numbers = #tpu.dot_dimension_numbers<[1], [0], [0], [1], [0, 0, 1, 1], [], []>} : vector<16x128xbf16>, vector<128x128xbf16>, vector<16x128xf32> -> vector<16x128xf32>
    %34 = arith.addf %28, %33 : vector<16x128xf32>
    %c0_41 = arith.constant 0 : index
    %c0_42 = arith.constant 0 : index
    %c4_43 = arith.constant 4 : index
    %c0_44 = arith.constant 0 : index
    %35 = vector.load %arg1[%c0_41, %c0_42, %c4_43, %c0_44] : memref<1x6x20x128xbf16, #tpu.memory_space<vmem>>, vector<1x1x16x128xbf16>
    %36 = vector.shape_cast %35 : vector<1x1x16x128xbf16> to vector<16x128xbf16>
    %c6 = arith.constant 6 : index
    %c0_45 = arith.constant 0 : index
    %c0_46 = arith.constant 0 : index
    %37 = vector.load %arg2[%c6, %c0_45, %c0_46] : memref<9x128x128xbf16, #tpu.memory_space<vmem>>, vector<1x128x128xbf16>
    %38 = vector.shape_cast %37 : vector<1x128x128xbf16> to vector<128x128xbf16>
    %cst_47 = arith.constant dense<0.000000e+00> : vector<16x128xf32>
    %39 = tpu.matmul %36, %38, %cst_47 {dimension_numbers = #tpu.dot_dimension_numbers<[1], [0], [0], [1], [0, 0, 1, 1], [], []>} : vector<16x128xbf16>, vector<128x128xbf16>, vector<16x128xf32> -> vector<16x128xf32>
    %40 = arith.addf %34, %39 : vector<16x128xf32>
    %c0_48 = arith.constant 0 : index
    %c2_49 = arith.constant 2 : index
    %c4_50 = arith.constant 4 : index
    %c0_51 = arith.constant 0 : index
    %41 = vector.load %arg1[%c0_48, %c2_49, %c4_50, %c0_51] : memref<1x6x20x128xbf16, #tpu.memory_space<vmem>>, vector<1x1x16x128xbf16>
    %42 = vector.shape_cast %41 : vector<1x1x16x128xbf16> to vector<16x128xbf16>
    %c7 = arith.constant 7 : index
    %c0_52 = arith.constant 0 : index
    %c0_53 = arith.constant 0 : index
    %43 = vector.load %arg2[%c7, %c0_52, %c0_53] : memref<9x128x128xbf16, #tpu.memory_space<vmem>>, vector<1x128x128xbf16>
    %44 = vector.shape_cast %43 : vector<1x128x128xbf16> to vector<128x128xbf16>
    %cst_54 = arith.constant dense<0.000000e+00> : vector<16x128xf32>
    %45 = tpu.matmul %42, %44, %cst_54 {dimension_numbers = #tpu.dot_dimension_numbers<[1], [0], [0], [1], [0, 0, 1, 1], [], []>} : vector<16x128xbf16>, vector<128x128xbf16>, vector<16x128xf32> -> vector<16x128xf32>
    %46 = arith.addf %40, %45 : vector<16x128xf32>
    %c0_55 = arith.constant 0 : index
    %c4_56 = arith.constant 4 : index
    %c4_57 = arith.constant 4 : index
    %c0_58 = arith.constant 0 : index
    %47 = vector.load %arg1[%c0_55, %c4_56, %c4_57, %c0_58] : memref<1x6x20x128xbf16, #tpu.memory_space<vmem>>, vector<1x1x16x128xbf16>
    %48 = vector.shape_cast %47 : vector<1x1x16x128xbf16> to vector<16x128xbf16>
    %c8 = arith.constant 8 : index
    %c0_59 = arith.constant 0 : index
    %c0_60 = arith.constant 0 : index
    %49 = vector.load %arg2[%c8, %c0_59, %c0_60] : memref<9x128x128xbf16, #tpu.memory_space<vmem>>, vector<1x128x128xbf16>
    %50 = vector.shape_cast %49 : vector<1x128x128xbf16> to vector<128x128xbf16>
    %cst_61 = arith.constant dense<0.000000e+00> : vector<16x128xf32>
    %51 = tpu.matmul %48, %50, %cst_61 {dimension_numbers = #tpu.dot_dimension_numbers<[1], [0], [0], [1], [0, 0, 1, 1], [], []>} : vector<16x128xbf16>, vector<128x128xbf16>, vector<16x128xf32> -> vector<16x128xf32>
    %52 = arith.addf %46, %51 : vector<16x128xf32>
    %c0_62 = arith.constant 0 : index
    %c0_63 = arith.constant 0 : index
    %53 = vector.load %arg3[%c0_62, %c0_63] : memref<1x128xf32, #tpu.memory_space<vmem>>, vector<1x128xf32>
    %54 = vector.broadcast %53 : vector<1x128xf32> to vector<16x128xf32>
    %55 = arith.addf %52, %54 : vector<16x128xf32>
    %cst_64 = arith.constant 0.000000e+00 : f32
    %56 = vector.broadcast %cst_64 : f32 to vector<16x128xf32>
    %57 = arith.maximumf %55, %56 : vector<16x128xf32>
    %58 = arith.truncf %57 : vector<16x128xf32> to vector<16x128xbf16>
    %c0_65 = arith.constant 0 : index
    %c0_66 = arith.constant 0 : index
    %c0_67 = arith.constant 0 : index
    %59 = vector.load %arg4[%c0_65, %c0_66, %c0_67] : memref<1x16x128xbf16, #tpu.memory_space<vmem>>, vector<1x16x128xbf16>
    %60 = vector.shape_cast %59 : vector<1x16x128xbf16> to vector<16x128xbf16>
    %61 = vector.shape_cast %58 : vector<16x128xbf16> to vector<1x16x128xbf16>
    tpu.vector_store %arg4[%c0_65, %c0_66, %c0_67], %61 {strides = array<i32>} : memref<1x16x128xbf16, #tpu.memory_space<vmem>>, vector<1x16x128xbf16>,
    return
  }
  func.func @transform_0(%arg0: i32) -> (i32, i32, i32, i32) {
    %c0_i32 = arith.constant 0 : i32
    %c0_i32_0 = arith.constant 0 : i32
    %c0_i32_1 = arith.constant 0 : i32
    %c0_i32_2 = arith.constant 0 : i32
    return %arg0, %c0_i32, %c0_i32_0, %c0_i32_1 : i32, i32, i32, i32
  }
  func.func @transform_1(%arg0: i32) -> (i32, i32, i32) {
    %c0_i32 = arith.constant 0 : i32
    %c0_i32_0 = arith.constant 0 : i32
    %c0_i32_1 = arith.constant 0 : i32
    %c0_i32_2 = arith.constant 0 : i32
    return %c0_i32, %c0_i32_0, %c0_i32_1 : i32, i32, i32
  }
  func.func @transform_2(%arg0: i32) -> (i32, i32) {
    %c0_i32 = arith.constant 0 : i32
    %c0_i32_0 = arith.constant 0 : i32
    %c0_i32_1 = arith.constant 0 : i32
    return %c0_i32, %c0_i32_0 : i32, i32
  }
  func.func @transform_3(%arg0: i32) -> (i32, i32, i32) {
    %c0_i32 = arith.constant 0 : i32
    %c0_i32_0 = arith.constant 0 : i32
    %c0_i32_1 = arith.constant 0 : i32
    return %arg0, %c0_i32, %c0_i32_0 : i32, i32, i32
  }
}

module attributes {stable_mosaic.version = 11 : i64} {
  func.func @_conv_kernel(%arg0: i32, %arg1: i32, %arg2: memref<1x1x16x128xbf16, #tpu.memory_space<vmem>>, %arg3: memref<1x128x128xbf16, #tpu.memory_space<vmem>>, %arg4: memref<1x128xf32, #tpu.memory_space<vmem>>, %arg5: memref<1x16x128xbf16, #tpu.memory_space<vmem>>) attributes {dimension_semantics = [#tpu.dimension_semantics<parallel>, #tpu.dimension_semantics<parallel>], iteration_bounds = array<i64: 2, 1>, scalar_prefetch = 0 : i64, scratch_operands = 0 : i64, tpu.core_type = #tpu.core_type<tc>, window_params = [{transform_indices = @transform_0, window_bounds = array<i64: 1, 1, 16, 128>}, {pipeline_mode = #tpu.pipeline_mode<synchronous>, transform_indices = @transform_1, window_bounds = array<i64: 1, 128, 128>}, {pipeline_mode = #tpu.pipeline_mode<synchronous>, transform_indices = @transform_2, window_bounds = array<i64: 1, 128>}, {transform_indices = @transform_3, window_bounds = array<i64: 1, 16, 128>}]} {
    %c0 = arith.constant 0 : index
    %c0_0 = arith.constant 0 : index
    %c0_1 = arith.constant 0 : index
    %c0_2 = arith.constant 0 : index
    %0 = vector.load %arg2[%c0, %c0_0, %c0_1, %c0_2] : memref<1x1x16x128xbf16, #tpu.memory_space<vmem>>, vector<1x1x16x128xbf16>
    %1 = vector.shape_cast %0 : vector<1x1x16x128xbf16> to vector<16x128xbf16>
    %c0_3 = arith.constant 0 : index
    %c0_4 = arith.constant 0 : index
    %c0_5 = arith.constant 0 : index
    %2 = vector.load %arg3[%c0_3, %c0_4, %c0_5] : memref<1x128x128xbf16, #tpu.memory_space<vmem>>, vector<1x128x128xbf16>
    %3 = vector.shape_cast %2 : vector<1x128x128xbf16> to vector<128x128xbf16>
    %cst = arith.constant dense<0.000000e+00> : vector<16x128xf32>
    %4 = tpu.matmul %1, %3, %cst {dimension_numbers = #tpu.dot_dimension_numbers<[1], [0], [0], [1], [0, 0, 1, 1], [], []>} : vector<16x128xbf16>, vector<128x128xbf16>, vector<16x128xf32> -> vector<16x128xf32>
    %c0_6 = arith.constant 0 : index
    %c0_7 = arith.constant 0 : index
    %5 = vector.load %arg4[%c0_6, %c0_7] : memref<1x128xf32, #tpu.memory_space<vmem>>, vector<1x128xf32>
    %6 = vector.broadcast %5 : vector<1x128xf32> to vector<16x128xf32>
    %7 = arith.addf %4, %6 : vector<16x128xf32>
    %cst_8 = arith.constant 0.000000e+00 : f32
    %8 = vector.broadcast %cst_8 : f32 to vector<16x128xf32>
    %9 = arith.maximumf %7, %8 : vector<16x128xf32>
    %10 = arith.truncf %9 : vector<16x128xf32> to vector<16x128xbf16>
    %c0_9 = arith.constant 0 : index
    %c0_10 = arith.constant 0 : index
    %c0_11 = arith.constant 0 : index
    %11 = vector.load %arg5[%c0_9, %c0_10, %c0_11] : memref<1x16x128xbf16, #tpu.memory_space<vmem>>, vector<1x16x128xbf16>
    %12 = vector.shape_cast %11 : vector<1x16x128xbf16> to vector<16x128xbf16>
    %13 = vector.shape_cast %10 : vector<16x128xbf16> to vector<1x16x128xbf16>
    tpu.vector_store %arg5[%c0_9, %c0_10, %c0_11], %13 {strides = array<i32>} : memref<1x16x128xbf16, #tpu.memory_space<vmem>>, vector<1x16x128xbf16>,
    return
  }
  func.func @transform_0(%arg0: i32, %arg1: i32) -> (i32, i32, i32, i32) {
    %c0_i32 = arith.constant 0 : i32
    %c0_i32_0 = arith.constant 0 : i32
    %c0_i32_1 = arith.constant 0 : i32
    return %arg0, %c0_i32, %arg1, %c0_i32_0 : i32, i32, i32, i32
  }
  func.func @transform_1(%arg0: i32, %arg1: i32) -> (i32, i32, i32) {
    %c0_i32 = arith.constant 0 : i32
    %c0_i32_0 = arith.constant 0 : i32
    %c0_i32_1 = arith.constant 0 : i32
    %c0_i32_2 = arith.constant 0 : i32
    return %c0_i32, %c0_i32_0, %c0_i32_1 : i32, i32, i32
  }
  func.func @transform_2(%arg0: i32, %arg1: i32) -> (i32, i32) {
    %c0_i32 = arith.constant 0 : i32
    %c0_i32_0 = arith.constant 0 : i32
    %c0_i32_1 = arith.constant 0 : i32
    return %c0_i32, %c0_i32_0 : i32, i32
  }
  func.func @transform_3(%arg0: i32, %arg1: i32) -> (i32, i32, i32) {
    %c0_i32 = arith.constant 0 : i32
    %c0_i32_0 = arith.constant 0 : i32
    return %arg0, %arg1, %c0_i32 : i32, i32, i32
  }
}

module attributes {stable_mosaic.version = 11 : i64} {
  func.func @_conv_kernel(%arg0: i32, %arg1: i32, %arg2: memref<1x1x16x128xbf16, #tpu.memory_space<vmem>>, %arg3: memref<1x128x128xbf16, #tpu.memory_space<vmem>>, %arg4: memref<1x128xf32, #tpu.memory_space<vmem>>, %arg5: memref<1x16x128xbf16, #tpu.memory_space<vmem>>, %arg6: memref<1x16x128xbf16, #tpu.memory_space<vmem>>) attributes {dimension_semantics = [#tpu.dimension_semantics<parallel>, #tpu.dimension_semantics<parallel>], iteration_bounds = array<i64: 2, 1>, scalar_prefetch = 0 : i64, scratch_operands = 0 : i64, tpu.core_type = #tpu.core_type<tc>, window_params = [{transform_indices = @transform_0, window_bounds = array<i64: 1, 1, 16, 128>}, {pipeline_mode = #tpu.pipeline_mode<synchronous>, transform_indices = @transform_1, window_bounds = array<i64: 1, 128, 128>}, {pipeline_mode = #tpu.pipeline_mode<synchronous>, transform_indices = @transform_2, window_bounds = array<i64: 1, 128>}, {transform_indices = @transform_3, window_bounds = array<i64: 1, 16, 128>}, {transform_indices = @transform_4, window_bounds = array<i64: 1, 16, 128>}]} {
    %c0 = arith.constant 0 : index
    %c0_0 = arith.constant 0 : index
    %c0_1 = arith.constant 0 : index
    %c0_2 = arith.constant 0 : index
    %0 = vector.load %arg2[%c0, %c0_0, %c0_1, %c0_2] : memref<1x1x16x128xbf16, #tpu.memory_space<vmem>>, vector<1x1x16x128xbf16>
    %1 = vector.shape_cast %0 : vector<1x1x16x128xbf16> to vector<16x128xbf16>
    %c0_3 = arith.constant 0 : index
    %c0_4 = arith.constant 0 : index
    %c0_5 = arith.constant 0 : index
    %2 = vector.load %arg3[%c0_3, %c0_4, %c0_5] : memref<1x128x128xbf16, #tpu.memory_space<vmem>>, vector<1x128x128xbf16>
    %3 = vector.shape_cast %2 : vector<1x128x128xbf16> to vector<128x128xbf16>
    %cst = arith.constant dense<0.000000e+00> : vector<16x128xf32>
    %4 = tpu.matmul %1, %3, %cst {dimension_numbers = #tpu.dot_dimension_numbers<[1], [0], [0], [1], [0, 0, 1, 1], [], []>} : vector<16x128xbf16>, vector<128x128xbf16>, vector<16x128xf32> -> vector<16x128xf32>
    %c0_6 = arith.constant 0 : index
    %c0_7 = arith.constant 0 : index
    %5 = vector.load %arg4[%c0_6, %c0_7] : memref<1x128xf32, #tpu.memory_space<vmem>>, vector<1x128xf32>
    %6 = vector.broadcast %5 : vector<1x128xf32> to vector<16x128xf32>
    %7 = arith.addf %4, %6 : vector<16x128xf32>
    %c0_8 = arith.constant 0 : index
    %c0_9 = arith.constant 0 : index
    %c0_10 = arith.constant 0 : index
    %8 = vector.load %arg5[%c0_8, %c0_9, %c0_10] : memref<1x16x128xbf16, #tpu.memory_space<vmem>>, vector<1x16x128xbf16>
    %9 = vector.shape_cast %8 : vector<1x16x128xbf16> to vector<16x128xbf16>
    %10 = arith.extf %9 : vector<16x128xbf16> to vector<16x128xf32>
    %11 = arith.addf %7, %10 : vector<16x128xf32>
    %cst_11 = arith.constant 0.000000e+00 : f32
    %12 = vector.broadcast %cst_11 : f32 to vector<16x128xf32>
    %13 = arith.maximumf %11, %12 : vector<16x128xf32>
    %14 = arith.truncf %13 : vector<16x128xf32> to vector<16x128xbf16>
    %c0_12 = arith.constant 0 : index
    %c0_13 = arith.constant 0 : index
    %c0_14 = arith.constant 0 : index
    %15 = vector.load %arg6[%c0_12, %c0_13, %c0_14] : memref<1x16x128xbf16, #tpu.memory_space<vmem>>, vector<1x16x128xbf16>
    %16 = vector.shape_cast %15 : vector<1x16x128xbf16> to vector<16x128xbf16>
    %17 = vector.shape_cast %14 : vector<16x128xbf16> to vector<1x16x128xbf16>
    tpu.vector_store %arg6[%c0_12, %c0_13, %c0_14], %17 {strides = array<i32>} : memref<1x16x128xbf16, #tpu.memory_space<vmem>>, vector<1x16x128xbf16>,
    return
  }
  func.func @transform_0(%arg0: i32, %arg1: i32) -> (i32, i32, i32, i32) {
    %c0_i32 = arith.constant 0 : i32
    %c0_i32_0 = arith.constant 0 : i32
    %c0_i32_1 = arith.constant 0 : i32
    return %arg0, %c0_i32, %arg1, %c0_i32_0 : i32, i32, i32, i32
  }
  func.func @transform_1(%arg0: i32, %arg1: i32) -> (i32, i32, i32) {
    %c0_i32 = arith.constant 0 : i32
    %c0_i32_0 = arith.constant 0 : i32
    %c0_i32_1 = arith.constant 0 : i32
    %c0_i32_2 = arith.constant 0 : i32
    return %c0_i32, %c0_i32_0, %c0_i32_1 : i32, i32, i32
  }
  func.func @transform_2(%arg0: i32, %arg1: i32) -> (i32, i32) {
    %c0_i32 = arith.constant 0 : i32
    %c0_i32_0 = arith.constant 0 : i32
    %c0_i32_1 = arith.constant 0 : i32
    return %c0_i32, %c0_i32_0 : i32, i32
  }
  func.func @transform_3(%arg0: i32, %arg1: i32) -> (i32, i32, i32) {
    %c0_i32 = arith.constant 0 : i32
    %c0_i32_0 = arith.constant 0 : i32
    return %arg0, %arg1, %c0_i32 : i32, i32, i32
  }
  func.func @transform_4(%arg0: i32, %arg1: i32) -> (i32, i32, i32) {
    %c0_i32 = arith.constant 0 : i32
    %c0_i32_0 = arith.constant 0 : i32
    return %arg0, %arg1, %c0_i32 : i32, i32, i32
  }
}

module attributes {stable_mosaic.version = 11 : i64} {
  func.func @_conv_kernel(%arg0: i32, %arg1: i32, %arg2: memref<1x1x16x128xbf16, #tpu.memory_space<vmem>>, %arg3: memref<1x128x128xbf16, #tpu.memory_space<vmem>>, %arg4: memref<1x128xf32, #tpu.memory_space<vmem>>, %arg5: memref<1x16x128xbf16, #tpu.memory_space<vmem>>) attributes {dimension_semantics = [#tpu.dimension_semantics<parallel>, #tpu.dimension_semantics<parallel>], iteration_bounds = array<i64: 2, 1>, scalar_prefetch = 0 : i64, scratch_operands = 0 : i64, tpu.core_type = #tpu.core_type<tc>, window_params = [{transform_indices = @transform_0, window_bounds = array<i64: 1, 1, 16, 128>}, {pipeline_mode = #tpu.pipeline_mode<synchronous>, transform_indices = @transform_1, window_bounds = array<i64: 1, 128, 128>}, {pipeline_mode = #tpu.pipeline_mode<synchronous>, transform_indices = @transform_2, window_bounds = array<i64: 1, 128>}, {transform_indices = @transform_3, window_bounds = array<i64: 1, 16, 128>}]} {
    %c0 = arith.constant 0 : index
    %c0_0 = arith.constant 0 : index
    %c0_1 = arith.constant 0 : index
    %c0_2 = arith.constant 0 : index
    %0 = vector.load %arg2[%c0, %c0_0, %c0_1, %c0_2] : memref<1x1x16x128xbf16, #tpu.memory_space<vmem>>, vector<1x1x16x128xbf16>
    %1 = vector.shape_cast %0 : vector<1x1x16x128xbf16> to vector<16x128xbf16>
    %c0_3 = arith.constant 0 : index
    %c0_4 = arith.constant 0 : index
    %c0_5 = arith.constant 0 : index
    %2 = vector.load %arg3[%c0_3, %c0_4, %c0_5] : memref<1x128x128xbf16, #tpu.memory_space<vmem>>, vector<1x128x128xbf16>
    %3 = vector.shape_cast %2 : vector<1x128x128xbf16> to vector<128x128xbf16>
    %cst = arith.constant dense<0.000000e+00> : vector<16x128xf32>
    %4 = tpu.matmul %1, %3, %cst {dimension_numbers = #tpu.dot_dimension_numbers<[1], [0], [0], [1], [0, 0, 1, 1], [], []>} : vector<16x128xbf16>, vector<128x128xbf16>, vector<16x128xf32> -> vector<16x128xf32>
    %c0_6 = arith.constant 0 : index
    %c0_7 = arith.constant 0 : index
    %5 = vector.load %arg4[%c0_6, %c0_7] : memref<1x128xf32, #tpu.memory_space<vmem>>, vector<1x128xf32>
    %6 = vector.broadcast %5 : vector<1x128xf32> to vector<16x128xf32>
    %7 = arith.addf %4, %6 : vector<16x128xf32>
    %8 = arith.truncf %7 : vector<16x128xf32> to vector<16x128xbf16>
    %c0_8 = arith.constant 0 : index
    %c0_9 = arith.constant 0 : index
    %c0_10 = arith.constant 0 : index
    %9 = vector.load %arg5[%c0_8, %c0_9, %c0_10] : memref<1x16x128xbf16, #tpu.memory_space<vmem>>, vector<1x16x128xbf16>
    %10 = vector.shape_cast %9 : vector<1x16x128xbf16> to vector<16x128xbf16>
    %11 = vector.shape_cast %8 : vector<16x128xbf16> to vector<1x16x128xbf16>
    tpu.vector_store %arg5[%c0_8, %c0_9, %c0_10], %11 {strides = array<i32>} : memref<1x16x128xbf16, #tpu.memory_space<vmem>>, vector<1x16x128xbf16>,
    return
  }
  func.func @transform_0(%arg0: i32, %arg1: i32) -> (i32, i32, i32, i32) {
    %c0_i32 = arith.constant 0 : i32
    %c0_i32_0 = arith.constant 0 : i32
    %c0_i32_1 = arith.constant 0 : i32
    return %arg0, %c0_i32, %arg1, %c0_i32_0 : i32, i32, i32, i32
  }
  func.func @transform_1(%arg0: i32, %arg1: i32) -> (i32, i32, i32) {
    %c0_i32 = arith.constant 0 : i32
    %c0_i32_0 = arith.constant 0 : i32
    %c0_i32_1 = arith.constant 0 : i32
    %c0_i32_2 = arith.constant 0 : i32
    return %c0_i32, %c0_i32_0, %c0_i32_1 : i32, i32, i32
  }
  func.func @transform_2(%arg0: i32, %arg1: i32) -> (i32, i32) {
    %c0_i32 = arith.constant 0 : i32
    %c0_i32_0 = arith.constant 0 : i32
    %c0_i32_1 = arith.constant 0 : i32
    return %c0_i32, %c0_i32_0 : i32, i32
  }
  func.func @transform_3(%arg0: i32, %arg1: i32) -> (i32, i32, i32) {
    %c0_i32 = arith.constant 0 : i32
    %c0_i32_0 = arith.constant 0 : i32
    return %arg0, %arg1, %c0_i32 : i32, i32, i32
  }
}

module attributes {stable_mosaic.version = 11 : i64} {
  func.func @_conv_kernel(%arg0: i32, %arg1: memref<1x6x6x128xbf16, #tpu.memory_space<vmem>>, %arg2: memref<9x128x128xbf16, #tpu.memory_space<vmem>>, %arg3: memref<1x128xf32, #tpu.memory_space<vmem>>, %arg4: memref<1x4x128xbf16, #tpu.memory_space<vmem>>) attributes {dimension_semantics = [#tpu.dimension_semantics<parallel>], iteration_bounds = array<i64: 2>, scalar_prefetch = 0 : i64, scratch_operands = 0 : i64, tpu.core_type = #tpu.core_type<tc>, window_params = [{transform_indices = @transform_0, window_bounds = array<i64: 1, 6, 6, 128>}, {pipeline_mode = #tpu.pipeline_mode<synchronous>, transform_indices = @transform_1, window_bounds = array<i64: 9, 128, 128>}, {pipeline_mode = #tpu.pipeline_mode<synchronous>, transform_indices = @transform_2, window_bounds = array<i64: 1, 128>}, {transform_indices = @transform_3, window_bounds = array<i64: 1, 4, 128>}]} {
    %c0 = arith.constant 0 : index
    %c0_0 = arith.constant 0 : index
    %c0_1 = arith.constant 0 : index
    %c0_2 = arith.constant 0 : index
    %0 = vector.load %arg1[%c0, %c0_0, %c0_1, %c0_2] : memref<1x6x6x128xbf16, #tpu.memory_space<vmem>>, vector<1x1x4x128xbf16>
    %1 = vector.shape_cast %0 : vector<1x1x4x128xbf16> to vector<4x128xbf16>
    %c0_3 = arith.constant 0 : index
    %c0_4 = arith.constant 0 : index
    %c0_5 = arith.constant 0 : index
    %2 = vector.load %arg2[%c0_3, %c0_4, %c0_5] : memref<9x128x128xbf16, #tpu.memory_space<vmem>>, vector<1x128x128xbf16>
    %3 = vector.shape_cast %2 : vector<1x128x128xbf16> to vector<128x128xbf16>
    %cst = arith.constant dense<0.000000e+00> : vector<4x128xf32>
    %4 = tpu.matmul %1, %3, %cst {dimension_numbers = #tpu.dot_dimension_numbers<[1], [0], [0], [1], [0, 0, 1, 1], [], []>} : vector<4x128xbf16>, vector<128x128xbf16>, vector<4x128xf32> -> vector<4x128xf32>
    %c0_6 = arith.constant 0 : index
    %c2 = arith.constant 2 : index
    %c0_7 = arith.constant 0 : index
    %c0_8 = arith.constant 0 : index
    %5 = vector.load %arg1[%c0_6, %c2, %c0_7, %c0_8] : memref<1x6x6x128xbf16, #tpu.memory_space<vmem>>, vector<1x1x4x128xbf16>
    %6 = vector.shape_cast %5 : vector<1x1x4x128xbf16> to vector<4x128xbf16>
    %c1 = arith.constant 1 : index
    %c0_9 = arith.constant 0 : index
    %c0_10 = arith.constant 0 : index
    %7 = vector.load %arg2[%c1, %c0_9, %c0_10] : memref<9x128x128xbf16, #tpu.memory_space<vmem>>, vector<1x128x128xbf16>
    %8 = vector.shape_cast %7 : vector<1x128x128xbf16> to vector<128x128xbf16>
    %cst_11 = arith.constant dense<0.000000e+00> : vector<4x128xf32>
    %9 = tpu.matmul %6, %8, %cst_11 {dimension_numbers = #tpu.dot_dimension_numbers<[1], [0], [0], [1], [0, 0, 1, 1], [], []>} : vector<4x128xbf16>, vector<128x128xbf16>, vector<4x128xf32> -> vector<4x128xf32>
    %10 = arith.addf %4, %9 : vector<4x128xf32>
    %c0_12 = arith.constant 0 : index
    %c4 = arith.constant 4 : index
    %c0_13 = arith.constant 0 : index
    %c0_14 = arith.constant 0 : index
    %11 = vector.load %arg1[%c0_12, %c4, %c0_13, %c0_14] : memref<1x6x6x128xbf16, #tpu.memory_space<vmem>>, vector<1x1x4x128xbf16>
    %12 = vector.shape_cast %11 : vector<1x1x4x128xbf16> to vector<4x128xbf16>
    %c2_15 = arith.constant 2 : index
    %c0_16 = arith.constant 0 : index
    %c0_17 = arith.constant 0 : index
    %13 = vector.load %arg2[%c2_15, %c0_16, %c0_17] : memref<9x128x128xbf16, #tpu.memory_space<vmem>>, vector<1x128x128xbf16>
    %14 = vector.shape_cast %13 : vector<1x128x128xbf16> to vector<128x128xbf16>
    %cst_18 = arith.constant dense<0.000000e+00> : vector<4x128xf32>
    %15 = tpu.matmul %12, %14, %cst_18 {dimension_numbers = #tpu.dot_dimension_numbers<[1], [0], [0], [1], [0, 0, 1, 1], [], []>} : vector<4x128xbf16>, vector<128x128xbf16>, vector<4x128xf32> -> vector<4x128xf32>
    %16 = arith.addf %10, %15 : vector<4x128xf32>
    %c0_19 = arith.constant 0 : index
    %c1_20 = arith.constant 1 : index
    %c0_21 = arith.constant 0 : index
    %c0_22 = arith.constant 0 : index
    %17 = vector.load %arg1[%c0_19, %c1_20, %c0_21, %c0_22] : memref<1x6x6x128xbf16, #tpu.memory_space<vmem>>, vector<1x1x4x128xbf16>
    %18 = vector.shape_cast %17 : vector<1x1x4x128xbf16> to vector<4x128xbf16>
    %c3 = arith.constant 3 : index
    %c0_23 = arith.constant 0 : index
    %c0_24 = arith.constant 0 : index
    %19 = vector.load %arg2[%c3, %c0_23, %c0_24] : memref<9x128x128xbf16, #tpu.memory_space<vmem>>, vector<1x128x128xbf16>
    %20 = vector.shape_cast %19 : vector<1x128x128xbf16> to vector<128x128xbf16>
    %cst_25 = arith.constant dense<0.000000e+00> : vector<4x128xf32>
    %21 = tpu.matmul %18, %20, %cst_25 {dimension_numbers = #tpu.dot_dimension_numbers<[1], [0], [0], [1], [0, 0, 1, 1], [], []>} : vector<4x128xbf16>, vector<128x128xbf16>, vector<4x128xf32> -> vector<4x128xf32>
    %22 = arith.addf %16, %21 : vector<4x128xf32>
    %c0_26 = arith.constant 0 : index
    %c3_27 = arith.constant 3 : index
    %c0_28 = arith.constant 0 : index
    %c0_29 = arith.constant 0 : index
    %23 = vector.load %arg1[%c0_26, %c3_27, %c0_28, %c0_29] : memref<1x6x6x128xbf16, #tpu.memory_space<vmem>>, vector<1x1x4x128xbf16>
    %24 = vector.shape_cast %23 : vector<1x1x4x128xbf16> to vector<4x128xbf16>
    %c4_30 = arith.constant 4 : index
    %c0_31 = arith.constant 0 : index
    %c0_32 = arith.constant 0 : index
    %25 = vector.load %arg2[%c4_30, %c0_31, %c0_32] : memref<9x128x128xbf16, #tpu.memory_space<vmem>>, vector<1x128x128xbf16>
    %26 = vector.shape_cast %25 : vector<1x128x128xbf16> to vector<128x128xbf16>
    %cst_33 = arith.constant dense<0.000000e+00> : vector<4x128xf32>
    %27 = tpu.matmul %24, %26, %cst_33 {dimension_numbers = #tpu.dot_dimension_numbers<[1], [0], [0], [1], [0, 0, 1, 1], [], []>} : vector<4x128xbf16>, vector<128x128xbf16>, vector<4x128xf32> -> vector<4x128xf32>
    %28 = arith.addf %22, %27 : vector<4x128xf32>
    %c0_34 = arith.constant 0 : index
    %c5 = arith.constant 5 : index
    %c0_35 = arith.constant 0 : index
    %c0_36 = arith.constant 0 : index
    %29 = vector.load %arg1[%c0_34, %c5, %c0_35, %c0_36] : memref<1x6x6x128xbf16, #tpu.memory_space<vmem>>, vector<1x1x4x128xbf16>
    %30 = vector.shape_cast %29 : vector<1x1x4x128xbf16> to vector<4x128xbf16>
    %c5_37 = arith.constant 5 : index
    %c0_38 = arith.constant 0 : index
    %c0_39 = arith.constant 0 : index
    %31 = vector.load %arg2[%c5_37, %c0_38, %c0_39] : memref<9x128x128xbf16, #tpu.memory_space<vmem>>, vector<1x128x128xbf16>
    %32 = vector.shape_cast %31 : vector<1x128x128xbf16> to vector<128x128xbf16>
    %cst_40 = arith.constant dense<0.000000e+00> : vector<4x128xf32>
    %33 = tpu.matmul %30, %32, %cst_40 {dimension_numbers = #tpu.dot_dimension_numbers<[1], [0], [0], [1], [0, 0, 1, 1], [], []>} : vector<4x128xbf16>, vector<128x128xbf16>, vector<4x128xf32> -> vector<4x128xf32>
    %34 = arith.addf %28, %33 : vector<4x128xf32>
    %c0_41 = arith.constant 0 : index
    %c0_42 = arith.constant 0 : index
    %c2_43 = arith.constant 2 : index
    %c0_44 = arith.constant 0 : index
    %35 = vector.load %arg1[%c0_41, %c0_42, %c2_43, %c0_44] : memref<1x6x6x128xbf16, #tpu.memory_space<vmem>>, vector<1x1x4x128xbf16>
    %36 = vector.shape_cast %35 : vector<1x1x4x128xbf16> to vector<4x128xbf16>
    %c6 = arith.constant 6 : index
    %c0_45 = arith.constant 0 : index
    %c0_46 = arith.constant 0 : index
    %37 = vector.load %arg2[%c6, %c0_45, %c0_46] : memref<9x128x128xbf16, #tpu.memory_space<vmem>>, vector<1x128x128xbf16>
    %38 = vector.shape_cast %37 : vector<1x128x128xbf16> to vector<128x128xbf16>
    %cst_47 = arith.constant dense<0.000000e+00> : vector<4x128xf32>
    %39 = tpu.matmul %36, %38, %cst_47 {dimension_numbers = #tpu.dot_dimension_numbers<[1], [0], [0], [1], [0, 0, 1, 1], [], []>} : vector<4x128xbf16>, vector<128x128xbf16>, vector<4x128xf32> -> vector<4x128xf32>
    %40 = arith.addf %34, %39 : vector<4x128xf32>
    %c0_48 = arith.constant 0 : index
    %c2_49 = arith.constant 2 : index
    %c2_50 = arith.constant 2 : index
    %c0_51 = arith.constant 0 : index
    %41 = vector.load %arg1[%c0_48, %c2_49, %c2_50, %c0_51] : memref<1x6x6x128xbf16, #tpu.memory_space<vmem>>, vector<1x1x4x128xbf16>
    %42 = vector.shape_cast %41 : vector<1x1x4x128xbf16> to vector<4x128xbf16>
    %c7 = arith.constant 7 : index
    %c0_52 = arith.constant 0 : index
    %c0_53 = arith.constant 0 : index
    %43 = vector.load %arg2[%c7, %c0_52, %c0_53] : memref<9x128x128xbf16, #tpu.memory_space<vmem>>, vector<1x128x128xbf16>
    %44 = vector.shape_cast %43 : vector<1x128x128xbf16> to vector<128x128xbf16>
    %cst_54 = arith.constant dense<0.000000e+00> : vector<4x128xf32>
    %45 = tpu.matmul %42, %44, %cst_54 {dimension_numbers = #tpu.dot_dimension_numbers<[1], [0], [0], [1], [0, 0, 1, 1], [], []>} : vector<4x128xbf16>, vector<128x128xbf16>, vector<4x128xf32> -> vector<4x128xf32>
    %46 = arith.addf %40, %45 : vector<4x128xf32>
    %c0_55 = arith.constant 0 : index
    %c4_56 = arith.constant 4 : index
    %c2_57 = arith.constant 2 : index
    %c0_58 = arith.constant 0 : index
    %47 = vector.load %arg1[%c0_55, %c4_56, %c2_57, %c0_58] : memref<1x6x6x128xbf16, #tpu.memory_space<vmem>>, vector<1x1x4x128xbf16>
    %48 = vector.shape_cast %47 : vector<1x1x4x128xbf16> to vector<4x128xbf16>
    %c8 = arith.constant 8 : index
    %c0_59 = arith.constant 0 : index
    %c0_60 = arith.constant 0 : index
    %49 = vector.load %arg2[%c8, %c0_59, %c0_60] : memref<9x128x128xbf16, #tpu.memory_space<vmem>>, vector<1x128x128xbf16>
    %50 = vector.shape_cast %49 : vector<1x128x128xbf16> to vector<128x128xbf16>
    %cst_61 = arith.constant dense<0.000000e+00> : vector<4x128xf32>
    %51 = tpu.matmul %48, %50, %cst_61 {dimension_numbers = #tpu.dot_dimension_numbers<[1], [0], [0], [1], [0, 0, 1, 1], [], []>} : vector<4x128xbf16>, vector<128x128xbf16>, vector<4x128xf32> -> vector<4x128xf32>
    %52 = arith.addf %46, %51 : vector<4x128xf32>
    %c0_62 = arith.constant 0 : index
    %c0_63 = arith.constant 0 : index
    %53 = vector.load %arg3[%c0_62, %c0_63] : memref<1x128xf32, #tpu.memory_space<vmem>>, vector<1x128xf32>
    %54 = vector.broadcast %53 : vector<1x128xf32> to vector<4x128xf32>
    %55 = arith.addf %52, %54 : vector<4x128xf32>
    %cst_64 = arith.constant 0.000000e+00 : f32
    %56 = vector.broadcast %cst_64 : f32 to vector<4x128xf32>
    %57 = arith.maximumf %55, %56 : vector<4x128xf32>
    %58 = arith.truncf %57 : vector<4x128xf32> to vector<4x128xbf16>
    %c0_65 = arith.constant 0 : index
    %c0_66 = arith.constant 0 : index
    %c0_67 = arith.constant 0 : index
    %59 = vector.load %arg4[%c0_65, %c0_66, %c0_67] : memref<1x4x128xbf16, #tpu.memory_space<vmem>>, vector<1x4x128xbf16>
    %60 = vector.shape_cast %59 : vector<1x4x128xbf16> to vector<4x128xbf16>
    %61 = vector.shape_cast %58 : vector<4x128xbf16> to vector<1x4x128xbf16>
    tpu.vector_store %arg4[%c0_65, %c0_66, %c0_67], %61 {strides = array<i32>} : memref<1x4x128xbf16, #tpu.memory_space<vmem>>, vector<1x4x128xbf16>,
    return
  }
  func.func @transform_0(%arg0: i32) -> (i32, i32, i32, i32) {
    %c0_i32 = arith.constant 0 : i32
    %c0_i32_0 = arith.constant 0 : i32
    %c0_i32_1 = arith.constant 0 : i32
    %c0_i32_2 = arith.constant 0 : i32
    return %arg0, %c0_i32, %c0_i32_0, %c0_i32_1 : i32, i32, i32, i32
  }
  func.func @transform_1(%arg0: i32) -> (i32, i32, i32) {
    %c0_i32 = arith.constant 0 : i32
    %c0_i32_0 = arith.constant 0 : i32
    %c0_i32_1 = arith.constant 0 : i32
    %c0_i32_2 = arith.constant 0 : i32
    return %c0_i32, %c0_i32_0, %c0_i32_1 : i32, i32, i32
  }
  func.func @transform_2(%arg0: i32) -> (i32, i32) {
    %c0_i32 = arith.constant 0 : i32
    %c0_i32_0 = arith.constant 0 : i32
    %c0_i32_1 = arith.constant 0 : i32
    return %c0_i32, %c0_i32_0 : i32, i32
  }
  func.func @transform_3(%arg0: i32) -> (i32, i32, i32) {
    %c0_i32 = arith.constant 0 : i32
    %c0_i32_0 = arith.constant 0 : i32
    %c0_i32_1 = arith.constant 0 : i32
    return %arg0, %c0_i32, %c0_i32_0 : i32, i32, i32
  }
}

module attributes {stable_mosaic.version = 11 : i64} {
  func.func @_conv_kernel(%arg0: i32, %arg1: i32, %arg2: memref<1x1x4x128xbf16, #tpu.memory_space<vmem>>, %arg3: memref<1x128x128xbf16, #tpu.memory_space<vmem>>, %arg4: memref<1x128xf32, #tpu.memory_space<vmem>>, %arg5: memref<1x4x128xbf16, #tpu.memory_space<vmem>>) attributes {dimension_semantics = [#tpu.dimension_semantics<parallel>, #tpu.dimension_semantics<parallel>], iteration_bounds = array<i64: 2, 1>, scalar_prefetch = 0 : i64, scratch_operands = 0 : i64, tpu.core_type = #tpu.core_type<tc>, window_params = [{transform_indices = @transform_0, window_bounds = array<i64: 1, 1, 4, 128>}, {pipeline_mode = #tpu.pipeline_mode<synchronous>, transform_indices = @transform_1, window_bounds = array<i64: 1, 128, 128>}, {pipeline_mode = #tpu.pipeline_mode<synchronous>, transform_indices = @transform_2, window_bounds = array<i64: 1, 128>}, {transform_indices = @transform_3, window_bounds = array<i64: 1, 4, 128>}]} {
    %c0 = arith.constant 0 : index
    %c0_0 = arith.constant 0 : index
    %c0_1 = arith.constant 0 : index
    %c0_2 = arith.constant 0 : index
    %0 = vector.load %arg2[%c0, %c0_0, %c0_1, %c0_2] : memref<1x1x4x128xbf16, #tpu.memory_space<vmem>>, vector<1x1x4x128xbf16>
    %1 = vector.shape_cast %0 : vector<1x1x4x128xbf16> to vector<4x128xbf16>
    %c0_3 = arith.constant 0 : index
    %c0_4 = arith.constant 0 : index
    %c0_5 = arith.constant 0 : index
    %2 = vector.load %arg3[%c0_3, %c0_4, %c0_5] : memref<1x128x128xbf16, #tpu.memory_space<vmem>>, vector<1x128x128xbf16>
    %3 = vector.shape_cast %2 : vector<1x128x128xbf16> to vector<128x128xbf16>
    %cst = arith.constant dense<0.000000e+00> : vector<4x128xf32>
    %4 = tpu.matmul %1, %3, %cst {dimension_numbers = #tpu.dot_dimension_numbers<[1], [0], [0], [1], [0, 0, 1, 1], [], []>} : vector<4x128xbf16>, vector<128x128xbf16>, vector<4x128xf32> -> vector<4x128xf32>
    %c0_6 = arith.constant 0 : index
    %c0_7 = arith.constant 0 : index
    %5 = vector.load %arg4[%c0_6, %c0_7] : memref<1x128xf32, #tpu.memory_space<vmem>>, vector<1x128xf32>
    %6 = vector.broadcast %5 : vector<1x128xf32> to vector<4x128xf32>
    %7 = arith.addf %4, %6 : vector<4x128xf32>
    %8 = arith.truncf %7 : vector<4x128xf32> to vector<4x128xbf16>
    %c0_8 = arith.constant 0 : index
    %c0_9 = arith.constant 0 : index
    %c0_10 = arith.constant 0 : index
    %9 = vector.load %arg5[%c0_8, %c0_9, %c0_10] : memref<1x4x128xbf16, #tpu.memory_space<vmem>>, vector<1x4x128xbf16>
    %10 = vector.shape_cast %9 : vector<1x4x128xbf16> to vector<4x128xbf16>
    %11 = vector.shape_cast %8 : vector<4x128xbf16> to vector<1x4x128xbf16>
    tpu.vector_store %arg5[%c0_8, %c0_9, %c0_10], %11 {strides = array<i32>} : memref<1x4x128xbf16, #tpu.memory_space<vmem>>, vector<1x4x128xbf16>,
    return
  }
  func.func @transform_0(%arg0: i32, %arg1: i32) -> (i32, i32, i32, i32) {
    %c0_i32 = arith.constant 0 : i32
    %c0_i32_0 = arith.constant 0 : i32
    %c0_i32_1 = arith.constant 0 : i32
    return %arg0, %c0_i32, %arg1, %c0_i32_0 : i32, i32, i32, i32
  }
  func.func @transform_1(%arg0: i32, %arg1: i32) -> (i32, i32, i32) {
    %c0_i32 = arith.constant 0 : i32
    %c0_i32_0 = arith.constant 0 : i32
    %c0_i32_1 = arith.constant 0 : i32
    %c0_i32_2 = arith.constant 0 : i32
    return %c0_i32, %c0_i32_0, %c0_i32_1 : i32, i32, i32
  }
  func.func @transform_2(%arg0: i32, %arg1: i32) -> (i32, i32) {
    %c0_i32 = arith.constant 0 : i32
    %c0_i32_0 = arith.constant 0 : i32
    %c0_i32_1 = arith.constant 0 : i32
    return %c0_i32, %c0_i32_0 : i32, i32
  }
  func.func @transform_3(%arg0: i32, %arg1: i32) -> (i32, i32, i32) {
    %c0_i32 = arith.constant 0 : i32
    %c0_i32_0 = arith.constant 0 : i32
    return %arg0, %arg1, %c0_i32 : i32, i32, i32
  }
}

module attributes {stable_mosaic.version = 11 : i64} {
  func.func @_conv_kernel(%arg0: i32, %arg1: i32, %arg2: memref<1x1x4x128xbf16, #tpu.memory_space<vmem>>, %arg3: memref<1x128x128xbf16, #tpu.memory_space<vmem>>, %arg4: memref<1x128xf32, #tpu.memory_space<vmem>>, %arg5: memref<1x4x128xbf16, #tpu.memory_space<vmem>>, %arg6: memref<1x4x128xbf16, #tpu.memory_space<vmem>>) attributes {dimension_semantics = [#tpu.dimension_semantics<parallel>, #tpu.dimension_semantics<parallel>], iteration_bounds = array<i64: 2, 1>, scalar_prefetch = 0 : i64, scratch_operands = 0 : i64, tpu.core_type = #tpu.core_type<tc>, window_params = [{transform_indices = @transform_0, window_bounds = array<i64: 1, 1, 4, 128>}, {pipeline_mode = #tpu.pipeline_mode<synchronous>, transform_indices = @transform_1, window_bounds = array<i64: 1, 128, 128>}, {pipeline_mode = #tpu.pipeline_mode<synchronous>, transform_indices = @transform_2, window_bounds = array<i64: 1, 128>}, {transform_indices = @transform_3, window_bounds = array<i64: 1, 4, 128>}, {transform_indices = @transform_4, window_bounds = array<i64: 1, 4, 128>}]} {
    %c0 = arith.constant 0 : index
    %c0_0 = arith.constant 0 : index
    %c0_1 = arith.constant 0 : index
    %c0_2 = arith.constant 0 : index
    %0 = vector.load %arg2[%c0, %c0_0, %c0_1, %c0_2] : memref<1x1x4x128xbf16, #tpu.memory_space<vmem>>, vector<1x1x4x128xbf16>
    %1 = vector.shape_cast %0 : vector<1x1x4x128xbf16> to vector<4x128xbf16>
    %c0_3 = arith.constant 0 : index
    %c0_4 = arith.constant 0 : index
    %c0_5 = arith.constant 0 : index
    %2 = vector.load %arg3[%c0_3, %c0_4, %c0_5] : memref<1x128x128xbf16, #tpu.memory_space<vmem>>, vector<1x128x128xbf16>
    %3 = vector.shape_cast %2 : vector<1x128x128xbf16> to vector<128x128xbf16>
    %cst = arith.constant dense<0.000000e+00> : vector<4x128xf32>
    %4 = tpu.matmul %1, %3, %cst {dimension_numbers = #tpu.dot_dimension_numbers<[1], [0], [0], [1], [0, 0, 1, 1], [], []>} : vector<4x128xbf16>, vector<128x128xbf16>, vector<4x128xf32> -> vector<4x128xf32>
    %c0_6 = arith.constant 0 : index
    %c0_7 = arith.constant 0 : index
    %5 = vector.load %arg4[%c0_6, %c0_7] : memref<1x128xf32, #tpu.memory_space<vmem>>, vector<1x128xf32>
    %6 = vector.broadcast %5 : vector<1x128xf32> to vector<4x128xf32>
    %7 = arith.addf %4, %6 : vector<4x128xf32>
    %c0_8 = arith.constant 0 : index
    %c0_9 = arith.constant 0 : index
    %c0_10 = arith.constant 0 : index
    %8 = vector.load %arg5[%c0_8, %c0_9, %c0_10] : memref<1x4x128xbf16, #tpu.memory_space<vmem>>, vector<1x4x128xbf16>
    %9 = vector.shape_cast %8 : vector<1x4x128xbf16> to vector<4x128xbf16>
    %10 = arith.extf %9 : vector<4x128xbf16> to vector<4x128xf32>
    %11 = arith.addf %7, %10 : vector<4x128xf32>
    %cst_11 = arith.constant 0.000000e+00 : f32
    %12 = vector.broadcast %cst_11 : f32 to vector<4x128xf32>
    %13 = arith.maximumf %11, %12 : vector<4x128xf32>
    %14 = arith.truncf %13 : vector<4x128xf32> to vector<4x128xbf16>
    %c0_12 = arith.constant 0 : index
    %c0_13 = arith.constant 0 : index
    %c0_14 = arith.constant 0 : index
    %15 = vector.load %arg6[%c0_12, %c0_13, %c0_14] : memref<1x4x128xbf16, #tpu.memory_space<vmem>>, vector<1x4x128xbf16>
    %16 = vector.shape_cast %15 : vector<1x4x128xbf16> to vector<4x128xbf16>
    %17 = vector.shape_cast %14 : vector<4x128xbf16> to vector<1x4x128xbf16>
    tpu.vector_store %arg6[%c0_12, %c0_13, %c0_14], %17 {strides = array<i32>} : memref<1x4x128xbf16, #tpu.memory_space<vmem>>, vector<1x4x128xbf16>,
    return
  }
  func.func @transform_0(%arg0: i32, %arg1: i32) -> (i32, i32, i32, i32) {
    %c0_i32 = arith.constant 0 : i32
    %c0_i32_0 = arith.constant 0 : i32
    %c0_i32_1 = arith.constant 0 : i32
    return %arg0, %c0_i32, %arg1, %c0_i32_0 : i32, i32, i32, i32
  }
  func.func @transform_1(%arg0: i32, %arg1: i32) -> (i32, i32, i32) {
    %c0_i32 = arith.constant 0 : i32
    %c0_i32_0 = arith.constant 0 : i32
    %c0_i32_1 = arith.constant 0 : i32
    %c0_i32_2 = arith.constant 0 : i32
    return %c0_i32, %c0_i32_0, %c0_i32_1 : i32, i32, i32
  }
  func.func @transform_2(%arg0: i32, %arg1: i32) -> (i32, i32) {
    %c0_i32 = arith.constant 0 : i32
    %c0_i32_0 = arith.constant 0 : i32
    %c0_i32_1 = arith.constant 0 : i32
    return %c0_i32, %c0_i32_0 : i32, i32
  }
  func.func @transform_3(%arg0: i32, %arg1: i32) -> (i32, i32, i32) {
    %c0_i32 = arith.constant 0 : i32
    %c0_i32_0 = arith.constant 0 : i32
    return %arg0, %arg1, %c0_i32 : i32, i32, i32
  }
  func.func @transform_4(%arg0: i32, %arg1: i32) -> (i32, i32, i32) {
    %c0_i32 = arith.constant 0 : i32
    %c0_i32_0 = arith.constant 0 : i32
    return %arg0, %arg1, %c0_i32 : i32, i32, i32
  }
}

module attributes {stable_mosaic.version = 11 : i64} {
  func.func @_conv_kernel(%arg0: i32, %arg1: i32, %arg2: memref<1x1x4x128xbf16, #tpu.memory_space<vmem>>, %arg3: memref<1x128x128xbf16, #tpu.memory_space<vmem>>, %arg4: memref<1x128xf32, #tpu.memory_space<vmem>>, %arg5: memref<1x4x128xbf16, #tpu.memory_space<vmem>>) attributes {dimension_semantics = [#tpu.dimension_semantics<parallel>, #tpu.dimension_semantics<parallel>], iteration_bounds = array<i64: 2, 1>, scalar_prefetch = 0 : i64, scratch_operands = 0 : i64, tpu.core_type = #tpu.core_type<tc>, window_params = [{transform_indices = @transform_0, window_bounds = array<i64: 1, 1, 4, 128>}, {pipeline_mode = #tpu.pipeline_mode<synchronous>, transform_indices = @transform_1, window_bounds = array<i64: 1, 128, 128>}, {pipeline_mode = #tpu.pipeline_mode<synchronous>, transform_indices = @transform_2, window_bounds = array<i64: 1, 128>}, {transform_indices = @transform_3, window_bounds = array<i64: 1, 4, 128>}]} {
    %c0 = arith.constant 0 : index
    %c0_0 = arith.constant 0 : index
    %c0_1 = arith.constant 0 : index
    %c0_2 = arith.constant 0 : index
    %0 = vector.load %arg2[%c0, %c0_0, %c0_1, %c0_2] : memref<1x1x4x128xbf16, #tpu.memory_space<vmem>>, vector<1x1x4x128xbf16>
    %1 = vector.shape_cast %0 : vector<1x1x4x128xbf16> to vector<4x128xbf16>
    %c0_3 = arith.constant 0 : index
    %c0_4 = arith.constant 0 : index
    %c0_5 = arith.constant 0 : index
    %2 = vector.load %arg3[%c0_3, %c0_4, %c0_5] : memref<1x128x128xbf16, #tpu.memory_space<vmem>>, vector<1x128x128xbf16>
    %3 = vector.shape_cast %2 : vector<1x128x128xbf16> to vector<128x128xbf16>
    %cst = arith.constant dense<0.000000e+00> : vector<4x128xf32>
    %4 = tpu.matmul %1, %3, %cst {dimension_numbers = #tpu.dot_dimension_numbers<[1], [0], [0], [1], [0, 0, 1, 1], [], []>} : vector<4x128xbf16>, vector<128x128xbf16>, vector<4x128xf32> -> vector<4x128xf32>
    %c0_6 = arith.constant 0 : index
    %c0_7 = arith.constant 0 : index
    %5 = vector.load %arg4[%c0_6, %c0_7] : memref<1x128xf32, #tpu.memory_space<vmem>>, vector<1x128xf32>
    %6 = vector.broadcast %5 : vector<1x128xf32> to vector<4x128xf32>
    %7 = arith.addf %4, %6 : vector<4x128xf32>
    %cst_8 = arith.constant 0.000000e+00 : f32
    %8 = vector.broadcast %cst_8 : f32 to vector<4x128xf32>
    %9 = arith.maximumf %7, %8 : vector<4x128xf32>
    %10 = arith.truncf %9 : vector<4x128xf32> to vector<4x128xbf16>
    %c0_9 = arith.constant 0 : index
    %c0_10 = arith.constant 0 : index
    %c0_11 = arith.constant 0 : index
    %11 = vector.load %arg5[%c0_9, %c0_10, %c0_11] : memref<1x4x128xbf16, #tpu.memory_space<vmem>>, vector<1x4x128xbf16>
    %12 = vector.shape_cast %11 : vector<1x4x128xbf16> to vector<4x128xbf16>
    %13 = vector.shape_cast %10 : vector<4x128xbf16> to vector<1x4x128xbf16>
    tpu.vector_store %arg5[%c0_9, %c0_10, %c0_11], %13 {strides = array<i32>} : memref<1x4x128xbf16, #tpu.memory_space<vmem>>, vector<1x4x128xbf16>,
    return
  }
  func.func @transform_0(%arg0: i32, %arg1: i32) -> (i32, i32, i32, i32) {
    %c0_i32 = arith.constant 0 : i32
    %c0_i32_0 = arith.constant 0 : i32
    %c0_i32_1 = arith.constant 0 : i32
    return %arg0, %c0_i32, %arg1, %c0_i32_0 : i32, i32, i32, i32
  }
  func.func @transform_1(%arg0: i32, %arg1: i32) -> (i32, i32, i32) {
    %c0_i32 = arith.constant 0 : i32
    %c0_i32_0 = arith.constant 0 : i32
    %c0_i32_1 = arith.constant 0 : i32
    %c0_i32_2 = arith.constant 0 : i32
    return %c0_i32, %c0_i32_0, %c0_i32_1 : i32, i32, i32
  }
  func.func @transform_2(%arg0: i32, %arg1: i32) -> (i32, i32) {
    %c0_i32 = arith.constant 0 : i32
    %c0_i32_0 = arith.constant 0 : i32
    %c0_i32_1 = arith.constant 0 : i32
    return %c0_i32, %c0_i32_0 : i32, i32
  }
  func.func @transform_3(%arg0: i32, %arg1: i32) -> (i32, i32, i32) {
    %c0_i32 = arith.constant 0 : i32
    %c0_i32_0 = arith.constant 0 : i32
    return %arg0, %arg1, %c0_i32 : i32, i32, i32
  }
}

module attributes {stable_mosaic.version = 11 : i64} {
  func.func @_conv_kernel(%arg0: i32, %arg1: memref<1x1x20x128xbf16, #tpu.memory_space<vmem>>, %arg2: memref<9x128x128xbf16, #tpu.memory_space<vmem>>, %arg3: memref<1x128xf32, #tpu.memory_space<vmem>>, %arg4: memref<1x2x2x128xbf16, #tpu.memory_space<vmem>>) attributes {dimension_semantics = [#tpu.dimension_semantics<parallel>], iteration_bounds = array<i64: 2>, scalar_prefetch = 0 : i64, scratch_operands = 0 : i64, tpu.core_type = #tpu.core_type<tc>, window_params = [{transform_indices = @transform_0, window_bounds = array<i64: 1, 1, 20, 128>}, {pipeline_mode = #tpu.pipeline_mode<synchronous>, transform_indices = @transform_1, window_bounds = array<i64: 9, 128, 128>}, {pipeline_mode = #tpu.pipeline_mode<synchronous>, transform_indices = @transform_2, window_bounds = array<i64: 1, 128>}, {transform_indices = @transform_3, window_bounds = array<i64: 1, 2, 2, 128>}]} {
    %c0 = arith.constant 0 : index
    %c0_0 = arith.constant 0 : index
    %c0_1 = arith.constant 0 : index
    %c0_2 = arith.constant 0 : index
    %0 = vector.load %arg1[%c0, %c0_0, %c0_1, %c0_2] : memref<1x1x20x128xbf16, #tpu.memory_space<vmem>>, vector<1x1x8x128xbf16>
    %1 = vector.shape_cast %0 : vector<1x1x8x128xbf16> to vector<8x128xbf16>
    %c0_3 = arith.constant 0 : index
    %c0_4 = arith.constant 0 : index
    %c0_5 = arith.constant 0 : index
    %2 = vector.load %arg2[%c0_3, %c0_4, %c0_5] : memref<9x128x128xbf16, #tpu.memory_space<vmem>>, vector<1x128x128xbf16>
    %3 = vector.shape_cast %2 : vector<1x128x128xbf16> to vector<128x128xbf16>
    %cst = arith.constant dense<0.000000e+00> : vector<8x128xf32>
    %4 = tpu.matmul %1, %3, %cst {dimension_numbers = #tpu.dot_dimension_numbers<[1], [0], [0], [1], [0, 0, 1, 1], [], []>} : vector<8x128xbf16>, vector<128x128xbf16>, vector<8x128xf32> -> vector<8x128xf32>
    %c0_6 = arith.constant 0 : index
    %c0_7 = arith.constant 0 : index
    %c1 = arith.constant 1 : index
    %c0_8 = arith.constant 0 : index
    %5 = vector.load %arg1[%c0_6, %c0_7, %c1, %c0_8] : memref<1x1x20x128xbf16, #tpu.memory_space<vmem>>, vector<1x1x8x128xbf16>
    %6 = vector.shape_cast %5 : vector<1x1x8x128xbf16> to vector<8x128xbf16>
    %c1_9 = arith.constant 1 : index
    %c0_10 = arith.constant 0 : index
    %c0_11 = arith.constant 0 : index
    %7 = vector.load %arg2[%c1_9, %c0_10, %c0_11] : memref<9x128x128xbf16, #tpu.memory_space<vmem>>, vector<1x128x128xbf16>
    %8 = vector.shape_cast %7 : vector<1x128x128xbf16> to vector<128x128xbf16>
    %cst_12 = arith.constant dense<0.000000e+00> : vector<8x128xf32>
    %9 = tpu.matmul %6, %8, %cst_12 {dimension_numbers = #tpu.dot_dimension_numbers<[1], [0], [0], [1], [0, 0, 1, 1], [], []>} : vector<8x128xbf16>, vector<128x128xbf16>, vector<8x128xf32> -> vector<8x128xf32>
    %10 = arith.addf %4, %9 : vector<8x128xf32>
    %c0_13 = arith.constant 0 : index
    %c0_14 = arith.constant 0 : index
    %c2 = arith.constant 2 : index
    %c0_15 = arith.constant 0 : index
    %11 = vector.load %arg1[%c0_13, %c0_14, %c2, %c0_15] : memref<1x1x20x128xbf16, #tpu.memory_space<vmem>>, vector<1x1x8x128xbf16>
    %12 = vector.shape_cast %11 : vector<1x1x8x128xbf16> to vector<8x128xbf16>
    %c2_16 = arith.constant 2 : index
    %c0_17 = arith.constant 0 : index
    %c0_18 = arith.constant 0 : index
    %13 = vector.load %arg2[%c2_16, %c0_17, %c0_18] : memref<9x128x128xbf16, #tpu.memory_space<vmem>>, vector<1x128x128xbf16>
    %14 = vector.shape_cast %13 : vector<1x128x128xbf16> to vector<128x128xbf16>
    %cst_19 = arith.constant dense<0.000000e+00> : vector<8x128xf32>
    %15 = tpu.matmul %12, %14, %cst_19 {dimension_numbers = #tpu.dot_dimension_numbers<[1], [0], [0], [1], [0, 0, 1, 1], [], []>} : vector<8x128xbf16>, vector<128x128xbf16>, vector<8x128xf32> -> vector<8x128xf32>
    %16 = arith.addf %10, %15 : vector<8x128xf32>
    %c0_20 = arith.constant 0 : index
    %c0_21 = arith.constant 0 : index
    %c4 = arith.constant 4 : index
    %c0_22 = arith.constant 0 : index
    %17 = vector.load %arg1[%c0_20, %c0_21, %c4, %c0_22] : memref<1x1x20x128xbf16, #tpu.memory_space<vmem>>, vector<1x1x8x128xbf16>
    %18 = vector.shape_cast %17 : vector<1x1x8x128xbf16> to vector<8x128xbf16>
    %c3 = arith.constant 3 : index
    %c0_23 = arith.constant 0 : index
    %c0_24 = arith.constant 0 : index
    %19 = vector.load %arg2[%c3, %c0_23, %c0_24] : memref<9x128x128xbf16, #tpu.memory_space<vmem>>, vector<1x128x128xbf16>
    %20 = vector.shape_cast %19 : vector<1x128x128xbf16> to vector<128x128xbf16>
    %cst_25 = arith.constant dense<0.000000e+00> : vector<8x128xf32>
    %21 = tpu.matmul %18, %20, %cst_25 {dimension_numbers = #tpu.dot_dimension_numbers<[1], [0], [0], [1], [0, 0, 1, 1], [], []>} : vector<8x128xbf16>, vector<128x128xbf16>, vector<8x128xf32> -> vector<8x128xf32>
    %22 = arith.addf %16, %21 : vector<8x128xf32>
    %c0_26 = arith.constant 0 : index
    %c0_27 = arith.constant 0 : index
    %c5 = arith.constant 5 : index
    %c0_28 = arith.constant 0 : index
    %23 = vector.load %arg1[%c0_26, %c0_27, %c5, %c0_28] : memref<1x1x20x128xbf16, #tpu.memory_space<vmem>>, vector<1x1x8x128xbf16>
    %24 = vector.shape_cast %23 : vector<1x1x8x128xbf16> to vector<8x128xbf16>
    %c4_29 = arith.constant 4 : index
    %c0_30 = arith.constant 0 : index
    %c0_31 = arith.constant 0 : index
    %25 = vector.load %arg2[%c4_29, %c0_30, %c0_31] : memref<9x128x128xbf16, #tpu.memory_space<vmem>>, vector<1x128x128xbf16>
    %26 = vector.shape_cast %25 : vector<1x128x128xbf16> to vector<128x128xbf16>
    %cst_32 = arith.constant dense<0.000000e+00> : vector<8x128xf32>
    %27 = tpu.matmul %24, %26, %cst_32 {dimension_numbers = #tpu.dot_dimension_numbers<[1], [0], [0], [1], [0, 0, 1, 1], [], []>} : vector<8x128xbf16>, vector<128x128xbf16>, vector<8x128xf32> -> vector<8x128xf32>
    %28 = arith.addf %22, %27 : vector<8x128xf32>
    %c0_33 = arith.constant 0 : index
    %c0_34 = arith.constant 0 : index
    %c6 = arith.constant 6 : index
    %c0_35 = arith.constant 0 : index
    %29 = vector.load %arg1[%c0_33, %c0_34, %c6, %c0_35] : memref<1x1x20x128xbf16, #tpu.memory_space<vmem>>, vector<1x1x8x128xbf16>
    %30 = vector.shape_cast %29 : vector<1x1x8x128xbf16> to vector<8x128xbf16>
    %c5_36 = arith.constant 5 : index
    %c0_37 = arith.constant 0 : index
    %c0_38 = arith.constant 0 : index
    %31 = vector.load %arg2[%c5_36, %c0_37, %c0_38] : memref<9x128x128xbf16, #tpu.memory_space<vmem>>, vector<1x128x128xbf16>
    %32 = vector.shape_cast %31 : vector<1x128x128xbf16> to vector<128x128xbf16>
    %cst_39 = arith.constant dense<0.000000e+00> : vector<8x128xf32>
    %33 = tpu.matmul %30, %32, %cst_39 {dimension_numbers = #tpu.dot_dimension_numbers<[1], [0], [0], [1], [0, 0, 1, 1], [], []>} : vector<8x128xbf16>, vector<128x128xbf16>, vector<8x128xf32> -> vector<8x128xf32>
    %34 = arith.addf %28, %33 : vector<8x128xf32>
    %c0_40 = arith.constant 0 : index
    %c0_41 = arith.constant 0 : index
    %c8 = arith.constant 8 : index
    %c0_42 = arith.constant 0 : index
    %35 = vector.load %arg1[%c0_40, %c0_41, %c8, %c0_42] : memref<1x1x20x128xbf16, #tpu.memory_space<vmem>>, vector<1x1x8x128xbf16>
    %36 = vector.shape_cast %35 : vector<1x1x8x128xbf16> to vector<8x128xbf16>
    %c6_43 = arith.constant 6 : index
    %c0_44 = arith.constant 0 : index
    %c0_45 = arith.constant 0 : index
    %37 = vector.load %arg2[%c6_43, %c0_44, %c0_45] : memref<9x128x128xbf16, #tpu.memory_space<vmem>>, vector<1x128x128xbf16>
    %38 = vector.shape_cast %37 : vector<1x128x128xbf16> to vector<128x128xbf16>
    %cst_46 = arith.constant dense<0.000000e+00> : vector<8x128xf32>
    %39 = tpu.matmul %36, %38, %cst_46 {dimension_numbers = #tpu.dot_dimension_numbers<[1], [0], [0], [1], [0, 0, 1, 1], [], []>} : vector<8x128xbf16>, vector<128x128xbf16>, vector<8x128xf32> -> vector<8x128xf32>
    %40 = arith.addf %34, %39 : vector<8x128xf32>
    %c0_47 = arith.constant 0 : index
    %c0_48 = arith.constant 0 : index
    %c9 = arith.constant 9 : index
    %c0_49 = arith.constant 0 : index
    %41 = vector.load %arg1[%c0_47, %c0_48, %c9, %c0_49] : memref<1x1x20x128xbf16, #tpu.memory_space<vmem>>, vector<1x1x8x128xbf16>
    %42 = vector.shape_cast %41 : vector<1x1x8x128xbf16> to vector<8x128xbf16>
    %c7 = arith.constant 7 : index
    %c0_50 = arith.constant 0 : index
    %c0_51 = arith.constant 0 : index
    %43 = vector.load %arg2[%c7, %c0_50, %c0_51] : memref<9x128x128xbf16, #tpu.memory_space<vmem>>, vector<1x128x128xbf16>
    %44 = vector.shape_cast %43 : vector<1x128x128xbf16> to vector<128x128xbf16>
    %cst_52 = arith.constant dense<0.000000e+00> : vector<8x128xf32>
    %45 = tpu.matmul %42, %44, %cst_52 {dimension_numbers = #tpu.dot_dimension_numbers<[1], [0], [0], [1], [0, 0, 1, 1], [], []>} : vector<8x128xbf16>, vector<128x128xbf16>, vector<8x128xf32> -> vector<8x128xf32>
    %46 = arith.addf %40, %45 : vector<8x128xf32>
    %c0_53 = arith.constant 0 : index
    %c0_54 = arith.constant 0 : index
    %c10 = arith.constant 10 : index
    %c0_55 = arith.constant 0 : index
    %47 = vector.load %arg1[%c0_53, %c0_54, %c10, %c0_55] : memref<1x1x20x128xbf16, #tpu.memory_space<vmem>>, vector<1x1x8x128xbf16>
    %48 = vector.shape_cast %47 : vector<1x1x8x128xbf16> to vector<8x128xbf16>
    %c8_56 = arith.constant 8 : index
    %c0_57 = arith.constant 0 : index
    %c0_58 = arith.constant 0 : index
    %49 = vector.load %arg2[%c8_56, %c0_57, %c0_58] : memref<9x128x128xbf16, #tpu.memory_space<vmem>>, vector<1x128x128xbf16>
    %50 = vector.shape_cast %49 : vector<1x128x128xbf16> to vector<128x128xbf16>
    %cst_59 = arith.constant dense<0.000000e+00> : vector<8x128xf32>
    %51 = tpu.matmul %48, %50, %cst_59 {dimension_numbers = #tpu.dot_dimension_numbers<[1], [0], [0], [1], [0, 0, 1, 1], [], []>} : vector<8x128xbf16>, vector<128x128xbf16>, vector<8x128xf32> -> vector<8x128xf32>
    %52 = arith.addf %46, %51 : vector<8x128xf32>
    %c0_60 = arith.constant 0 : index
    %c0_61 = arith.constant 0 : index
    %53 = vector.load %arg3[%c0_60, %c0_61] : memref<1x128xf32, #tpu.memory_space<vmem>>, vector<1x128xf32>
    %54 = vector.broadcast %53 : vector<1x128xf32> to vector<8x128xf32>
    %55 = arith.addf %52, %54 : vector<8x128xf32>
    %cst_62 = arith.constant 0.000000e+00 : f32
    %56 = vector.broadcast %cst_62 : f32 to vector<8x128xf32>
    %57 = arith.maximumf %55, %56 : vector<8x128xf32>
    %58 = vector.shape_cast %57 : vector<8x128xf32> to vector<2x4x128xf32>
    %59 = vector.extract_strided_slice %58 {offsets = [0, 0, 0], sizes = [2, 2, 128], strides = [1, 1, 1]} : vector<2x4x128xf32> to vector<2x2x128xf32>
    %60 = arith.truncf %59 : vector<2x2x128xf32> to vector<2x2x128xbf16>
    %c0_63 = arith.constant 0 : index
    %c0_64 = arith.constant 0 : index
    %c0_65 = arith.constant 0 : index
    %c0_66 = arith.constant 0 : index
    %61 = vector.load %arg4[%c0_63, %c0_64, %c0_65, %c0_66] : memref<1x2x2x128xbf16, #tpu.memory_space<vmem>>, vector<1x2x2x128xbf16>
    %62 = vector.shape_cast %61 : vector<1x2x2x128xbf16> to vector<2x2x128xbf16>
    %63 = vector.shape_cast %60 : vector<2x2x128xbf16> to vector<1x2x2x128xbf16>
    tpu.vector_store %arg4[%c0_63, %c0_64, %c0_65, %c0_66], %63 {strides = array<i32>} : memref<1x2x2x128xbf16, #tpu.memory_space<vmem>>, vector<1x2x2x128xbf16>,
    return
  }
  func.func @transform_0(%arg0: i32) -> (i32, i32, i32, i32) {
    %c0_i32 = arith.constant 0 : i32
    %c0_i32_0 = arith.constant 0 : i32
    %c0_i32_1 = arith.constant 0 : i32
    %c0_i32_2 = arith.constant 0 : i32
    return %arg0, %c0_i32, %c0_i32_0, %c0_i32_1 : i32, i32, i32, i32
  }
  func.func @transform_1(%arg0: i32) -> (i32, i32, i32) {
    %c0_i32 = arith.constant 0 : i32
    %c0_i32_0 = arith.constant 0 : i32
    %c0_i32_1 = arith.constant 0 : i32
    %c0_i32_2 = arith.constant 0 : i32
    return %c0_i32, %c0_i32_0, %c0_i32_1 : i32, i32, i32
  }
  func.func @transform_2(%arg0: i32) -> (i32, i32) {
    %c0_i32 = arith.constant 0 : i32
    %c0_i32_0 = arith.constant 0 : i32
    %c0_i32_1 = arith.constant 0 : i32
    return %c0_i32, %c0_i32_0 : i32, i32
  }
  func.func @transform_3(%arg0: i32) -> (i32, i32, i32, i32) {
    %c0_i32 = arith.constant 0 : i32
    %c0_i32_0 = arith.constant 0 : i32
    %c0_i32_1 = arith.constant 0 : i32
    %c0_i32_2 = arith.constant 0 : i32
    return %arg0, %c0_i32, %c0_i32_0, %c0_i32_1 : i32, i32, i32, i32
  }
}

module attributes {stable_mosaic.version = 11 : i64} {
  func.func @_head_kernel(%arg0: i32, %arg1: memref<2x4x128xbf16, #tpu.memory_space<vmem>>, %arg2: memref<128x128xf32, #tpu.memory_space<vmem>>, %arg3: memref<1x128xf32, #tpu.memory_space<vmem>>, %arg4: memref<2x128xf32, #tpu.memory_space<vmem>>) attributes {dimension_semantics = [#tpu.dimension_semantics<parallel>], iteration_bounds = array<i64: 1>, scalar_prefetch = 0 : i64, scratch_operands = 0 : i64, tpu.core_type = #tpu.core_type<tc>, window_params = [{transform_indices = @transform_0, window_bounds = array<i64: 2, 4, 128>}, {pipeline_mode = #tpu.pipeline_mode<synchronous>, transform_indices = @transform_1, window_bounds = array<i64: 128, 128>}, {pipeline_mode = #tpu.pipeline_mode<synchronous>, transform_indices = @transform_2, window_bounds = array<i64: 1, 128>}, {transform_indices = @transform_3, window_bounds = array<i64: 2, 128>}]} {
    %c0 = arith.constant 0 : index
    %c0_0 = arith.constant 0 : index
    %c0_1 = arith.constant 0 : index
    %0 = vector.load %arg1[%c0, %c0_0, %c0_1] : memref<2x4x128xbf16, #tpu.memory_space<vmem>>, vector<2x4x128xbf16>
    %1 = arith.extf %0 : vector<2x4x128xbf16> to vector<2x4x128xf32>
    %cst = arith.constant dense<0.000000e+00> : vector<2x128xf32>
    %2 = vector.multi_reduction <add>, %1, %cst [1] : vector<2x4x128xf32> to vector<2x128xf32>
    %cst_2 = arith.constant 2.500000e-01 : f32
    %3 = vector.broadcast %cst_2 : f32 to vector<2x128xf32>
    %4 = arith.mulf %2, %3 : vector<2x128xf32>
    %c0_3 = arith.constant 0 : index
    %c0_4 = arith.constant 0 : index
    %5 = vector.load %arg2[%c0_3, %c0_4] : memref<128x128xf32, #tpu.memory_space<vmem>>, vector<128x128xf32>
    %cst_5 = arith.constant dense<0.000000e+00> : vector<2x128xf32>
    %6 = tpu.matmul %4, %5, %cst_5 {dimension_numbers = #tpu.dot_dimension_numbers<[1], [0], [0], [1], [0, 0, 1, 1], [], []>} : vector<2x128xf32>, vector<128x128xf32>, vector<2x128xf32> -> vector<2x128xf32>
    %c0_6 = arith.constant 0 : index
    %c0_7 = arith.constant 0 : index
    %7 = vector.load %arg3[%c0_6, %c0_7] : memref<1x128xf32, #tpu.memory_space<vmem>>, vector<1x128xf32>
    %8 = vector.broadcast %7 : vector<1x128xf32> to vector<2x128xf32>
    %9 = arith.addf %6, %8 : vector<2x128xf32>
    %c0_8 = arith.constant 0 : index
    %c0_9 = arith.constant 0 : index
    %10 = vector.load %arg4[%c0_8, %c0_9] : memref<2x128xf32, #tpu.memory_space<vmem>>, vector<2x128xf32>
    tpu.vector_store %arg4[%c0_8, %c0_9], %9 {strides = array<i32>} : memref<2x128xf32, #tpu.memory_space<vmem>>, vector<2x128xf32>,
    return
  }
  func.func @transform_0(%arg0: i32) -> (i32, i32, i32) {
    %c0_i32 = arith.constant 0 : i32
    %c0_i32_0 = arith.constant 0 : i32
    %c0_i32_1 = arith.constant 0 : i32
    return %arg0, %c0_i32, %c0_i32_0 : i32, i32, i32
  }
  func.func @transform_1(%arg0: i32) -> (i32, i32) {
    %c0_i32 = arith.constant 0 : i32
    %c0_i32_0 = arith.constant 0 : i32
    %c0_i32_1 = arith.constant 0 : i32
    return %c0_i32, %c0_i32_0 : i32, i32
  }
  func.func @transform_2(%arg0: i32) -> (i32, i32) {
    %c0_i32 = arith.constant 0 : i32
    %c0_i32_0 = arith.constant 0 : i32
    %c0_i32_1 = arith.constant 0 : i32
    return %c0_i32, %c0_i32_0 : i32, i32
  }
  func.func @transform_3(%arg0: i32) -> (i32, i32) {
    %c0_i32 = arith.constant 0 : i32
    %c0_i32_0 = arith.constant 0 : i32
    return %arg0, %c0_i32 : i32, i32
  }
}

</mosaic_0001>

<bundles_post_ra>
// kernel: tpu_custom_call.1
= control target key start
LH: loop header
LB: loop body
LE: loop exit
PB: predicated region body
PF: predicated region fallthrough
CT: control target
= control target key end

     0   :  { %6 = vsyncpa [#allocation3], 0  ;;  %s286_s0 = inlined_call_operand.hbm [shape: f32[8,128], index: 0, kind: input, shape index: {}]   ;;  %s287_s1 = inlined_call_operand.hbm [shape: f32[8,128], index: 1, kind: output, shape index: {}]  }
   0x1   :  { %7 = vsyncpa [#allocation4], 0  ;;  %s269_s6 = smov 0  }
   0x2 LB: > { %s148_s7 = sadd.s32 4294967295, %s255_s6   ;;  %p149_p0 = scmp.ge.s32.totalorder %s255_s6, 1  ;;  %s255_s6 = sphi %s269_s6, %s13_s6  }
   0x3   : > { %p60_p1 = scmp.lt.s32.totalorder %s255_s6, 3  ;;  %s72_s10 = sshll.u32 %s286_s0, 4  ;;  %s73_s10 = int_to_ptr.hbm [resolvable:$true] %s72_s10 }
   0x4   : > { %p169_p3 = scmp.eq.s32.totalorder %s148_s7, 0  ;;  %s257_s11 = smov [#allocation2]  }
   0x5   : > { %p61_p2 = pnand %p149_p0, %p60_p1  ;;  %s74_s12 = sshll.u32 %s257_s11, 4  ;;  %s75_s12 = int_to_ptr.vmem [resolvable:$true] %s74_s12 }
   0x7   : > { %p165_p4 = pneg %p61_p2  ;;  %87 = sbr.rel (%p61_p2) target bundleno = 19 (0x13), region = 24 }
   0x9   : > { %p166_p5 = pnand %p169_p3, %p165_p4 }
   0xb   : > { %168 = dma.hbm_to_vmem [thread:$0]  (!%p166_p5), %s73_s10, 128, %s75_s12, [#allocation3]  }
   0xc   : > { %246 = dma.done.wait (%p169_p3), [#allocation3], 128  }
   0xd   : > { %248 = vsyncadd (%p169_p3), [#allocation3], 4294967168  ;;  %s258_s13 = smov [#allocation5]   ;;  %s108_s17 = sshll.u32 %s287_s1, 4  ;;  %v98_v0 = vld [vmem:[#allocation2] sm:$0xff]  ;;  %s109_s17 = int_to_ptr.hbm [resolvable:$true] %s108_s17 }
   0xe   : > { %s106_s14 = sshll.u32 %s258_s13, 4  ;;  %p171_p6 = scmp.eq.s32.totalorder %s148_s7, 1  ;;  %99 = vst [vmem:[#allocation5] sm:$0xff] %v98_v0  ;;  %s107_s14 = int_to_ptr.vmem [resolvable:$true] %s106_s14 }
  0x10   : > { %162 = dma.vmem_to_hbm [thread:$0]  (%p171_p6), %s107_s14, 128, %s109_s17, [#allocation4]  }
  0x11   : > { %250 = dma.done.wait (%p171_p6), [#allocation4], 128  }
  0x12   : > { %252 = vsyncadd (%p171_p6), [#allocation4], 4294967168 }
  0x13 PF: > { %s13_s6 = sadd.s32 1, %s255_s6  }
  0x14   : > { %p10_p7 = scmp.ge.s32.totalorder %s13_s6, 4  }
  0x16   :  { %12 = sbr.rel (!%p10_p7) target bundleno = 2 (0x2), region = 53 }
  0x1b   :  { %122 = vsyncpa [#allocation3], 1 }
  0x1c   :  { %124 = vsyncpa [#allocation3 + $0x1], 1 }
  0x1d   :  { %125 = vsyncpa [#allocation4], 1 }
  0x1e   :  { %127 = vsyncpa [#allocation4 + $0x1], 1 }

// kernel: anynet_forward.13
= control target key start
LH: loop header
LB: loop body
LE: loop exit
PB: predicated region body
PF: predicated region fallthrough
CT: control target
= control target key end

     0   :  { %s639_s12 = smov 0   ;;  %s641_s13 = smov 0   ;;  %s710_s0 = inlined_call_operand.vmem [shape: bf16[2,1,64,128], index: 0, kind: input, shape index: {}]   ;;  %s711_s1 = inlined_call_operand.vmem [shape: bf16[1,128,128], index: 1, kind: input, shape index: {}]   ;;  %s712_s2 = inlined_call_operand.vmem [shape: f32[1,128], index: 2, kind: input, shape index: {}]   ;;  %s713_s3 = inlined_call_operand.vmem [shape: bf16[2,64,128], index: 3, kind: output, shape index: {}]  }
   0x1   :  { %s643_s14 = smov 0  }
   0x2 LB: > { %s25_s15 = sadd.s32 1, %s613_s13  ;;  %p454_p0 = scmp.ge.s32.totalorder %s617_s14, 1  ;;  %s617_s14 = sphi %s643_s14, %s13_s14   ;;  %s613_s13 = sphi %s641_s13, %s715_s13   ;;  %s609_s12 = sphi %s639_s12, %s714_s12  }
   0x3   : > { %p27_p1 = scmp.ge.s32.totalorder %s25_s15, 2  ;;  %p158_p2 = scmp.lt.s32.totalorder %s617_s14, 3 }
   0x5   : > { %s717_s15 = smov (%p27_p1, %s25_s15), 0  ;;  %p159_p3 = pnand %p454_p0, %p158_p2 }
   0x6   : > { %p191_p4 = scmp.lt.s32.totalorder (!%p159_p3), %s609_s12, 1 }
   0x7   : > { %162 = sbr.rel (%p159_p3) target bundleno = 193 (0xc1), region = 32 }
   0xc   : > { %v522_v0 = vld [vmem:[%s711_s1 + $0x38] sm:$0xff]  ;;  %v521_v1 = vld [vmem:[%s711_s1 + $0x30] sm:$0xff]  ;;  %v520_v2 = vld [vmem:[%s711_s1 + $0x28] sm:$0xff]  ;;  %s719_s12 = smov (!%p191_p4, %s609_s12), 1 }
   0xd   : > { %310 = vmatpush.bf16.msra.mxu0 %v522_v0  ;;  %546 = vmatpush.bf16.msra.mxu1 %v522_v0  ;;  %v519_v3 = vld [vmem:[%s711_s1 + $0x20] sm:$0xff]  ;;  %v518_v4 = vld [vmem:[%s711_s1 + $0x18] sm:$0xff]  ;;  %v517_v5 = vld [vmem:[%s711_s1 + $0x10] sm:$0xff]  ;;  %s509_s30 = sshll.u32 %s719_s12, 5 }
   0xe   : > { %547 = vmatpush.bf16.msra.mxu2 %v522_v0  ;;  %548 = vmatpush.bf16.msra.mxu3 %v522_v0  ;;  %v516_v6 = vld [vmem:[%s711_s1 + $0x8] sm:$0xff]  ;;  %v515_v7 = vld [vmem:[%s711_s1] sm:$0xff]  ;;  %s198_s8 = scalar_lea.vmem %s710_s0, %s509_s30  ;;  %s208_s17 = scalar_lea.vmem %s713_s3, %s509_s30 }
   0xf   : > { %v511_v8 = vld [vmem:[%s198_s8] sm:$0xff]  ;;  %v512_v9 = vld [vmem:[%s198_s8 + $0x8] sm:$0xff]  ;;  %v513_v10 = vld [vmem:[%s198_s8 + $0x10] sm:$0xff] }
  0x10   : > { %v514_v11 = vld [vmem:[%s198_s8 + $0x18] sm:$0xff]  ;;  %v594_v14 = vld [vmem:[%s712_s2] ss:$0 sm:$0xff] }
  0x11   : > { %311 = vmatpush.bf16.msra.mxu0 %v521_v1  ;;  %549 = vmatpush.bf16.msra.mxu1 %v521_v1 }
  0x12   : > { %550 = vmatpush.bf16.msra.mxu2 %v521_v1  ;;  %551 = vmatpush.bf16.msra.mxu3 %v521_v1 }
  0x15   : > { %312 = vmatpush.bf16.msra.mxu0 %v520_v2  ;;  %552 = vmatpush.bf16.msra.mxu1 %v520_v2 }
  0x16   : > { %553 = vmatpush.bf16.msra.mxu2 %v520_v2  ;;  %554 = vmatpush.bf16.msra.mxu3 %v520_v2 }
  0x19   : > { %313 = vmatpush.bf16.msra.mxu0 %v519_v3  ;;  %555 = vmatpush.bf16.msra.mxu1 %v519_v3 }
  0x1a   : > { %556 = vmatpush.bf16.msra.mxu2 %v519_v3  ;;  %557 = vmatpush.bf16.msra.mxu3 %v519_v3 }
  0x1d   : > { %314 = vmatpush.bf16.msra.mxu0 %v518_v4  ;;  %558 = vmatpush.bf16.msra.mxu1 %v518_v4 }
  0x1e   : > { %559 = vmatpush.bf16.msra.mxu2 %v518_v4  ;;  %560 = vmatpush.bf16.msra.mxu3 %v518_v4 }
  0x21   : > { %315 = vmatpush.bf16.msra.mxu0 %v517_v5  ;;  %561 = vmatpush.bf16.msra.mxu1 %v517_v5 }
  0x22   : > { %562 = vmatpush.bf16.msra.mxu2 %v517_v5  ;;  %563 = vmatpush.bf16.msra.mxu3 %v517_v5 }
  0x25   : > { %316 = vmatpush.bf16.msra.mxu0 %v516_v6  ;;  %564 = vmatpush.bf16.msra.mxu1 %v516_v6 }
  0x26   : > { %565 = vmatpush.bf16.msra.mxu2 %v516_v6  ;;  %566 = vmatpush.bf16.msra.mxu3 %v516_v6 }
  0x29   : > { %317 = vmatpush.bf16.msra.mxu0 %v515_v7  ;;  %567 = vmatpush.bf16.msra.mxu1 %v515_v7 }
  0x2a   : > { %568 = vmatpush.bf16.msra.mxu2 %v515_v7  ;;  %569 = vmatpush.bf16.msra.mxu3 %v515_v7 }
  0x2c   : > { %318 = vmatmul.bf16.vlgmr.msra.gmra.mxu0 %v511_v8  ;;  %323 = vmatmul.bf16.vlgmr.msra.gmra.mxu1 %v512_v9 }
  0x2d   : > { %328 = vmatmul.bf16.vlgmr.msra.gmra.mxu2 %v513_v10  ;;  %333 = vmatmul.bf16.vlgmr.msra.gmra.mxu3 %v514_v11 }
  0xa9   : > { %v319_v12 = vpop.f32.mrf.mxu0  ;;  %v324_v13 = vpop.f32.mrf.mxu1 }
  0xaa   : > { %v320_v15 = vadd.f32 %v594_v14, %v319_v12  ;;  %v325_v16 = vadd.f32 %v594_v14, %v324_v13 }
  0xac   : > { %v339_v23 = vmax.f32 %v320_v15, 0.0  ;;  %v341_v24 = vmax.f32 %v325_v16, 0.0 }
  0xb0   : > { %v329_v17 = vpop.f32.mrf.mxu2  ;;  %v334_v18 = vpop.f32.mrf.mxu3 }
  0xb1   : > { %v321_v19 = vpop.f32.mrf.mxu0  ;;  %v326_v20 = vpop.f32.mrf.mxu1  ;;  %v330_v29 = vadd.f32 %v594_v14, %v329_v17  ;;  %v335_v30 = vadd.f32 %v594_v14, %v334_v18 }
  0xb2   : > { %v322_v21 = vadd.f32 %v594_v14, %v321_v19  ;;  %v327_v22 = vadd.f32 %v594_v14, %v326_v20 }
  0xb3   : > { %v343_v35 = vmax.f32 %v330_v29, 0.0  ;;  %v345_v36 = vmax.f32 %v335_v30, 0.0 }
  0xb4   : > { %v340_v25 = vmax.f32 %v322_v21, 0.0  ;;  %v342_v26 = vmax.f32 %v327_v22, 0.0 }
  0xb6   : > { %v526_v27 = vpack.c.bf16 %v340_v25, %v339_v23  ;;  %v531_v28 = vpack.c.bf16 %v342_v26, %v341_v24 }
  0xb8   : > { %527 = vst [vmem:[%s208_s17] sm:$0xff] %v526_v27   ;;  %v331_v31 = vpop.f32.mrf.mxu2  ;;  %v336_v32 = vpop.f32.mrf.mxu3 }
  0xb9   : > { %543 = vst [vmem:[%s208_s17 + $0x8] sm:$0xff] %v531_v28   ;;  %v332_v33 = vadd.f32 %v594_v14, %v331_v31  ;;  %v337_v34 = vadd.f32 %v594_v14, %v336_v32 }
  0xbb   : > { %v344_v37 = vmax.f32 %v332_v33, 0.0  ;;  %v346_v38 = vmax.f32 %v337_v34, 0.0 }
  0xbd   : > { %v536_v39 = vpack.c.bf16 %v344_v37, %v343_v35  ;;  %v541_v40 = vpack.c.bf16 %v346_v38, %v345_v36 }
  0xbf   : > { %544 = vst [vmem:[%s208_s17 + $0x10] sm:$0xff] %v536_v39  }
  0xc0   : > { %545 = vst [vmem:[%s208_s17 + $0x18] sm:$0xff] %v541_v40  }
  0xc1 PF: > { %s13_s14 = sadd.s32 1, %s617_s14   ;;  %s714_s12 = smov %s613_s13 }
  0xc2   : > { %p10_p5 = scmp.ge.s32.totalorder %s13_s14, 4   ;;  %s715_s13 = smov %s717_s15 }
  0xc4   :  { %12 = sbr.rel (!%p10_p5) target bundleno = 2 (0x2), region = 62 }

// kernel: anynet_forward.18
= control target key start
LH: loop header
LB: loop body
LE: loop exit
PB: predicated region body
PF: predicated region fallthrough
CT: control target
= control target key end

     0   :  { %s525_s12 = smov 0   ;;  %s527_s13 = smov 0   ;;  %s585_s0 = inlined_call_operand.vmem [shape: bf16[2,1,16,128], index: 0, kind: input, shape index: {}]   ;;  %s586_s1 = inlined_call_operand.vmem [shape: bf16[1,128,128], index: 1, kind: input, shape index: {}]   ;;  %s587_s2 = inlined_call_operand.vmem [shape: f32[1,128], index: 2, kind: input, shape index: {}]   ;;  %s588_s3 = inlined_call_operand.vmem [shape: bf16[2,16,128], index: 3, kind: output, shape index: {}]  }
   0x1   :  { %s529_s14 = smov 0  }
   0x2 LB: > { %s25_s15 = sadd.s32 1, %s499_s13  ;;  %p397_p0 = scmp.ge.s32.totalorder %s503_s14, 1  ;;  %s503_s14 = sphi %s529_s14, %s13_s14   ;;  %s499_s13 = sphi %s527_s13, %s590_s13   ;;  %s495_s12 = sphi %s525_s12, %s589_s12  }
   0x3   : > { %p27_p1 = scmp.ge.s32.totalorder %s25_s15, 2  ;;  %p158_p2 = scmp.lt.s32.totalorder %s503_s14, 3 }
   0x5   : > { %s592_s15 = smov (%p27_p1, %s25_s15), 0  ;;  %p159_p3 = pnand %p397_p0, %p158_p2 }
   0x6   : > { %p191_p4 = scmp.lt.s32.totalorder (!%p159_p3), %s495_s12, 1 }
   0x7   : > { %162 = sbr.rel (%p159_p3) target bundleno = 185 (0xb9), region = 32 }
   0xc   : > { %v450_v0 = vld [vmem:[%s586_s1 + $0x38] sm:$0xff]  ;;  %v449_v1 = vld [vmem:[%s586_s1 + $0x30] sm:$0xff]  ;;  %v448_v2 = vld [vmem:[%s586_s1 + $0x28] sm:$0xff]  ;;  %s594_s12 = smov (!%p191_p4, %s495_s12), 1 }
   0xd   : > { %286 = vmatpush.bf16.msra.mxu0 %v450_v0  ;;  %v447_v3 = vld [vmem:[%s586_s1 + $0x20] sm:$0xff]  ;;  %v446_v4 = vld [vmem:[%s586_s1 + $0x18] sm:$0xff]  ;;  %v445_v5 = vld [vmem:[%s586_s1 + $0x10] sm:$0xff]  ;;  %s440_s30 = sshll.u32 %s594_s12, 3 }
   0xe   : > { %v444_v6 = vld [vmem:[%s586_s1 + $0x8] sm:$0xff]  ;;  %v443_v7 = vld [vmem:[%s586_s1] sm:$0xff]  ;;  %s198_s8 = scalar_lea.vmem %s585_s0, %s440_s30  ;;  %s208_s16 = scalar_lea.vmem %s588_s3, %s440_s30 }
   0xf   : > { %v442_v8 = vld [vmem:[%s198_s8] sm:$0xff] }
  0x10   : > { %v480_v10 = vld [vmem:[%s587_s2] ss:$0 sm:$0xff] }
  0x11   : > { %287 = vmatpush.bf16.msra.mxu0 %v449_v1 }
  0x15   : > { %288 = vmatpush.bf16.msra.mxu0 %v448_v2 }
  0x19   : > { %289 = vmatpush.bf16.msra.mxu0 %v447_v3 }
  0x1d   : > { %290 = vmatpush.bf16.msra.mxu0 %v446_v4 }
  0x21   : > { %291 = vmatpush.bf16.msra.mxu0 %v445_v5 }
  0x25   : > { %292 = vmatpush.bf16.msra.mxu0 %v444_v6 }
  0x29   : > { %293 = vmatpush.bf16.msra.mxu0 %v443_v7 }
  0x2c   : > { %294 = vmatmul.bf16.vlgmr.msra.gmra.mxu0 %v442_v8 }
  0xa9   : > { %v295_v9 = vpop.f32.mrf.mxu0 }
  0xaa   : > { %v296_v11 = vadd.f32 %v480_v10, %v295_v9 }
  0xac   : > { %v300_v14 = vmax.f32 %v296_v11, 0.0 }
  0xb1   : > { %v297_v12 = vpop.f32.mrf.mxu0 }
  0xb2   : > { %v298_v13 = vadd.f32 %v480_v10, %v297_v12 }
  0xb4   : > { %v301_v15 = vmax.f32 %v298_v13, 0.0 }
  0xb6   : > { %v454_v16 = vpack.c.bf16 %v301_v15, %v300_v14 }
  0xb8   : > { %455 = vst [vmem:[%s208_s16] sm:$0xff] %v454_v16  }
  0xb9 PF: > { %s13_s14 = sadd.s32 1, %s503_s14   ;;  %s589_s12 = smov %s499_s13 }
  0xba   : > { %p10_p5 = scmp.ge.s32.totalorder %s13_s14, 4   ;;  %s590_s13 = smov %s592_s15 }
  0xbc   :  { %12 = sbr.rel (!%p10_p5) target bundleno = 2 (0x2), region = 62 }

// kernel: anynet_forward.17
= control target key start
LH: loop header
LB: loop body
LE: loop exit
PB: predicated region body
PF: predicated region fallthrough
CT: control target
= control target key end

     0   :  { %s624_s15 = smov 0   ;;  %s626_s16 = smov 0   ;;  %s687_s0 = inlined_call_operand.vmem [shape: bf16[2,1,16,128], index: 0, kind: input, shape index: {}]   ;;  %s688_s1 = inlined_call_operand.vmem [shape: bf16[1,128,128], index: 1, kind: input, shape index: {}]   ;;  %s689_s2 = inlined_call_operand.vmem [shape: f32[1,128], index: 2, kind: input, shape index: {}]   ;;  %s690_s3 = inlined_call_operand.vmem [shape: bf16[2,16,128], index: 3, kind: input, shape index: {}]   ;;  %s691_s4 = inlined_call_operand.vmem [shape: bf16[2,16,128], index: 4, kind: output, shape index: {}]  }
   0x1   :  { %s628_s17 = smov 0  }
   0x2 LB: > { %s26_s18 = sadd.s32 1, %s593_s16  ;;  %p484_p0 = scmp.ge.s32.totalorder %s597_s17, 1  ;;  %s597_s17 = sphi %s628_s17, %s14_s17   ;;  %s593_s16 = sphi %s626_s16, %s693_s16   ;;  %s589_s15 = sphi %s624_s15, %s692_s15  }
   0x3   : > { %p28_p1 = scmp.ge.s32.totalorder %s26_s18, 2  ;;  %p200_p2 = scmp.lt.s32.totalorder %s597_s17, 3 }
   0x5   : > { %s695_s18 = smov (%p28_p1, %s26_s18), 0  ;;  %p201_p3 = pnand %p484_p0, %p200_p2 }
   0x6   : > { %p244_p4 = scmp.lt.s32.totalorder (!%p201_p3), %s589_s15, 1 }
   0x7   : > { %204 = sbr.rel (%p201_p3) target bundleno = 187 (0xbb), region = 36 }
   0xc   : > { %v540_v0 = vld [vmem:[%s688_s1 + $0x38] sm:$0xff]  ;;  %v539_v1 = vld [vmem:[%s688_s1 + $0x30] sm:$0xff]  ;;  %v538_v2 = vld [vmem:[%s688_s1 + $0x28] sm:$0xff]  ;;  %s697_s15 = smov (!%p244_p4, %s589_s15), 1 }
   0xd   : > { %349 = vmatpush.bf16.msra.mxu0 %v540_v0  ;;  %v537_v3 = vld [vmem:[%s688_s1 + $0x20] sm:$0xff]  ;;  %v536_v4 = vld [vmem:[%s688_s1 + $0x18] sm:$0xff]  ;;  %v535_v5 = vld [vmem:[%s688_s1 + $0x10] sm:$0xff]  ;;  %s529_s7 = sshll.u32 %s697_s15, 3 }
   0xe   : > { %v534_v6 = vld [vmem:[%s688_s1 + $0x8] sm:$0xff]  ;;  %v533_v7 = vld [vmem:[%s688_s1] sm:$0xff]  ;;  %s251_s12 = scalar_lea.vmem %s687_s0, %s529_s7  ;;  %s261_s19 = scalar_lea.vmem %s690_s3, %s529_s7 }
   0xf   : > { %v532_v8 = vld [vmem:[%s251_s12] sm:$0xff]  ;;  %s271_s23 = scalar_lea.vmem %s691_s4, %s529_s7 }
  0x10   : > { %v574_v10 = vld [vmem:[%s689_s2] ss:$0 sm:$0xff] }
  0x11   : > { %350 = vmatpush.bf16.msra.mxu0 %v539_v1  ;;  %v542_v11 = vld [vmem:[%s261_s19] sm:$0xff]  }
  0x12   : > { %v543_v13 = vunpack.c.l.bf16 %v542_v11  ;;  %v544_v14 = vunpack.c.h.bf16 %v542_v11 }
  0x15   : > { %351 = vmatpush.bf16.msra.mxu0 %v538_v2 }
  0x19   : > { %352 = vmatpush.bf16.msra.mxu0 %v537_v3 }
  0x1d   : > { %353 = vmatpush.bf16.msra.mxu0 %v536_v4 }
  0x21   : > { %354 = vmatpush.bf16.msra.mxu0 %v535_v5 }
  0x25   : > { %355 = vmatpush.bf16.msra.mxu0 %v534_v6 }
  0x29   : > { %356 = vmatpush.bf16.msra.mxu0 %v533_v7 }
  0x2c   : > { %357 = vmatmul.bf16.vlgmr.msra.gmra.mxu0 %v532_v8 }
  0xa9   : > { %v358_v9 = vpop.f32.mrf.mxu0 }
  0xaa   : > { %v359_v12 = vadd.f32 %v574_v10, %v358_v9 }
  0xac   : > { %v367_v16 = vadd.f32 %v543_v13, %v359_v12 }
  0xae   : > { %v369_v19 = vmax.f32 %v367_v16, 0.0 }
  0xb1   : > { %v360_v15 = vpop.f32.mrf.mxu0 }
  0xb2   : > { %v361_v17 = vadd.f32 %v574_v10, %v360_v15 }
  0xb4   : > { %v368_v18 = vadd.f32 %v544_v14, %v361_v17 }
  0xb6   : > { %v370_v20 = vmax.f32 %v368_v18, 0.0 }
  0xb8   : > { %v548_v21 = vpack.c.bf16 %v370_v20, %v369_v19 }
  0xba   : > { %549 = vst [vmem:[%s271_s23] sm:$0xff] %v548_v21  }
  0xbb PF: > { %s14_s17 = sadd.s32 1, %s597_s17   ;;  %s692_s15 = smov %s593_s16 }
  0xbc   : > { %p11_p5 = scmp.ge.s32.totalorder %s14_s17, 4   ;;  %s693_s16 = smov %s695_s18 }
  0xbe   :  { %13 = sbr.rel (!%p11_p5) target bundleno = 2 (0x2), region = 69 }

// kernel: anynet_forward.16
= control target key start
LH: loop header
LB: loop body
LE: loop exit
PB: predicated region body
PF: predicated region fallthrough
CT: control target
= control target key end

     0   :  { %s523_s12 = smov 0   ;;  %s525_s13 = smov 0   ;;  %s583_s0 = inlined_call_operand.vmem [shape: bf16[2,1,16,128], index: 0, kind: input, shape index: {}]   ;;  %s584_s1 = inlined_call_operand.vmem [shape: bf16[1,128,128], index: 1, kind: input, shape index: {}]   ;;  %s585_s2 = inlined_call_operand.vmem [shape: f32[1,128], index: 2, kind: input, shape index: {}]   ;;  %s586_s3 = inlined_call_operand.vmem [shape: bf16[2,16,128], index: 3, kind: output, shape index: {}]  }
   0x1   :  { %s527_s14 = smov 0  }
   0x2 LB: > { %s25_s15 = sadd.s32 1, %s497_s13  ;;  %p395_p0 = scmp.ge.s32.totalorder %s501_s14, 1  ;;  %s501_s14 = sphi %s527_s14, %s13_s14   ;;  %s497_s13 = sphi %s525_s13, %s588_s13   ;;  %s493_s12 = sphi %s523_s12, %s587_s12  }
   0x3   : > { %p27_p1 = scmp.ge.s32.totalorder %s25_s15, 2  ;;  %p158_p2 = scmp.lt.s32.totalorder %s501_s14, 3 }
   0x5   : > { %s590_s15 = smov (%p27_p1, %s25_s15), 0  ;;  %p159_p3 = pnand %p395_p0, %p158_p2 }
   0x6   : > { %p191_p4 = scmp.lt.s32.totalorder (!%p159_p3), %s493_s12, 1 }
   0x7   : > { %162 = sbr.rel (%p159_p3) target bundleno = 183 (0xb7), region = 32 }
   0xc   : > { %v448_v0 = vld [vmem:[%s584_s1 + $0x38] sm:$0xff]  ;;  %v447_v1 = vld [vmem:[%s584_s1 + $0x30] sm:$0xff]  ;;  %v446_v2 = vld [vmem:[%s584_s1 + $0x28] sm:$0xff]  ;;  %s592_s12 = smov (!%p191_p4, %s493_s12), 1 }
   0xd   : > { %286 = vmatpush.bf16.msra.mxu0 %v448_v0  ;;  %v445_v3 = vld [vmem:[%s584_s1 + $0x20] sm:$0xff]  ;;  %v444_v4 = vld [vmem:[%s584_s1 + $0x18] sm:$0xff]  ;;  %v443_v5 = vld [vmem:[%s584_s1 + $0x10] sm:$0xff]  ;;  %s438_s30 = sshll.u32 %s592_s12, 3 }
   0xe   : > { %v442_v6 = vld [vmem:[%s584_s1 + $0x8] sm:$0xff]  ;;  %v441_v7 = vld [vmem:[%s584_s1] sm:$0xff]  ;;  %s198_s8 = scalar_lea.vmem %s583_s0, %s438_s30  ;;  %s208_s16 = scalar_lea.vmem %s586_s3, %s438_s30 }
   0xf   : > { %v440_v8 = vld [vmem:[%s198_s8] sm:$0xff] }
  0x10   : > { %v478_v10 = vld [vmem:[%s585_s2] ss:$0 sm:$0xff] }
  0x11   : > { %287 = vmatpush.bf16.msra.mxu0 %v447_v1 }
  0x15   : > { %288 = vmatpush.bf16.msra.mxu0 %v446_v2 }
  0x19   : > { %289 = vmatpush.bf16.msra.mxu0 %v445_v3 }
  0x1d   : > { %290 = vmatpush.bf16.msra.mxu0 %v444_v4 }
  0x21   : > { %291 = vmatpush.bf16.msra.mxu0 %v443_v5 }
  0x25   : > { %292 = vmatpush.bf16.msra.mxu0 %v442_v6 }
  0x29   : > { %293 = vmatpush.bf16.msra.mxu0 %v441_v7 }
  0x2c   : > { %294 = vmatmul.bf16.vlgmr.msra.gmra.mxu0 %v440_v8 }
  0xa9   : > { %v295_v9 = vpop.f32.mrf.mxu0 }
  0xaa   : > { %v296_v12 = vadd.f32 %v478_v10, %v295_v9 }
  0xb1   : > { %v297_v11 = vpop.f32.mrf.mxu0 }
  0xb2   : > { %v298_v13 = vadd.f32 %v478_v10, %v297_v11 }
  0xb4   : > { %v452_v14 = vpack.c.bf16 %v298_v13, %v296_v12 }
  0xb6   : > { %453 = vst [vmem:[%s208_s16] sm:$0xff] %v452_v14  }
  0xb7 PF: > { %s13_s14 = sadd.s32 1, %s501_s14   ;;  %s587_s12 = smov %s497_s13 }
  0xb8   : > { %p10_p5 = scmp.ge.s32.totalorder %s13_s14, 4   ;;  %s588_s13 = smov %s590_s15 }
  0xba   :  { %12 = sbr.rel (!%p10_p5) target bundleno = 2 (0x2), region = 62 }

// kernel: anynet_forward.15
= control target key start
LH: loop header
LB: loop body
LE: loop exit
PB: predicated region body
PF: predicated region fallthrough
CT: control target
= control target key end

     0   :  { %s1664_s12 = smov 0   ;;  %s1928_s0 = inlined_call_operand.vmem [shape: bf16[2,6,20,128], index: 0, kind: input, shape index: {}]   ;;  %s1929_s1 = inlined_call_operand.vmem [shape: bf16[9,128,128], index: 1, kind: input, shape index: {}]   ;;  %s1930_s2 = inlined_call_operand.vmem [shape: f32[1,128], index: 2, kind: input, shape index: {}]   ;;  %s1931_s3 = inlined_call_operand.vmem [shape: bf16[2,16,128], index: 3, kind: output, shape index: {}]  }
   0x1 LB: > { %s1061_s13 = sadd.s32 4294967295, %s1642_s12   ;;  %p1065_p0 = scmp.ge.s32.totalorder %s1642_s12, 1  ;;  %s1642_s12 = sphi %s1664_s12, %s13_s12  }
   0x2   : > { %p137_p1 = scmp.lt.s32.totalorder %s1642_s12, 3 }
   0x4   : > { %p138_p2 = pnand %p1065_p0, %p137_p1 }
   0x5   : > { %p161_p3 = scmp.lt.s32.totalorder (!%p138_p2), %s1061_s13, 1 }
   0x6   : > { %141 = sbr.rel (%p138_p2) target bundleno = 250 (0xfa), region = 32 }
   0xb   : > { %v1557_v0 = vld [vmem:[%s1929_s1 + $0x78] sm:$0xff]  ;;  %v1556_v4 = vld [vmem:[%s1929_s1 + $0x70] sm:$0xff]  ;;  %v1555_v8 = vld [vmem:[%s1929_s1 + $0x68] sm:$0xff]  ;;  %s1933_s13 = smov (!%p161_p3, %s1061_s13), 1  ;;  %vm733_vm0 = vcmask 1045504  }
   0xc   : > { %v1566_v1 = vld [vmem:[%s1929_s1 + $0xb8] sm:$0xff]  ;;  %263 = vmatpush.bf16.msra.mxu0 %v1557_v0  ;;  %v1565_v5 = vld [vmem:[%s1929_s1 + $0xb0] sm:$0xff]  ;;  %v1564_v9 = vld [vmem:[%s1929_s1 + $0xa8] sm:$0xff]  ;;  %s1626_s20 = smul.u32 72, %s1933_s13  ;;  %s1539_s16 = sshll.u32 %s1933_s13, 3 }
   0xd   : > { %v1548_v2 = vld [vmem:[%s1929_s1 + $0x38] sm:$0xff]  ;;  %419 = vmatpush.bf16.msra.mxu2 %v1566_v1  ;;  %v1547_v6 = vld [vmem:[%s1929_s1 + $0x30] sm:$0xff]  ;;  %v1546_v10 = vld [vmem:[%s1929_s1 + $0x28] sm:$0xff]  ;;  %s170_s19 = scalar_lea.vmem %s1931_s3, %s1539_s16 }
   0xe   : > { %v1575_v3 = vld [vmem:[%s1929_s1 + $0xf8] sm:$0xff]  ;;  %331 = vmatpush.bf16.msra.mxu1 %v1548_v2  ;;  %v1574_v7 = vld [vmem:[%s1929_s1 + $0xf0] sm:$0xff]  ;;  %v1573_v11 = vld [vmem:[%s1929_s1 + $0xe8] sm:$0xff]  ;;  %s1778_s4 = scalar_lea.vmem %s1928_s0, %s1626_s20 }
   0xf   : > { %509 = vmatpush.bf16.msra.mxu3 %v1575_v3  ;;  %v1554_v12 = vld [vmem:[%s1929_s1 + $0x60] sm:$0xff]  ;;  %v1553_v16 = vld [vmem:[%s1929_s1 + $0x58] sm:$0xff]  ;;  %v1552_v20 = vld [vmem:[%s1929_s1 + $0x50] sm:$0xff] }
  0x10   : > { %264 = vmatpush.bf16.msra.mxu0 %v1556_v4  ;;  %v1563_v13 = vld [vmem:[%s1929_s1 + $0xa0] sm:$0xff]  ;;  %v1562_v17 = vld [vmem:[%s1929_s1 + $0x98] sm:$0xff]  ;;  %v1561_v21 = vld [vmem:[%s1929_s1 + $0x90] sm:$0xff] }
  0x11   : > { %420 = vmatpush.bf16.msra.mxu2 %v1565_v5  ;;  %v1545_v14 = vld [vmem:[%s1929_s1 + $0x20] sm:$0xff]  ;;  %v1544_v18 = vld [vmem:[%s1929_s1 + $0x18] sm:$0xff]  ;;  %v1543_v22 = vld [vmem:[%s1929_s1 + $0x10] sm:$0xff] }
  0x12   : > { %332 = vmatpush.bf16.msra.mxu1 %v1547_v6  ;;  %v1572_v15 = vld [vmem:[%s1929_s1 + $0xe0] sm:$0xff]  ;;  %v1571_v19 = vld [vmem:[%s1929_s1 + $0xd8] sm:$0xff]  ;;  %v1570_v23 = vld [vmem:[%s1929_s1 + $0xd0] sm:$0xff] }
  0x13   : > { %510 = vmatpush.bf16.msra.mxu3 %v1574_v7  ;;  %v1551_v24 = vld [vmem:[%s1929_s1 + $0x48] sm:$0xff]  ;;  %v1550_v28 = vld [vmem:[%s1929_s1 + $0x40] sm:$0xff]  ;;  %v1584_v30 = vld [vmem:[%s1929_s1 + $0x138] sm:$0xff] }
  0x14   : > { %265 = vmatpush.bf16.msra.mxu0 %v1555_v8  ;;  %v1560_v25 = vld [vmem:[%s1929_s1 + $0x88] sm:$0xff]  ;;  %v1559_v29 = vld [vmem:[%s1929_s1 + $0x80] sm:$0xff]  ;;  %v1602_v31 = vld [vmem:[%s1929_s1 + $0x1b8] sm:$0xff] }
  0x15   : > { %421 = vmatpush.bf16.msra.mxu2 %v1564_v9  ;;  %v1542_v26 = vld [vmem:[%s1929_s1 + $0x8] sm:$0xff]  ;;  %v1541_v32 = vld [vmem:[%s1929_s1] sm:$0xff]  ;;  %v1593_v34 = vld [vmem:[%s1929_s1 + $0x178] sm:$0xff] }
  0x16   : > { %333 = vmatpush.bf16.msra.mxu1 %v1546_v10  ;;  %v1569_v27 = vld [vmem:[%s1929_s1 + $0xc8] sm:$0xff]  ;;  %v1568_v33 = vld [vmem:[%s1929_s1 + $0xc0] sm:$0xff]  ;;  %v1611_v35 = vld [vmem:[%s1929_s1 + $0x1f8] sm:$0xff] }
  0x17   : > { %511 = vmatpush.bf16.msra.mxu3 %v1573_v11  ;;  %v1549_v36 = vld [vmem:[%s1778_s4 + $0x18] sm:$0xff]  ;;  %v1558_v37 = vld [vmem:[%s1778_s4 + $0x30] sm:$0xff]  ;;  %v1540_v40 = vld [vmem:[%s1778_s4] sm:$0xff] }
  0x18   : > { %266 = vmatpush.bf16.msra.mxu0 %v1554_v12  ;;  %v1583_v38 = vld [vmem:[%s1929_s1 + $0x130] sm:$0xff]  ;;  %v1582_v44 = vld [vmem:[%s1929_s1 + $0x128] sm:$0xff]  ;;  %v1581_v48 = vld [vmem:[%s1929_s1 + $0x120] sm:$0xff] }
  0x19   : > { %422 = vmatpush.bf16.msra.mxu2 %v1563_v13  ;;  %v1601_v39 = vld [vmem:[%s1929_s1 + $0x1b0] sm:$0xff]  ;;  %v1600_v45 = vld [vmem:[%s1929_s1 + $0x1a8] sm:$0xff]  ;;  %v1599_v49 = vld [vmem:[%s1929_s1 + $0x1a0] sm:$0xff] }
  0x1a   : > { %334 = vmatpush.bf16.msra.mxu1 %v1545_v14  ;;  %v1567_v41 = vld [vmem:[%s1778_s4 + $0xc] sm:$0xff]  ;;  %v1590_v50 = vld [vmem:[%s1929_s1 + $0x160] sm:$0xff]  ;;  %v1580_v52 = vld [vmem:[%s1929_s1 + $0x118] sm:$0xff] }
  0x1b   : > { %512 = vmatpush.bf16.msra.mxu3 %v1572_v15  ;;  %v1592_v42 = vld [vmem:[%s1929_s1 + $0x170] sm:$0xff]  ;;  %v1591_v46 = vld [vmem:[%s1929_s1 + $0x168] sm:$0xff]  ;;  %v1608_v51 = vld [vmem:[%s1929_s1 + $0x1e0] sm:$0xff] }
  0x1c   : > { %267 = vmatpush.bf16.msra.mxu0 %v1553_v16  ;;  %v1610_v43 = vld [vmem:[%s1929_s1 + $0x1f0] sm:$0xff]  ;;  %v1609_v47 = vld [vmem:[%s1929_s1 + $0x1e8] sm:$0xff]  ;;  %v1598_v53 = vld [vmem:[%s1929_s1 + $0x198] sm:$0xff] }
  0x1d   : > { %423 = vmatpush.bf16.msra.mxu2 %v1562_v17  ;;  %v707_v54 = vld [vmem:[%s1778_s4 + $0x8] sm:$0x3]  ;;  %v1589_v55 = vld [vmem:[%s1929_s1 + $0x158] sm:$0xff]  ;;  %v1429_v57 = vld [vmem:[%s1778_s4 + $0x20] sm:$0x3] }
  0x1e   : > { %335 = vmatpush.bf16.msra.mxu1 %v1544_v18  ;;  %v1607_v56 = vld [vmem:[%s1929_s1 + $0x1d8] sm:$0xff]  ;;  %v1579_v58 = vld [vmem:[%s1929_s1 + $0x110] sm:$0xff]  ;;  %v730_v60 = vunpack.c.l.b16 %v707_v54  ;;  %v1393_v61 = vld [vmem:[%s1778_s4] sm:$0xc]  ;;  %v827_v1 = vunpack.c.l.b16 %v1429_v57 }
  0x1f   : > { %513 = vmatpush.bf16.msra.mxu3 %v1571_v19  ;;  %v1597_v59 = vld [vmem:[%s1929_s1 + $0x190] sm:$0xff]  ;;  %v1594_v62 = vld [vmem:[%s1778_s4] sm:$0xf0]  ;;  %v1448_v2 = vld [vmem:[%s1778_s4 + $0x18] sm:$0xc] }
  0x20   : > { %268 = vmatpush.bf16.msra.mxu0 %v1552_v20  ;;  %v1588_v63 = vld [vmem:[%s1929_s1 + $0x150] sm:$0xff]  ;;  %v1603_v3 = vld [vmem:[%s1778_s4 + $0x18] sm:$0xf0]  ;;  %v1578_v4 = vld [vmem:[%s1929_s1 + $0x108] sm:$0xff]  ;;  %v1394_v6 = vor.u32 %v1594_v62, %v1393_v61  ;;  %v732_v7 = vpack.c.b16 %v730_v60, %v730_v60  ;;  %v829_v11 = vpack.c.b16 %v827_v1, %v827_v1 }
  0x21   : > { %424 = vmatpush.bf16.msra.mxu2 %v1561_v21  ;;  %v1606_v0 = vld [vmem:[%s1929_s1 + $0x1d0] sm:$0xff]  ;;  %v1596_v5 = vld [vmem:[%s1929_s1 + $0x188] sm:$0xff]  ;;  %v1449_v10 = vor.u32 %v1603_v3, %v1448_v2  ;;  %v1577_v12 = vld [vmem:[%s1929_s1 + $0x100] sm:$0xff] }
  0x22   : > { %336 = vmatpush.bf16.msra.mxu1 %v1543_v22  ;;  %v1587_v8 = vld [vmem:[%s1929_s1 + $0x148] sm:$0xff]  ;;  %v1595_v13 = vld [vmem:[%s1929_s1 + $0x180] sm:$0xff]  ;;  %v734_v14 = vrot.slane %v1394_v6, 2  ;;  %v735_v15 = vrot.slane %v732_v7, 2  ;;  %v1620_v16 = vld [vmem:[%s1929_s1 + $0x238] sm:$0xff]  ;;  %v831_v20 = vrot.slane %v829_v11, 2 }
  0x23   : > { %514 = vmatpush.bf16.msra.mxu3 %v1570_v23  ;;  %v1605_v9 = vld [vmem:[%s1929_s1 + $0x1c8] sm:$0xff]  ;;  %v1586_v17 = vld [vmem:[%s1929_s1 + $0x140] sm:$0xff]  ;;  %v830_v19 = vrot.slane %v1449_v10, 2 }
  0x24   : > { %269 = vmatpush.bf16.msra.mxu0 %v1551_v24  ;;  %v1604_v18 = vld [vmem:[%s1929_s1 + $0x1c0] sm:$0xff]  ;;  %v736_v22 = vsel %vm733_vm0, %v734_v14, %v735_v15 }
  0x25   : > { %425 = vmatpush.bf16.msra.mxu2 %v1560_v25  ;;  %v1576_v21 = vld [vmem:[%s1778_s4 + $0x24] sm:$0xff]  ;;  %v1585_v23 = vld [vmem:[%s1778_s4 + $0x3c] sm:$0xff]  ;;  %v832_v24 = vsel %vm733_vm0, %v830_v19, %v831_v20  ;;  %v1619_v25 = vld [vmem:[%s1929_s1 + $0x230] sm:$0xff] }
  0x26   : > { %337 = vmatpush.bf16.msra.mxu1 %v1542_v26  ;;  %v1618_v26 = vld [vmem:[%s1929_s1 + $0x228] sm:$0xff] }
  0x27   : > { %515 = vmatpush.bf16.msra.mxu3 %v1569_v27  ;;  %v1617_v27 = vld [vmem:[%s1929_s1 + $0x220] sm:$0xff] }
  0x28   : > { %270 = vmatpush.bf16.msra.mxu0 %v1550_v28  ;;  %v1616_v28 = vld [vmem:[%s1929_s1 + $0x218] sm:$0xff] }
  0x29   : > { %426 = vmatpush.bf16.msra.mxu2 %v1559_v29  ;;  %v1484_v29 = vld [vmem:[%s1778_s4 + $0x38] sm:$0x3] }
  0x2a   : > { %338 = vmatpush.bf16.msra.mxu1 %v1541_v32  ;;  %v1503_v32 = vld [vmem:[%s1778_s4 + $0x30] sm:$0xc] }
  0x2b   : > { %516 = vmatpush.bf16.msra.mxu3 %v1568_v33  ;;  %271 = vmatmul.bf16.vlgmr.msra.gmra.mxu0 %v1549_v36  ;;  %v1612_v33 = vld [vmem:[%s1778_s4 + $0x30] sm:$0xf0] }
  0x2c   : > { %599 = vmatpush.bf16.msrb.mxu0 %v1584_v30  ;;  %427 = vmatmul.bf16.vlgmr.msra.gmra.mxu2 %v1558_v37  ;;  %v1615_v30 = vld [vmem:[%s1929_s1 + $0x210] sm:$0xff]  ;;  %v1613_v37 = vld [vmem:[%s1929_s1 + $0x200] sm:$0xff] }
  0x2d   : > { %786 = vmatpush.bf16.msrb.mxu2 %v1602_v31  ;;  %339 = vmatmul.bf16.vlgmr.msra.gmra.mxu1 %v1540_v40  ;;  %v923_v31 = vunpack.c.l.b16 %v1484_v29 }
  0x2e   : > { %689 = vmatpush.bf16.msrb.mxu1 %v1593_v34  ;;  %517 = vmatmul.bf16.vlgmr.msra.gmra.mxu3 %v1567_v41  ;;  %v1614_v34 = vld [vmem:[%s1929_s1 + $0x208] sm:$0xff] }
  0x2f   : > { %882 = vmatpush.bf16.msrb.mxu3 %v1611_v35  ;;  %v1504_v35 = vor.u32 %v1612_v33, %v1503_v32  ;;  %v925_v36 = vpack.c.b16 %v923_v31, %v923_v31 }
  0x30   : > { %600 = vmatpush.bf16.msrb.mxu0 %v1583_v38 }
  0x31   : > { %787 = vmatpush.bf16.msrb.mxu2 %v1601_v39  ;;  %v926_v38 = vrot.slane %v1504_v35, 2  ;;  %v927_v39 = vrot.slane %v925_v36, 2 }
  0x32   : > { %690 = vmatpush.bf16.msrb.mxu1 %v1592_v42 }
  0x33   : > { %883 = vmatpush.bf16.msrb.mxu3 %v1610_v43  ;;  %v928_v40 = vsel %vm733_vm0, %v926_v38, %v927_v39 }
  0x34   : > { %601 = vmatpush.bf16.msrb.mxu0 %v1582_v44 }
  0x35   : > { %788 = vmatpush.bf16.msrb.mxu2 %v1600_v45 }
  0x36   : > { %691 = vmatpush.bf16.msrb.mxu1 %v1591_v46 }
  0x37   : > { %884 = vmatpush.bf16.msrb.mxu3 %v1609_v47 }
  0x38   : > { %602 = vmatpush.bf16.msrb.mxu0 %v1581_v48 }
  0x39   : > { %789 = vmatpush.bf16.msrb.mxu2 %v1599_v49 }
  0x3a   : > { %692 = vmatpush.bf16.msrb.mxu1 %v1590_v50 }
  0x3b   : > { %885 = vmatpush.bf16.msrb.mxu3 %v1608_v51 }
  0x3c   : > { %603 = vmatpush.bf16.msrb.mxu0 %v1580_v52 }
  0x3d   : > { %790 = vmatpush.bf16.msrb.mxu2 %v1598_v53 }
  0x3e   : > { %693 = vmatpush.bf16.msrb.mxu1 %v1589_v55 }
  0x3f   : > { %886 = vmatpush.bf16.msrb.mxu3 %v1607_v56 }
  0x40   : > { %604 = vmatpush.bf16.msrb.mxu0 %v1579_v58 }
  0x41   : > { %791 = vmatpush.bf16.msrb.mxu2 %v1597_v59 }
  0x42   : > { %694 = vmatpush.bf16.msrb.mxu1 %v1588_v63 }
  0x43   : > { %887 = vmatpush.bf16.msrb.mxu3 %v1606_v0 }
  0x44   : > { %605 = vmatpush.bf16.msrb.mxu0 %v1578_v4 }
  0x45   : > { %792 = vmatpush.bf16.msrb.mxu2 %v1596_v5 }
  0x46   : > { %695 = vmatpush.bf16.msrb.mxu1 %v1587_v8  ;;  %v1635_v8 = vld [vmem:[%s1930_s2] ss:$0 sm:$0xff] }
  0x47   : > { %888 = vmatpush.bf16.msrb.mxu3 %v1605_v9 }
  0x48   : > { %606 = vmatpush.bf16.msrb.mxu0 %v1577_v12 }
  0x49   : > { %793 = vmatpush.bf16.msrb.mxu2 %v1595_v13 }
  0x4a   : > { %696 = vmatpush.bf16.msrb.mxu1 %v1586_v17 }
  0x4b   : > { %889 = vmatpush.bf16.msrb.mxu3 %v1604_v18  ;;  %607 = vmatmul.bf16.vlgmr.msrb.gmra.mxu0 %v1576_v21 }
  0x4c   : > { %978 = vmatpush.bf16.msra.mxu0 %v1620_v16  ;;  %794 = vmatmul.bf16.vlgmr.msrb.gmra.mxu2 %v736_v22 }
  0x4d   : > { %697 = vmatmul.bf16.vlgmr.msrb.gmra.mxu1 %v1585_v23 }
  0x4e   : > { %890 = vmatmul.bf16.vlgmr.msrb.gmra.mxu3 %v832_v24 }
  0x50   : > { %979 = vmatpush.bf16.msra.mxu0 %v1619_v25 }
  0x54   : > { %980 = vmatpush.bf16.msra.mxu0 %v1618_v26 }
  0x58   : > { %981 = vmatpush.bf16.msra.mxu0 %v1617_v27 }
  0x5c   : > { %982 = vmatpush.bf16.msra.mxu0 %v1616_v28 }
  0x60   : > { %983 = vmatpush.bf16.msra.mxu0 %v1615_v30 }
  0x64   : > { %984 = vmatpush.bf16.msra.mxu0 %v1614_v34 }
  0x68   : > { %985 = vmatpush.bf16.msra.mxu0 %v1613_v37 }
  0x6b   : > { %986 = vmatmul.bf16.vlgmr.msra.gmra.mxu0 %v928_v40 }
  0xa8   : > { %v272_v41 = vpop.f32.mrf.mxu0 }
  0xaa   : > { %v340_v42 = vpop.f32.mrf.mxu1 }
  0xab   : > { %v341_v47 = vadd.f32 %v340_v42, %v272_v41 }
  0xaf   : > { %v428_v43 = vpop.f32.mrf.mxu2 }
  0xb0   : > { %v274_v44 = vpop.f32.mrf.mxu0  ;;  %v433_v50 = vadd.f32 %v428_v43, %v341_v47 }
  0xb1   : > { %v518_v45 = vpop.f32.mrf.mxu3 }
  0xb2   : > { %v342_v46 = vpop.f32.mrf.mxu1  ;;  %v523_v52 = vadd.f32 %v518_v45, %v433_v50 }
  0xb3   : > { %v343_v53 = vadd.f32 %v342_v46, %v274_v44 }
  0xb7   : > { %v430_v48 = vpop.f32.mrf.mxu2 }
  0xb8   : > { %v434_v56 = vadd.f32 %v430_v48, %v343_v53 }
  0xb9   : > { %v520_v51 = vpop.f32.mrf.mxu3 }
  0xba   : > { %v524_v60 = vadd.f32 %v520_v51, %v434_v56 }
  0xc8   : > { %v608_v49 = vpop.f32.mrf.mxu0 }
  0xc9   : > { %v613_v57 = vadd.f32 %v608_v49, %v523_v52 }
  0xca   : > { %v698_v54 = vpop.f32.mrf.mxu1 }
  0xcb   : > { %v703_v61 = vadd.f32 %v698_v54, %v613_v57 }
  0xcf   : > { %v795_v55 = vpop.f32.mrf.mxu2 }
  0xd0   : > { %v610_v58 = vpop.f32.mrf.mxu0  ;;  %v800_v0 = vadd.f32 %v795_v55, %v703_v61 }
  0xd1   : > { %v891_v59 = vpop.f32.mrf.mxu3  ;;  %v614_v62 = vadd.f32 %v610_v58, %v524_v60 }
  0xd2   : > { %v700_v63 = vpop.f32.mrf.mxu1  ;;  %v896_v4 = vadd.f32 %v891_v59, %v800_v0 }
  0xd3   : > { %v704_v3 = vadd.f32 %v700_v63, %v614_v62 }
  0xd7   : > { %v797_v1 = vpop.f32.mrf.mxu2 }
  0xd8   : > { %v801_v5 = vadd.f32 %v797_v1, %v704_v3 }
  0xd9   : > { %v893_v6 = vpop.f32.mrf.mxu3 }
  0xda   : > { %v897_v9 = vadd.f32 %v893_v6, %v801_v5 }
  0xe8   : > { %v987_v2 = vpop.f32.mrf.mxu0 }
  0xe9   : > { %v992_v7 = vadd.f32 %v987_v2, %v896_v4 }
  0xeb   : > { %v998_v11 = vadd.f32 %v1635_v8, %v992_v7 }
  0xed   : > { %v1000_v14 = vmax.f32 %v998_v11, 0.0 }
  0xf0   : > { %v989_v10 = vpop.f32.mrf.mxu0 }
  0xf1   : > { %v993_v12 = vadd.f32 %v989_v10, %v897_v9 }
  0xf3   : > { %v999_v13 = vadd.f32 %v1635_v8, %v993_v12 }
  0xf5   : > { %v1001_v15 = vmax.f32 %v999_v13, 0.0 }
  0xf7   : > { %v1624_v16 = vpack.c.bf16 %v1001_v15, %v1000_v14 }
  0xf9   : > { %1625 = vst [vmem:[%s170_s19] sm:$0xff] %v1624_v16  }
  0xfa PF: > { %s13_s12 = sadd.s32 1, %s1642_s12  }
  0xfb   : > { %p10_p4 = scmp.ge.s32.totalorder %s13_s12, 4  }
  0xfd   :  { %12 = sbr.rel (!%p10_p4) target bundleno = 1 (0x1), region = 75 }

// kernel: anynet_forward.20
= control target key start
LH: loop header
LB: loop body
LE: loop exit
PB: predicated region body
PF: predicated region fallthrough
CT: control target
= control target key end

     0   :  { %s473_s12 = smov 0   ;;  %s475_s13 = smov 0   ;;  %s533_s0 = inlined_call_operand.vmem [shape: bf16[2,1,4,128], index: 0, kind: input, shape index: {}]   ;;  %s534_s1 = inlined_call_operand.vmem [shape: bf16[1,128,128], index: 1, kind: input, shape index: {}]   ;;  %s535_s2 = inlined_call_operand.vmem [shape: f32[1,128], index: 2, kind: input, shape index: {}]   ;;  %s536_s3 = inlined_call_operand.vmem [shape: bf16[2,4,128], index: 3, kind: output, shape index: {}]  }
   0x1   :  { %s477_s14 = smov 0  }
   0x2 LB: > { %s25_s15 = sadd.s32 1, %s447_s13  ;;  %p359_p0 = scmp.ge.s32.totalorder %s451_s14, 1  ;;  %s451_s14 = sphi %s477_s14, %s13_s14   ;;  %s447_s13 = sphi %s475_s13, %s538_s13   ;;  %s443_s12 = sphi %s473_s12, %s537_s12  }
   0x3   : > { %p27_p1 = scmp.ge.s32.totalorder %s25_s15, 2  ;;  %p155_p2 = scmp.lt.s32.totalorder %s451_s14, 3 }
   0x5   : > { %s540_s15 = smov (%p27_p1, %s25_s15), 0  ;;  %p156_p3 = pnand %p359_p0, %p155_p2 }
   0x6   : > { %p183_p4 = scmp.lt.s32.totalorder (!%p156_p3), %s443_s12, 1 }
   0x7   : > { %159 = sbr.rel (%p156_p3) target bundleno = 178 (0xb2), region = 32 }
   0xc   : > { %v403_v0 = vld [vmem:[%s534_s1 + $0x38] sm:$0xff]  ;;  %v402_v1 = vld [vmem:[%s534_s1 + $0x30] sm:$0xff]  ;;  %v401_v2 = vld [vmem:[%s534_s1 + $0x28] sm:$0xff]  ;;  %s542_s12 = smov (!%p183_p4, %s443_s12), 1 }
   0xd   : > { %266 = vmatpush.bf16.msra.mxu0 %v403_v0  ;;  %v400_v3 = vld [vmem:[%s534_s1 + $0x20] sm:$0xff]  ;;  %v399_v4 = vld [vmem:[%s534_s1 + $0x18] sm:$0xff]  ;;  %v398_v5 = vld [vmem:[%s534_s1 + $0x10] sm:$0xff]  ;;  %s360_s30 = sshll.u32 %s542_s12, 1 }
   0xe   : > { %v397_v6 = vld [vmem:[%s534_s1 + $0x8] sm:$0xff]  ;;  %v396_v7 = vld [vmem:[%s534_s1] sm:$0xff]  ;;  %s189_s8 = scalar_lea.vmem %s533_s0, %s360_s30  ;;  %s196_s16 = scalar_lea.vmem %s536_s3, %s360_s30 }
   0xf   : > { %v197_v8 = vld [vmem:[%s189_s8] sm:$0x3] }
  0x10   : > { %v428_v9 = vld [vmem:[%s535_s2] ss:$0 sm:$0xff] }
  0x11   : > { %267 = vmatpush.bf16.msra.mxu0 %v402_v1 }
  0x15   : > { %268 = vmatpush.bf16.msra.mxu0 %v401_v2 }
  0x19   : > { %269 = vmatpush.bf16.msra.mxu0 %v400_v3 }
  0x1d   : > { %270 = vmatpush.bf16.msra.mxu0 %v399_v4 }
  0x21   : > { %271 = vmatpush.bf16.msra.mxu0 %v398_v5 }
  0x25   : > { %272 = vmatpush.bf16.msra.mxu0 %v397_v6 }
  0x29   : > { %273 = vmatpush.bf16.msra.mxu0 %v396_v7 }
  0x2c   : > { %274 = vmatmul.bf16.vlgmr.msra.gmra.mxu0 %v197_v8 }
  0xa9   : > { %v275_v10 = vpop.f32.mrf.mxu0 }
  0xaa   : > { %v276_v11 = vadd.f32 %v428_v9, %v275_v10 }
  0xac   : > { %v279_v12 = vpack.c.bf16 %v276_v11, %v276_v11 }
  0xae   : > { %280 = vst [vmem:[%s196_s16] sm:$0x3] %v279_v12 }
  0xb1   : > { %v277_v13 = vpop.f32.mrf.mxu0 }
  0xb2 PF: > { %s13_s14 = sadd.s32 1, %s451_s14   ;;  %s537_s12 = smov %s447_s13 }
  0xb3   : > { %p10_p5 = scmp.ge.s32.totalorder %s13_s14, 4   ;;  %s538_s13 = smov %s540_s15 }
  0xb5   :  { %12 = sbr.rel (!%p10_p5) target bundleno = 2 (0x2), region = 62 }

// kernel: anynet_forward.21
= control target key start
LH: loop header
LB: loop body
LE: loop exit
PB: predicated region body
PF: predicated region fallthrough
CT: control target
= control target key end

     0   :  { %s553_s15 = smov 0   ;;  %s555_s16 = smov 0   ;;  %s616_s0 = inlined_call_operand.vmem [shape: bf16[2,1,4,128], index: 0, kind: input, shape index: {}]   ;;  %s617_s1 = inlined_call_operand.vmem [shape: bf16[1,128,128], index: 1, kind: input, shape index: {}]   ;;  %s618_s2 = inlined_call_operand.vmem [shape: f32[1,128], index: 2, kind: input, shape index: {}]   ;;  %s619_s3 = inlined_call_operand.vmem [shape: bf16[2,4,128], index: 3, kind: input, shape index: {}]   ;;  %s620_s4 = inlined_call_operand.vmem [shape: bf16[2,4,128], index: 4, kind: output, shape index: {}]  }
   0x1   :  { %s557_s17 = smov 0  }
   0x2 LB: > { %s26_s18 = sadd.s32 1, %s522_s16  ;;  %p433_p0 = scmp.ge.s32.totalorder %s526_s17, 1  ;;  %s526_s17 = sphi %s557_s17, %s14_s17   ;;  %s522_s16 = sphi %s555_s16, %s622_s16   ;;  %s518_s15 = sphi %s553_s15, %s621_s15  }
   0x3   : > { %p28_p1 = scmp.ge.s32.totalorder %s26_s18, 2  ;;  %p194_p2 = scmp.lt.s32.totalorder %s526_s17, 3 }
   0x5   : > { %s624_s18 = smov (%p28_p1, %s26_s18), 0  ;;  %p195_p3 = pnand %p433_p0, %p194_p2 }
   0x6   : > { %p231_p4 = scmp.lt.s32.totalorder (!%p195_p3), %s518_s15, 1 }
   0x7   : > { %198 = sbr.rel (%p195_p3) target bundleno = 179 (0xb3), region = 36 }
   0xc   : > { %v478_v0 = vld [vmem:[%s617_s1 + $0x38] sm:$0xff]  ;;  %v477_v1 = vld [vmem:[%s617_s1 + $0x30] sm:$0xff]  ;;  %v476_v2 = vld [vmem:[%s617_s1 + $0x28] sm:$0xff]  ;;  %s626_s15 = smov (!%p231_p4, %s518_s15), 1 }
   0xd   : > { %321 = vmatpush.bf16.msra.mxu0 %v478_v0  ;;  %v475_v3 = vld [vmem:[%s617_s1 + $0x20] sm:$0xff]  ;;  %v474_v4 = vld [vmem:[%s617_s1 + $0x18] sm:$0xff]  ;;  %v473_v5 = vld [vmem:[%s617_s1 + $0x10] sm:$0xff]  ;;  %s434_s7 = sshll.u32 %s626_s15, 1 }
   0xe   : > { %v472_v6 = vld [vmem:[%s617_s1 + $0x8] sm:$0xff]  ;;  %v471_v7 = vld [vmem:[%s617_s1] sm:$0xff]  ;;  %s237_s12 = scalar_lea.vmem %s616_s0, %s434_s7  ;;  %s244_s19 = scalar_lea.vmem %s619_s3, %s434_s7 }
   0xf   : > { %v252_v8 = vld [vmem:[%s237_s12] sm:$0x3]  ;;  %s251_s23 = scalar_lea.vmem %s620_s4, %s434_s7 }
  0x10   : > { %v334_v9 = vld [vmem:[%s244_s19] sm:$0x3] }
  0x11   : > { %322 = vmatpush.bf16.msra.mxu0 %v477_v1  ;;  %v503_v10 = vld [vmem:[%s618_s2] ss:$0 sm:$0xff]  ;;  %v335_v11 = vunpack.c.l.bf16 %v334_v9 }
  0x15   : > { %323 = vmatpush.bf16.msra.mxu0 %v476_v2 }
  0x19   : > { %324 = vmatpush.bf16.msra.mxu0 %v475_v3 }
  0x1d   : > { %325 = vmatpush.bf16.msra.mxu0 %v474_v4 }
  0x21   : > { %326 = vmatpush.bf16.msra.mxu0 %v473_v5 }
  0x25   : > { %327 = vmatpush.bf16.msra.mxu0 %v472_v6 }
  0x29   : > { %328 = vmatpush.bf16.msra.mxu0 %v471_v7 }
  0x2c   : > { %329 = vmatmul.bf16.vlgmr.msra.gmra.mxu0 %v252_v8 }
  0xa9   : > { %v330_v12 = vpop.f32.mrf.mxu0 }
  0xaa   : > { %v331_v13 = vadd.f32 %v503_v10, %v330_v12 }
  0xac   : > { %v336_v14 = vadd.f32 %v335_v11, %v331_v13 }
  0xae   : > { %v337_v15 = vmax.f32 %v336_v14, 0.0 }
  0xb0   : > { %v338_v16 = vpack.c.bf16 %v337_v15, %v337_v15 }
  0xb1   : > { %v332_v17 = vpop.f32.mrf.mxu0 }
  0xb2   : > { %339 = vst [vmem:[%s251_s23] sm:$0x3] %v338_v16 }
  0xb3 PF: > { %s14_s17 = sadd.s32 1, %s526_s17   ;;  %s621_s15 = smov %s522_s16 }
  0xb4   : > { %p11_p5 = scmp.ge.s32.totalorder %s14_s17, 4   ;;  %s622_s16 = smov %s624_s18 }
  0xb6   :  { %13 = sbr.rel (!%p11_p5) target bundleno = 2 (0x2), region = 69 }

// kernel: anynet_forward.22
= control target key start
LH: loop header
LB: loop body
LE: loop exit
PB: predicated region body
PF: predicated region fallthrough
CT: control target
= control target key end

     0   :  { %s474_s12 = smov 0   ;;  %s476_s13 = smov 0   ;;  %s534_s0 = inlined_call_operand.vmem [shape: bf16[2,1,4,128], index: 0, kind: input, shape index: {}]   ;;  %s535_s1 = inlined_call_operand.vmem [shape: bf16[1,128,128], index: 1, kind: input, shape index: {}]   ;;  %s536_s2 = inlined_call_operand.vmem [shape: f32[1,128], index: 2, kind: input, shape index: {}]   ;;  %s537_s3 = inlined_call_operand.vmem [shape: bf16[2,4,128], index: 3, kind: output, shape index: {}]  }
   0x1   :  { %s478_s14 = smov 0  }
   0x2 LB: > { %s25_s15 = sadd.s32 1, %s448_s13  ;;  %p360_p0 = scmp.ge.s32.totalorder %s452_s14, 1  ;;  %s452_s14 = sphi %s478_s14, %s13_s14   ;;  %s448_s13 = sphi %s476_s13, %s539_s13   ;;  %s444_s12 = sphi %s474_s12, %s538_s12  }
   0x3   : > { %p27_p1 = scmp.ge.s32.totalorder %s25_s15, 2  ;;  %p155_p2 = scmp.lt.s32.totalorder %s452_s14, 3 }
   0x5   : > { %s541_s15 = smov (%p27_p1, %s25_s15), 0  ;;  %p156_p3 = pnand %p360_p0, %p155_p2 }
   0x6   : > { %p183_p4 = scmp.lt.s32.totalorder (!%p156_p3), %s444_s12, 1 }
   0x7   : > { %159 = sbr.rel (%p156_p3) target bundleno = 178 (0xb2), region = 32 }
   0xc   : > { %v404_v0 = vld [vmem:[%s535_s1 + $0x38] sm:$0xff]  ;;  %v403_v1 = vld [vmem:[%s535_s1 + $0x30] sm:$0xff]  ;;  %v402_v2 = vld [vmem:[%s535_s1 + $0x28] sm:$0xff]  ;;  %s543_s12 = smov (!%p183_p4, %s444_s12), 1 }
   0xd   : > { %266 = vmatpush.bf16.msra.mxu0 %v404_v0  ;;  %v401_v3 = vld [vmem:[%s535_s1 + $0x20] sm:$0xff]  ;;  %v400_v4 = vld [vmem:[%s535_s1 + $0x18] sm:$0xff]  ;;  %v399_v5 = vld [vmem:[%s535_s1 + $0x10] sm:$0xff]  ;;  %s361_s30 = sshll.u32 %s543_s12, 1 }
   0xe   : > { %v398_v6 = vld [vmem:[%s535_s1 + $0x8] sm:$0xff]  ;;  %v397_v7 = vld [vmem:[%s535_s1] sm:$0xff]  ;;  %s189_s8 = scalar_lea.vmem %s534_s0, %s361_s30  ;;  %s196_s16 = scalar_lea.vmem %s537_s3, %s361_s30 }
   0xf   : > { %v197_v8 = vld [vmem:[%s189_s8] sm:$0x3] }
  0x10   : > { %v429_v9 = vld [vmem:[%s536_s2] ss:$0 sm:$0xff] }
  0x11   : > { %267 = vmatpush.bf16.msra.mxu0 %v403_v1 }
  0x15   : > { %268 = vmatpush.bf16.msra.mxu0 %v402_v2 }
  0x19   : > { %269 = vmatpush.bf16.msra.mxu0 %v401_v3 }
  0x1d   : > { %270 = vmatpush.bf16.msra.mxu0 %v400_v4 }
  0x21   : > { %271 = vmatpush.bf16.msra.mxu0 %v399_v5 }
  0x25   : > { %272 = vmatpush.bf16.msra.mxu0 %v398_v6 }
  0x29   : > { %273 = vmatpush.bf16.msra.mxu0 %v397_v7 }
  0x2c   : > { %274 = vmatmul.bf16.vlgmr.msra.gmra.mxu0 %v197_v8 }
  0xa9   : > { %v275_v10 = vpop.f32.mrf.mxu0 }
  0xaa   : > { %v276_v11 = vadd.f32 %v429_v9, %v275_v10 }
  0xac   : > { %v279_v12 = vmax.f32 %v276_v11, 0.0 }
  0xae   : > { %v280_v13 = vpack.c.bf16 %v279_v12, %v279_v12 }
  0xb0   : > { %281 = vst [vmem:[%s196_s16] sm:$0x3] %v280_v13 }
  0xb1   : > { %v277_v14 = vpop.f32.mrf.mxu0 }
  0xb2 PF: > { %s13_s14 = sadd.s32 1, %s452_s14   ;;  %s538_s12 = smov %s448_s13 }
  0xb3   : > { %p10_p5 = scmp.ge.s32.totalorder %s13_s14, 4   ;;  %s539_s13 = smov %s541_s15 }
  0xb5   :  { %12 = sbr.rel (!%p10_p5) target bundleno = 2 (0x2), region = 62 }

// kernel: anynet_forward.19
= control target key start
LH: loop header
LB: loop body
LE: loop exit
PB: predicated region body
PF: predicated region fallthrough
CT: control target
= control target key end

     0   :  { %s1509_s12 = smov 0   ;;  %s1764_s0 = inlined_call_operand.vmem [shape: bf16[2,6,6,128], index: 0, kind: input, shape index: {}]   ;;  %s1765_s1 = inlined_call_operand.vmem [shape: bf16[9,128,128], index: 1, kind: input, shape index: {}]   ;;  %s1766_s2 = inlined_call_operand.vmem [shape: f32[1,128], index: 2, kind: input, shape index: {}]   ;;  %s1767_s3 = inlined_call_operand.vmem [shape: bf16[2,4,128], index: 3, kind: output, shape index: {}]  }
   0x1 LB: > { %s967_s13 = sadd.s32 4294967295, %s1487_s12   ;;  %p971_p0 = scmp.ge.s32.totalorder %s1487_s12, 1  ;;  %s1487_s12 = sphi %s1509_s12, %s13_s12  }
   0x2   : > { %p137_p1 = scmp.lt.s32.totalorder %s1487_s12, 3 }
   0x4   : > { %p138_p2 = pnand %p971_p0, %p137_p1 }
   0x5   : > { %p160_p3 = scmp.lt.s32.totalorder (!%p138_p2), %s967_s13, 1 }
   0x6   : > { %141 = sbr.rel (%p138_p2) target bundleno = 242 (0xf2), region = 32 }
   0xb   : > { %v1414_v0 = vld [vmem:[%s1765_s1 + $0x78] sm:$0xff]  ;;  %v1413_v4 = vld [vmem:[%s1765_s1 + $0x70] sm:$0xff]  ;;  %v1412_v8 = vld [vmem:[%s1765_s1 + $0x68] sm:$0xff]  ;;  %s1769_s13 = smov (!%p160_p3, %s967_s13), 1 }
   0xc   : > { %v1422_v1 = vld [vmem:[%s1765_s1 + $0xb8] sm:$0xff]  ;;  %253 = vmatpush.bf16.msra.mxu0 %v1414_v0  ;;  %v1421_v5 = vld [vmem:[%s1765_s1 + $0xb0] sm:$0xff]  ;;  %v1420_v9 = vld [vmem:[%s1765_s1 + $0xa8] sm:$0xff]  ;;  %s1471_s20 = smul.u32 24, %s1769_s13  ;;  %s973_s16 = sshll.u32 %s1769_s13, 1 }
   0xd   : > { %v1430_v2 = vld [vmem:[%s1765_s1 + $0xf8] sm:$0xff]  ;;  %394 = vmatpush.bf16.msra.mxu2 %v1422_v1  ;;  %v1429_v6 = vld [vmem:[%s1765_s1 + $0xf0] sm:$0xff]  ;;  %v1428_v10 = vld [vmem:[%s1765_s1 + $0xe8] sm:$0xff]  ;;  %s168_s19 = scalar_lea.vmem %s1767_s3, %s973_s16 }
   0xe   : > { %v1406_v3 = vld [vmem:[%s1765_s1 + $0x38] sm:$0xff]  ;;  %475 = vmatpush.bf16.msra.mxu3 %v1430_v2  ;;  %v1405_v7 = vld [vmem:[%s1765_s1 + $0x30] sm:$0xff]  ;;  %v1404_v11 = vld [vmem:[%s1765_s1 + $0x28] sm:$0xff]  ;;  %s1629_s8 = scalar_lea.vmem %s1764_s0, %s1471_s20 }
   0xf   : > { %314 = vmatpush.bf16.msra.mxu1 %v1406_v3  ;;  %v1411_v12 = vld [vmem:[%s1765_s1 + $0x60] sm:$0xff]  ;;  %v1410_v16 = vld [vmem:[%s1765_s1 + $0x58] sm:$0xff]  ;;  %v1409_v20 = vld [vmem:[%s1765_s1 + $0x50] sm:$0xff] }
  0x10   : > { %254 = vmatpush.bf16.msra.mxu0 %v1413_v4  ;;  %v1419_v13 = vld [vmem:[%s1765_s1 + $0xa0] sm:$0xff]  ;;  %v1418_v17 = vld [vmem:[%s1765_s1 + $0x98] sm:$0xff]  ;;  %v1417_v21 = vld [vmem:[%s1765_s1 + $0x90] sm:$0xff] }
  0x11   : > { %395 = vmatpush.bf16.msra.mxu2 %v1421_v5  ;;  %v1427_v14 = vld [vmem:[%s1765_s1 + $0xe0] sm:$0xff]  ;;  %v1426_v18 = vld [vmem:[%s1765_s1 + $0xd8] sm:$0xff]  ;;  %v1425_v22 = vld [vmem:[%s1765_s1 + $0xd0] sm:$0xff] }
  0x12   : > { %476 = vmatpush.bf16.msra.mxu3 %v1429_v6  ;;  %v1403_v15 = vld [vmem:[%s1765_s1 + $0x20] sm:$0xff]  ;;  %v1402_v19 = vld [vmem:[%s1765_s1 + $0x18] sm:$0xff]  ;;  %v1401_v23 = vld [vmem:[%s1765_s1 + $0x10] sm:$0xff] }
  0x13   : > { %315 = vmatpush.bf16.msra.mxu1 %v1405_v7  ;;  %v1408_v24 = vld [vmem:[%s1765_s1 + $0x48] sm:$0xff]  ;;  %v1407_v28 = vld [vmem:[%s1765_s1 + $0x40] sm:$0xff]  ;;  %v1438_v30 = vld [vmem:[%s1765_s1 + $0x138] sm:$0xff] }
  0x14   : > { %255 = vmatpush.bf16.msra.mxu0 %v1412_v8  ;;  %v1416_v25 = vld [vmem:[%s1765_s1 + $0x88] sm:$0xff]  ;;  %v1415_v29 = vld [vmem:[%s1765_s1 + $0x80] sm:$0xff]  ;;  %v1454_v31 = vld [vmem:[%s1765_s1 + $0x1b8] sm:$0xff] }
  0x15   : > { %396 = vmatpush.bf16.msra.mxu2 %v1420_v9  ;;  %v1424_v26 = vld [vmem:[%s1765_s1 + $0xc8] sm:$0xff]  ;;  %v1423_v32 = vld [vmem:[%s1765_s1 + $0xc0] sm:$0xff]  ;;  %v1462_v34 = vld [vmem:[%s1765_s1 + $0x1f8] sm:$0xff] }
  0x16   : > { %477 = vmatpush.bf16.msra.mxu3 %v1428_v10  ;;  %v1400_v27 = vld [vmem:[%s1765_s1 + $0x8] sm:$0xff]  ;;  %v1399_v33 = vld [vmem:[%s1765_s1] sm:$0xff]  ;;  %v1446_v35 = vld [vmem:[%s1765_s1 + $0x178] sm:$0xff] }
  0x17   : > { %316 = vmatpush.bf16.msra.mxu1 %v1404_v11  ;;  %v1437_v36 = vld [vmem:[%s1765_s1 + $0x130] sm:$0xff]  ;;  %v974_v39 = vld [vmem:[%s1629_s8 + $0x8] sm:$0x3]  ;;  %v1104_v42 = vld [vmem:[%s1629_s8 + $0x4] sm:$0x3] }
  0x18   : > { %256 = vmatpush.bf16.msra.mxu0 %v1411_v12  ;;  %v1453_v37 = vld [vmem:[%s1765_s1 + $0x1b0] sm:$0xff]  ;;  %v169_v43 = vld [vmem:[%s1629_s8] sm:$0x3]  ;;  %v1436_v44 = vld [vmem:[%s1765_s1 + $0x128] sm:$0xff] }
  0x19   : > { %397 = vmatpush.bf16.msra.mxu2 %v1419_v13  ;;  %v1055_v38 = vld [vmem:[%s1629_s8 + $0x10] sm:$0x3]  ;;  %v1452_v45 = vld [vmem:[%s1765_s1 + $0x1a8] sm:$0xff]  ;;  %v1435_v48 = vld [vmem:[%s1765_s1 + $0x120] sm:$0xff] }
  0x1a   : > { %478 = vmatpush.bf16.msra.mxu3 %v1427_v14  ;;  %v1461_v40 = vld [vmem:[%s1765_s1 + $0x1f0] sm:$0xff]  ;;  %v1460_v46 = vld [vmem:[%s1765_s1 + $0x1e8] sm:$0xff]  ;;  %v1451_v49 = vld [vmem:[%s1765_s1 + $0x1a0] sm:$0xff] }
  0x1b   : > { %317 = vmatpush.bf16.msra.mxu1 %v1403_v15  ;;  %v1445_v41 = vld [vmem:[%s1765_s1 + $0x170] sm:$0xff]  ;;  %v1444_v47 = vld [vmem:[%s1765_s1 + $0x168] sm:$0xff]  ;;  %v1459_v50 = vld [vmem:[%s1765_s1 + $0x1e0] sm:$0xff] }
  0x1c   : > { %257 = vmatpush.bf16.msra.mxu0 %v1410_v16  ;;  %v1443_v51 = vld [vmem:[%s1765_s1 + $0x160] sm:$0xff]  ;;  %v1434_v52 = vld [vmem:[%s1765_s1 + $0x118] sm:$0xff]  ;;  %v1433_v56 = vld [vmem:[%s1765_s1 + $0x110] sm:$0xff] }
  0x1d   : > { %398 = vmatpush.bf16.msra.mxu2 %v1418_v17  ;;  %v1450_v53 = vld [vmem:[%s1765_s1 + $0x198] sm:$0xff]  ;;  %v1449_v57 = vld [vmem:[%s1765_s1 + $0x190] sm:$0xff]  ;;  %v651_v58 = vld [vmem:[%s1629_s8] sm:$0x6] }
  0x1e   : > { %479 = vmatpush.bf16.msra.mxu3 %v1426_v18  ;;  %v1458_v54 = vld [vmem:[%s1765_s1 + $0x1d8] sm:$0xff]  ;;  %v1457_v59 = vld [vmem:[%s1765_s1 + $0x1d0] sm:$0xff]  ;;  %v1299_v61 = vld [vmem:[%s1629_s8 + $0x8] sm:$0x6]  ;;  %v670_v62 = vunpack.c.l.b16 %v651_v58 }
  0x1f   : > { %318 = vmatpush.bf16.msra.mxu1 %v1402_v19  ;;  %v1442_v55 = vld [vmem:[%s1765_s1 + $0x158] sm:$0xff]  ;;  %v1441_v60 = vld [vmem:[%s1765_s1 + $0x150] sm:$0xff]  ;;  %v1432_v63 = vld [vmem:[%s1765_s1 + $0x108] sm:$0xff]  ;;  %v755_v1 = vunpack.c.l.b16 %v1299_v61 }
  0x20   : > { %258 = vmatpush.bf16.msra.mxu0 %v1409_v20  ;;  %v1448_v0 = vld [vmem:[%s1765_s1 + $0x188] sm:$0xff]  ;;  %v671_v4 = vpack.c.b16 %v670_v62, %v670_v62  ;;  %v1431_v5 = vld [vmem:[%s1765_s1 + $0x100] sm:$0xff]  ;;  %v1470_v7 = vld [vmem:[%s1765_s1 + $0x238] sm:$0xff] }
  0x21   : > { %399 = vmatpush.bf16.msra.mxu2 %v1417_v21  ;;  %v1456_v2 = vld [vmem:[%s1765_s1 + $0x1c8] sm:$0xff]  ;;  %v1447_v6 = vld [vmem:[%s1765_s1 + $0x180] sm:$0xff]  ;;  %v756_v8 = vpack.c.b16 %v755_v1, %v755_v1  ;;  %v1469_v13 = vld [vmem:[%s1765_s1 + $0x230] sm:$0xff] }
  0x22   : > { %480 = vmatpush.bf16.msra.mxu3 %v1425_v22  ;;  %v1440_v3 = vld [vmem:[%s1765_s1 + $0x148] sm:$0xff]  ;;  %v1455_v9 = vld [vmem:[%s1765_s1 + $0x1c0] sm:$0xff]  ;;  %v672_v11 = vrot.slane %v671_v4, 1  ;;  %v1202_v15 = vld [vmem:[%s1629_s8 + $0x14] sm:$0x3] }
  0x23   : > { %319 = vmatpush.bf16.msra.mxu1 %v1401_v23  ;;  %v1439_v10 = vld [vmem:[%s1765_s1 + $0x140] sm:$0xff]  ;;  %v1153_v12 = vld [vmem:[%s1629_s8 + $0xc] sm:$0x3]  ;;  %v757_v14 = vrot.slane %v756_v8, 1  ;;  %v1466_v18 = vld [vmem:[%s1765_s1 + $0x218] sm:$0xff] }
  0x24   : > { %259 = vmatpush.bf16.msra.mxu0 %v1408_v24  ;;  %v1468_v16 = vld [vmem:[%s1765_s1 + $0x228] sm:$0xff]  ;;  %v1467_v17 = vld [vmem:[%s1765_s1 + $0x220] sm:$0xff]  ;;  %v1465_v19 = vld [vmem:[%s1765_s1 + $0x210] sm:$0xff] }
  0x25   : > { %400 = vmatpush.bf16.msra.mxu2 %v1416_v25  ;;  %v1348_v20 = vld [vmem:[%s1629_s8 + $0x10] sm:$0x6]  ;;  %v1464_v22 = vld [vmem:[%s1765_s1 + $0x208] sm:$0xff]  ;;  %v1463_v24 = vld [vmem:[%s1765_s1 + $0x200] sm:$0xff] }
  0x26   : > { %481 = vmatpush.bf16.msra.mxu3 %v1424_v26  ;;  %v840_v21 = vunpack.c.l.b16 %v1348_v20 }
  0x27   : > { %320 = vmatpush.bf16.msra.mxu1 %v1400_v27 }
  0x28   : > { %260 = vmatpush.bf16.msra.mxu0 %v1407_v28  ;;  %v841_v23 = vpack.c.b16 %v840_v21, %v840_v21 }
  0x29   : > { %401 = vmatpush.bf16.msra.mxu2 %v1415_v29 }
  0x2a   : > { %482 = vmatpush.bf16.msra.mxu3 %v1423_v32  ;;  %v842_v25 = vrot.slane %v841_v23, 1 }
  0x2b   : > { %321 = vmatpush.bf16.msra.mxu1 %v1399_v33  ;;  %261 = vmatmul.bf16.vlgmr.msra.gmra.mxu0 %v974_v39 }
  0x2c   : > { %556 = vmatpush.bf16.msrb.mxu0 %v1438_v30  ;;  %402 = vmatmul.bf16.vlgmr.msra.gmra.mxu2 %v1055_v38 }
  0x2d   : > { %722 = vmatpush.bf16.msrb.mxu2 %v1454_v31  ;;  %483 = vmatmul.bf16.vlgmr.msra.gmra.mxu3 %v1104_v42 }
  0x2e   : > { %807 = vmatpush.bf16.msrb.mxu3 %v1462_v34  ;;  %322 = vmatmul.bf16.vlgmr.msra.gmra.mxu1 %v169_v43 }
  0x2f   : > { %637 = vmatpush.bf16.msrb.mxu1 %v1446_v35 }
  0x30   : > { %557 = vmatpush.bf16.msrb.mxu0 %v1437_v36 }
  0x31   : > { %723 = vmatpush.bf16.msrb.mxu2 %v1453_v37 }
  0x32   : > { %808 = vmatpush.bf16.msrb.mxu3 %v1461_v40 }
  0x33   : > { %638 = vmatpush.bf16.msrb.mxu1 %v1445_v41 }
  0x34   : > { %558 = vmatpush.bf16.msrb.mxu0 %v1436_v44 }
  0x35   : > { %724 = vmatpush.bf16.msrb.mxu2 %v1452_v45 }
  0x36   : > { %809 = vmatpush.bf16.msrb.mxu3 %v1460_v46 }
  0x37   : > { %639 = vmatpush.bf16.msrb.mxu1 %v1444_v47 }
  0x38   : > { %559 = vmatpush.bf16.msrb.mxu0 %v1435_v48 }
  0x39   : > { %725 = vmatpush.bf16.msrb.mxu2 %v1451_v49  ;;  %v1480_v49 = vld [vmem:[%s1766_s2] ss:$0 sm:$0xff] }
  0x3a   : > { %810 = vmatpush.bf16.msrb.mxu3 %v1459_v50 }
  0x3b   : > { %640 = vmatpush.bf16.msrb.mxu1 %v1443_v51 }
  0x3c   : > { %560 = vmatpush.bf16.msrb.mxu0 %v1434_v52 }
  0x3d   : > { %726 = vmatpush.bf16.msrb.mxu2 %v1450_v53 }
  0x3e   : > { %811 = vmatpush.bf16.msrb.mxu3 %v1458_v54 }
  0x3f   : > { %641 = vmatpush.bf16.msrb.mxu1 %v1442_v55 }
  0x40   : > { %561 = vmatpush.bf16.msrb.mxu0 %v1433_v56 }
  0x41   : > { %727 = vmatpush.bf16.msrb.mxu2 %v1449_v57 }
  0x42   : > { %812 = vmatpush.bf16.msrb.mxu3 %v1457_v59 }
  0x43   : > { %642 = vmatpush.bf16.msrb.mxu1 %v1441_v60 }
  0x44   : > { %562 = vmatpush.bf16.msrb.mxu0 %v1432_v63 }
  0x45   : > { %728 = vmatpush.bf16.msrb.mxu2 %v1448_v0 }
  0x46   : > { %813 = vmatpush.bf16.msrb.mxu3 %v1456_v2 }
  0x47   : > { %643 = vmatpush.bf16.msrb.mxu1 %v1440_v3 }
  0x48   : > { %563 = vmatpush.bf16.msrb.mxu0 %v1431_v5 }
  0x49   : > { %729 = vmatpush.bf16.msrb.mxu2 %v1447_v6 }
  0x4a   : > { %814 = vmatpush.bf16.msrb.mxu3 %v1455_v9 }
  0x4b   : > { %644 = vmatpush.bf16.msrb.mxu1 %v1439_v10  ;;  %564 = vmatmul.bf16.vlgmr.msrb.gmra.mxu0 %v1153_v12 }
  0x4c   : > { %892 = vmatpush.bf16.msra.mxu0 %v1470_v7  ;;  %730 = vmatmul.bf16.vlgmr.msrb.gmra.mxu2 %v672_v11 }
  0x4d   : > { %815 = vmatmul.bf16.vlgmr.msrb.gmra.mxu3 %v757_v14 }
  0x4e   : > { %645 = vmatmul.bf16.vlgmr.msrb.gmra.mxu1 %v1202_v15 }
  0x50   : > { %893 = vmatpush.bf16.msra.mxu0 %v1469_v13 }
  0x54   : > { %894 = vmatpush.bf16.msra.mxu0 %v1468_v16 }
  0x58   : > { %895 = vmatpush.bf16.msra.mxu0 %v1467_v17 }
  0x5c   : > { %896 = vmatpush.bf16.msra.mxu0 %v1466_v18 }
  0x60   : > { %897 = vmatpush.bf16.msra.mxu0 %v1465_v19 }
  0x64   : > { %898 = vmatpush.bf16.msra.mxu0 %v1464_v22 }
  0x68   : > { %899 = vmatpush.bf16.msra.mxu0 %v1463_v24 }
  0x6b   : > { %900 = vmatmul.bf16.vlgmr.msra.gmra.mxu0 %v842_v25 }
  0xa8   : > { %v262_v26 = vpop.f32.mrf.mxu0 }
  0xab   : > { %v323_v27 = vpop.f32.mrf.mxu1 }
  0xac   : > { %v324_v36 = vadd.f32 %v323_v27, %v262_v26 }
  0xaf   : > { %v403_v28 = vpop.f32.mrf.mxu2 }
  0xb0   : > { %v484_v29 = vpop.f32.mrf.mxu3  ;;  %v264_v30 = vpop.f32.mrf.mxu0  ;;  %v407_v38 = vadd.f32 %v403_v28, %v324_v36 }
  0xb2   : > { %v488_v42 = vadd.f32 %v484_v29, %v407_v38 }
  0xb3   : > { %v325_v31 = vpop.f32.mrf.mxu1 }
  0xb7   : > { %v405_v32 = vpop.f32.mrf.mxu2 }
  0xb8   : > { %v486_v33 = vpop.f32.mrf.mxu3 }
  0xc8   : > { %v565_v34 = vpop.f32.mrf.mxu0 }
  0xc9   : > { %v569_v44 = vadd.f32 %v565_v34, %v488_v42 }
  0xcb   : > { %v646_v35 = vpop.f32.mrf.mxu1 }
  0xcc   : > { %v650_v46 = vadd.f32 %v646_v35, %v569_v44 }
  0xcf   : > { %v731_v37 = vpop.f32.mrf.mxu2 }
  0xd0   : > { %v816_v39 = vpop.f32.mrf.mxu3  ;;  %v567_v40 = vpop.f32.mrf.mxu0  ;;  %v735_v47 = vadd.f32 %v731_v37, %v650_v46 }
  0xd2   : > { %v820_v48 = vadd.f32 %v816_v39, %v735_v47 }
  0xd3   : > { %v648_v41 = vpop.f32.mrf.mxu1 }
  0xd7   : > { %v733_v43 = vpop.f32.mrf.mxu2 }
  0xd8   : > { %v818_v45 = vpop.f32.mrf.mxu3 }
  0xe8   : > { %v901_v50 = vpop.f32.mrf.mxu0 }
  0xe9   : > { %v905_v51 = vadd.f32 %v901_v50, %v820_v48 }
  0xeb   : > { %v910_v52 = vadd.f32 %v1480_v49, %v905_v51 }
  0xed   : > { %v911_v53 = vmax.f32 %v910_v52, 0.0 }
  0xef   : > { %v912_v54 = vpack.c.bf16 %v911_v53, %v911_v53 }
  0xf0   : > { %v903_v55 = vpop.f32.mrf.mxu0 }
  0xf1   : > { %913 = vst [vmem:[%s168_s19] sm:$0x3] %v912_v54 }
  0xf2 PF: > { %s13_s12 = sadd.s32 1, %s1487_s12  }
  0xf3   : > { %p10_p4 = scmp.ge.s32.totalorder %s13_s12, 4  }
  0xf5   :  { %12 = sbr.rel (!%p10_p4) target bundleno = 1 (0x1), region = 75 }

// kernel: anynet_forward.25
= control target key start
LH: loop header
LB: loop body
LE: loop exit
PB: predicated region body
PF: predicated region fallthrough
CT: control target
= control target key end

     0   :  { %vm19_vm0 = vcmask 1043456   ;;  %s207_s0 = inlined_call_operand.vmem [shape: bf16[2,4,128], index: 0, kind: input, shape index: {}]   ;;  %s208_s1 = inlined_call_operand.vmem [shape: f32[128,128], index: 1, kind: input, shape index: {}]   ;;  %s209_s2 = inlined_call_operand.vmem [shape: f32[1,128], index: 2, kind: input, shape index: {}]   ;;  %s210_s3 = inlined_call_operand.hbm [shape: f32[2,128], index: 3, kind: output, shape index: {}]  }
   0x1   :  { %v51_v0 = vld [vmem:[%s208_s1 + $0x78] sm:$0xff]  ;;  %v50_v1 = vld [vmem:[%s208_s1 + $0x70] sm:$0xff]  ;;  %v49_v2 = vld [vmem:[%s208_s1 + $0x68] sm:$0xff] }
   0x2   :  { %61 = vmatpush.msra.mxu0 %v51_v0  ;;  %v48_v3 = vld [vmem:[%s208_s1 + $0x60] sm:$0xff]  ;;  %v47_v6 = vld [vmem:[%s208_s1 + $0x58] sm:$0xff] }
   0x3   :  { %v15_v4 = vld [vmem:[%s207_s0] sm:$0x3]  ;;  %v16_v5 = vld [vmem:[%s207_s0 + $0x2] sm:$0x3] }
   0x4   :  { %62 = vmatpush.msra.mxu0 %v50_v1  ;;  %v17_v7 = vunpack.c.l.bf16 %v15_v4  ;;  %v18_v8 = vunpack.c.l.bf16 %v16_v5 }
   0x6   :  { %63 = vmatpush.msra.mxu0 %v49_v2 }
   0x7   :  { %8 = vsyncpa [#allocation3], 0  ;;  %v46_v9 = vld [vmem:[%s208_s1 + $0x50] sm:$0xff]  ;;  %v20_v10 = vsel %vm19_vm0, %v17_v7, 0.0  ;;  %v27_v11 = vsel %vm19_vm0, %v18_v8, 0.0  ;;  %v45_v14 = vld [vmem:[%s208_s1 + $0x48] sm:$0xff] }
   0x8   :  { %64 = vmatpush.msra.mxu0 %v48_v3  ;;  %v21_v12 = vrot.slane %v20_v10, 4  ;;  %v28_v13 = vrot.slane %v27_v11, 4  ;;  %v44_v17 = vld [vmem:[%s208_s1 + $0x40] sm:$0xff]  ;;  %v43_v20 = vld [vmem:[%s208_s1 + $0x38] sm:$0xff]  ;;  %v42_v23 = vld [vmem:[%s208_s1 + $0x30] sm:$0xff]  ;;  %vm58_vm1 = vcmask 1041409  }
   0x9   :  { %v41_v26 = vld [vmem:[%s208_s1 + $0x28] sm:$0xff]  ;;  %v40_v27 = vld [vmem:[%s208_s1 + $0x20] sm:$0xff]  ;;  %v39_v30 = vld [vmem:[%s208_s1 + $0x18] sm:$0xff]  ;;  %s126_s22 = smov [#allocation2]   ;;  %s89_s26 = sshll.u32 %s210_s3, 4  ;;  %s90_s26 = int_to_ptr.hbm [resolvable:$true] %s89_s26 }
   0xa   :  { %65 = vmatpush.msra.mxu0 %v47_v6  ;;  %v22_v15 = vadd.f32 %v21_v12, %v20_v10  ;;  %v29_v16 = vadd.f32 %v28_v13, %v27_v11  ;;  %v38_v31 = vld [vmem:[%s208_s1 + $0x10] sm:$0xff]  ;;  %v37_v34 = vld [vmem:[%s208_s1 + $0x8] sm:$0xff]  ;;  %v36_v35 = vld [vmem:[%s208_s1] sm:$0xff]  ;;  %s87_s23 = sshll.u32 %s126_s22, 4  ;;  %s88_s23 = int_to_ptr.vmem [resolvable:$true] %s87_s23 }
   0xb   :  { %v99_v37 = vld [vmem:[%s209_s2] ss:$0 sm:$0xff] }
   0xc   :  { %66 = vmatpush.msra.mxu0 %v46_v9  ;;  %v23_v18 = vrot.slane %v22_v15, 2  ;;  %v30_v19 = vrot.slane %v29_v16, 2 }
   0xe   :  { %67 = vmatpush.msra.mxu0 %v45_v14  ;;  %v24_v21 = vadd.f32 %v23_v18, %v22_v15  ;;  %v31_v22 = vadd.f32 %v30_v19, %v29_v16 }
  0x10   :  { %68 = vmatpush.msra.mxu0 %v44_v17  ;;  %v25_v24 = vrot.slane %v24_v21, 1  ;;  %v32_v25 = vrot.slane %v31_v22, 1 }
  0x12   :  { %69 = vmatpush.msra.mxu0 %v43_v20  ;;  %v26_v28 = vadd.f32 %v25_v24, %v24_v21  ;;  %v33_v29 = vadd.f32 %v32_v25, %v31_v22 }
  0x14   :  { %70 = vmatpush.msra.mxu0 %v42_v23  ;;  %v34_v32 = vmul.f32 0.25, %v26_v28  ;;  %v35_v33 = vmul.f32 0.25, %v33_v29 }
  0x16   :  { %71 = vmatpush.msra.mxu0 %v41_v26  ;;  %v59_v36 = vsel %vm58_vm1, %v35_v33, %v34_v32 }
  0x18   :  { %72 = vmatpush.msra.mxu0 %v40_v27 }
  0x1a   :  { %73 = vmatpush.msra.mxu0 %v39_v30 }
  0x1c   :  { %74 = vmatpush.msra.mxu0 %v38_v31 }
  0x1e   :  { %75 = vmatpush.msra.mxu0 %v37_v34 }
  0x20   :  { %76 = vmatpush.msra.mxu0 %v36_v35 }
  0x21   :  { %77 = vmatmul.f32.vlgmr.msra.gmra.mxu0 %v59_v36 }
  0x9e   :  { %v78_v38 = vpop.f32.mrf.mxu0 }
  0x9f   :  { %v79_v39 = vadd.f32 %v99_v37, %v78_v38 }
  0xa1   :  { %81 = vst [vmem:[#allocation2] sm:$0x3] %v79_v39 }
  0xa2   :  { %92 = dma.vmem_to_hbm [thread:$0]  %s88_s23, 32, %s90_s26, [#allocation3]  }
  0xa3   :  { %124 = dma.done.wait [#allocation3], 32  }
  0xa4   :  { %125 = vsyncadd [#allocation3], 4294967264 }
  0xa5   :  { %97 = vsyncpa [#allocation3], 1 }

// kernel: anynet_forward.23
= control target key start
LH: loop header
LB: loop body
LE: loop exit
PB: predicated region body
PF: predicated region fallthrough
CT: control target
= control target key end

     0   :  { %s1549_s12 = smov 0   ;;  %s1820_s0 = inlined_call_operand.vmem [shape: bf16[2,1,20,128], index: 0, kind: input, shape index: {}]   ;;  %s1821_s1 = inlined_call_operand.vmem [shape: bf16[9,128,128], index: 1, kind: input, shape index: {}]   ;;  %s1822_s2 = inlined_call_operand.vmem [shape: f32[1,128], index: 2, kind: input, shape index: {}]   ;;  %s1823_s3 = inlined_call_operand.vmem [shape: bf16[2,2,2,128], index: 3, kind: output, shape index: {}]  }
   0x1 LB: > { %s1014_s13 = sadd.s32 4294967295, %s1527_s12   ;;  %p1018_p0 = scmp.ge.s32.totalorder %s1527_s12, 1  ;;  %s1527_s12 = sphi %s1549_s12, %s13_s12  }
   0x2   : > { %p137_p1 = scmp.lt.s32.totalorder %s1527_s12, 3 }
   0x4   : > { %p138_p2 = pnand %p1018_p0, %p137_p1 }
   0x5   : > { %p160_p3 = scmp.lt.s32.totalorder (!%p138_p2), %s1014_s13, 1 }
   0x6   : > { %141 = sbr.rel (%p138_p2) target bundleno = 244 (0xf4), region = 32 }
   0xb   : > { %v1454_v0 = vld [vmem:[%s1821_s1 + $0x78] sm:$0xff]  ;;  %v1453_v4 = vld [vmem:[%s1821_s1 + $0x70] sm:$0xff]  ;;  %s1825_s13 = smov (!%p160_p3, %s1014_s13), 1  ;;  %v1452_v8 = vld [vmem:[%s1821_s1 + $0x68] sm:$0xff] }
   0xc   : > { %v1462_v1 = vld [vmem:[%s1821_s1 + $0xb8] sm:$0xff]  ;;  %265 = vmatpush.bf16.msra.mxu0 %v1454_v0  ;;  %v1461_v5 = vld [vmem:[%s1821_s1 + $0xb0] sm:$0xff]  ;;  %v1460_v9 = vld [vmem:[%s1821_s1 + $0xa8] sm:$0xff]  ;;  %s1511_s11 = smul.u32 12, %s1825_s13  ;;  %s1020_s17 = sshll.u32 %s1825_s13, 1 }
   0xd   : > { %v1470_v2 = vld [vmem:[%s1821_s1 + $0xf8] sm:$0xff]  ;;  %410 = vmatpush.bf16.msra.mxu2 %v1462_v1  ;;  %v1469_v6 = vld [vmem:[%s1821_s1 + $0xf0] sm:$0xff]  ;;  %v1468_v10 = vld [vmem:[%s1821_s1 + $0xe8] sm:$0xff]  ;;  %s168_s20 = scalar_lea.vmem %s1823_s3, %s1020_s17 }
   0xe   : > { %v1446_v3 = vld [vmem:[%s1821_s1 + $0x38] sm:$0xff]  ;;  %498 = vmatpush.bf16.msra.mxu3 %v1470_v2  ;;  %v1445_v7 = vld [vmem:[%s1821_s1 + $0x30] sm:$0xff]  ;;  %v1444_v11 = vld [vmem:[%s1821_s1 + $0x28] sm:$0xff]  ;;  %s1611_s24 = scalar_lea.vmem %s1820_s0, %s1511_s11 }
   0xf   : > { %326 = vmatpush.bf16.msra.mxu1 %v1446_v3  ;;  %v1451_v12 = vld [vmem:[%s1821_s1 + $0x60] sm:$0xff]  ;;  %v1450_v16 = vld [vmem:[%s1821_s1 + $0x58] sm:$0xff]  ;;  %v1449_v23 = vld [vmem:[%s1821_s1 + $0x50] sm:$0xff] }
  0x10   : > { %266 = vmatpush.bf16.msra.mxu0 %v1453_v4  ;;  %v1459_v13 = vld [vmem:[%s1821_s1 + $0xa0] sm:$0xff]  ;;  %v1458_v17 = vld [vmem:[%s1821_s1 + $0x98] sm:$0xff]  ;;  %v1457_v24 = vld [vmem:[%s1821_s1 + $0x90] sm:$0xff] }
  0x11   : > { %411 = vmatpush.bf16.msra.mxu2 %v1461_v5  ;;  %v1467_v14 = vld [vmem:[%s1821_s1 + $0xe0] sm:$0xff]  ;;  %v1466_v18 = vld [vmem:[%s1821_s1 + $0xd8] sm:$0xff]  ;;  %v1465_v26 = vld [vmem:[%s1821_s1 + $0xd0] sm:$0xff] }
  0x12   : > { %499 = vmatpush.bf16.msra.mxu3 %v1469_v6  ;;  %v1443_v15 = vld [vmem:[%s1821_s1 + $0x20] sm:$0xff]  ;;  %v1442_v19 = vld [vmem:[%s1821_s1 + $0x18] sm:$0xff]  ;;  %v1441_v27 = vld [vmem:[%s1821_s1 + $0x10] sm:$0xff] }
  0x13   : > { %327 = vmatpush.bf16.msra.mxu1 %v1445_v7  ;;  %v186_v20 = vld [vmem:[%s1611_s24 + $0x4] sm:$0x1]  ;;  %v1627_v22 = vld [vmem:[%s1611_s24] sm:$0xf]  ;;  %v1448_v32 = vld [vmem:[%s1821_s1 + $0x48] sm:$0xff] }
  0x14   : > { %267 = vmatpush.bf16.msra.mxu0 %v1452_v8  ;;  %v207_v21 = vunpack.c.l.b16 %v186_v20  ;;  %v206_v25 = vunpack.c.l.b16 %v1627_v22  ;;  %v339_v28 = vld [vmem:[%s1611_s24] sm:$0xe]  ;;  %v425_v31 = vld [vmem:[%s1611_s24 + $0x4] sm:$0x3]  ;;  %v1456_v33 = vld [vmem:[%s1821_s1 + $0x88] sm:$0xff] }
  0x15   : > { %412 = vmatpush.bf16.msra.mxu2 %v1460_v9  ;;  %v1644_v30 = vld [vmem:[%s1611_s24] sm:$0xc]  ;;  %v358_v34 = vunpack.c.l.b16 %v339_v28  ;;  %v1464_v36 = vld [vmem:[%s1821_s1 + $0xc8] sm:$0xff]  ;;  %v446_v39 = vunpack.c.l.b16 %v425_v31  ;;  %v1478_v45 = vld [vmem:[%s1821_s1 + $0x138] sm:$0xff] }
  0x16   : > { %500 = vmatpush.bf16.msra.mxu3 %v1468_v10  ;;  %v208_v29 = vpack.c.b16 %v207_v21, %v206_v25  ;;  %v1440_v37 = vld [vmem:[%s1821_s1 + $0x8] sm:$0xff]  ;;  %v445_v38 = vunpack.c.l.b16 %v1644_v30  ;;  %v1447_v40 = vld [vmem:[%s1821_s1 + $0x40] sm:$0xff]  ;;  %v1494_v46 = vld [vmem:[%s1821_s1 + $0x1b8] sm:$0xff] }
  0x17   : > { %328 = vmatpush.bf16.msra.mxu1 %v1444_v11  ;;  %v1455_v41 = vld [vmem:[%s1821_s1 + $0x80] sm:$0xff]  ;;  %v359_v42 = vpack.c.b16 %v207_v21, %v358_v34  ;;  %v1502_v50 = vld [vmem:[%s1821_s1 + $0x1f8] sm:$0xff]  ;;  %v1477_v54 = vld [vmem:[%s1821_s1 + $0x130] sm:$0xff] }
  0x18   : > { %268 = vmatpush.bf16.msra.mxu0 %v1451_v12  ;;  %v212_v35 = vshll.u32 %v208_v29, 16  ;;  %v210_v43 = vshrl.u32 %v208_v29, 16  ;;  %v1463_v47 = vld [vmem:[%s1821_s1 + $0xc0] sm:$0xff]  ;;  %v447_v49 = vpack.c.b16 %v446_v39, %v445_v38  ;;  %v1486_v51 = vld [vmem:[%s1821_s1 + $0x178] sm:$0xff]  ;;  %v1493_v55 = vld [vmem:[%s1821_s1 + $0x1b0] sm:$0xff] }
  0x19   : > { %413 = vmatpush.bf16.msra.mxu2 %v1459_v13  ;;  %v1439_v48 = vld [vmem:[%s1821_s1] sm:$0xff]  ;;  %v360_v52 = vrot.slane %v359_v42, 1  ;;  %v1501_v57 = vld [vmem:[%s1821_s1 + $0x1f0] sm:$0xff]  ;;  %v1476_v59 = vld [vmem:[%s1821_s1 + $0x128] sm:$0xff] }
  0x1a   : > { %501 = vmatpush.bf16.msra.mxu3 %v1467_v14  ;;  %v214_v44 = vrot.slane %v212_v35, 1  ;;  %v448_v56 = vrot.slane %v447_v49, 2  ;;  %v1485_v58 = vld [vmem:[%s1821_s1 + $0x170] sm:$0xff]  ;;  %v1492_v60 = vld [vmem:[%s1821_s1 + $0x1a8] sm:$0xff]  ;;  %v1475_v63 = vld [vmem:[%s1821_s1 + $0x120] sm:$0xff] }
  0x1b   : > { %329 = vmatpush.bf16.msra.mxu1 %v1443_v15  ;;  %v1500_v61 = vld [vmem:[%s1821_s1 + $0x1e8] sm:$0xff]  ;;  %v1491_v0 = vld [vmem:[%s1821_s1 + $0x1a0] sm:$0xff]  ;;  %v1474_v7 = vld [vmem:[%s1821_s1 + $0x118] sm:$0xff] }
  0x1c   : > { %269 = vmatpush.bf16.msra.mxu0 %v1450_v16  ;;  %v215_v53 = vor.u32 %v214_v44, %v210_v43  ;;  %v1484_v62 = vld [vmem:[%s1821_s1 + $0x168] sm:$0xff]  ;;  %v512_v1 = vld [vmem:[%s1611_s24 + $0x4] sm:$0x7]  ;;  %v1490_v8 = vld [vmem:[%s1821_s1 + $0x198] sm:$0xff] }
  0x1d   : > { %414 = vmatpush.bf16.msra.mxu2 %v1458_v17  ;;  %v1499_v2 = vld [vmem:[%s1821_s1 + $0x1e0] sm:$0xff]  ;;  %v1726_v5 = vld [vmem:[%s1611_s24 + $0x8] sm:$0x1]  ;;  %v531_v6 = vunpack.c.l.b16 %v512_v1  ;;  %v1498_v11 = vld [vmem:[%s1821_s1 + $0x1d8] sm:$0xff] }
  0x1e   : > { %502 = vmatpush.bf16.msra.mxu3 %v1466_v18  ;;  %v1483_v3 = vld [vmem:[%s1821_s1 + $0x160] sm:$0xff]  ;;  %v791_v10 = vunpack.c.l.b16 %v1726_v5  ;;  %v1482_v12 = vld [vmem:[%s1821_s1 + $0x158] sm:$0xff]  ;;  %v1473_v14 = vld [vmem:[%s1821_s1 + $0x110] sm:$0xff] }
  0x1f   : > { %330 = vmatpush.bf16.msra.mxu1 %v1442_v19  ;;  %v769_v4 = vld [vmem:[%s1611_s24 + $0x4] sm:$0xf]  ;;  %v532_v13 = vpack.c.b16 %v531_v6, %v445_v38  ;;  %v1489_v15 = vld [vmem:[%s1821_s1 + $0x190] sm:$0xff]  ;;  %v604_v21 = vld [vmem:[%s1611_s24] sm:$0x8] }
  0x20   : > { %270 = vmatpush.bf16.msra.mxu0 %v1449_v23  ;;  %v790_v9 = vunpack.c.l.b16 %v769_v4  ;;  %v1497_v17 = vld [vmem:[%s1821_s1 + $0x1d0] sm:$0xff]  ;;  %v1488_v23 = vld [vmem:[%s1821_s1 + $0x188] sm:$0xff]  ;;  %v1471_v30 = vld [vmem:[%s1821_s1 + $0x100] sm:$0xff] }
  0x21   : > { %415 = vmatpush.bf16.msra.mxu2 %v1457_v24  ;;  %v1481_v18 = vld [vmem:[%s1821_s1 + $0x150] sm:$0xff]  ;;  %v534_v19 = vshrl.u32 %v532_v13, 16  ;;  %v537_v20 = vshll.u32 %v532_v13, 16  ;;  %v1496_v25 = vld [vmem:[%s1821_s1 + $0x1c8] sm:$0xff]  ;;  %v1487_v31 = vld [vmem:[%s1821_s1 + $0x180] sm:$0xff] }
  0x22   : > { %503 = vmatpush.bf16.msra.mxu3 %v1465_v26  ;;  %v792_v16 = vpack.c.b16 %v791_v10, %v790_v9  ;;  %v1480_v26 = vld [vmem:[%s1821_s1 + $0x148] sm:$0xff]  ;;  %v1495_v35 = vld [vmem:[%s1821_s1 + $0x1c0] sm:$0xff] }
  0x23   : > { %331 = vmatpush.bf16.msra.mxu1 %v1441_v27  ;;  %v623_v27 = vunpack.c.l.b16 %v604_v21  ;;  %v536_v28 = vrot.slane %v534_v19, 2  ;;  %v539_v29 = vrot.slane %v537_v20, 3  ;;  %v689_v39 = vld [vmem:[%s1611_s24 + $0x4] sm:$0xf]  ;;  %v1508_v43 = vld [vmem:[%s1821_s1 + $0x228] sm:$0xff] }
  0x24   : > { %271 = vmatpush.bf16.msra.mxu0 %v1448_v32  ;;  %v796_v24 = vshll.u32 %v792_v16, 16  ;;  %v1510_v32 = vld [vmem:[%s1821_s1 + $0x238] sm:$0xff]  ;;  %v1507_v44 = vld [vmem:[%s1821_s1 + $0x220] sm:$0xff]  ;;  %v1504_v49 = vld [vmem:[%s1821_s1 + $0x208] sm:$0xff] }
  0x25   : > { %416 = vmatpush.bf16.msra.mxu2 %v1456_v33  ;;  %v794_v33 = vshrl.u32 %v792_v16, 16  ;;  %v540_v38 = vor.u32 %v539_v29, %v536_v28 }
  0x26   : > { %504 = vmatpush.bf16.msra.mxu3 %v1464_v36  ;;  %v798_v34 = vrot.slane %v796_v24, 1  ;;  %v1479_v36 = vld [vmem:[%s1821_s1 + $0x140] sm:$0xff] }
  0x27   : > { %332 = vmatpush.bf16.msra.mxu1 %v1440_v37  ;;  %v624_v37 = vpack.c.b16 %v531_v6, %v623_v27 }
  0x28   : > { %272 = vmatpush.bf16.msra.mxu0 %v1447_v40  ;;  %v1509_v40 = vld [vmem:[%s1821_s1 + $0x230] sm:$0xff] }
  0x29   : > { %417 = vmatpush.bf16.msra.mxu2 %v1455_v41  ;;  %v799_v41 = vor.u32 %v798_v34, %v794_v33  ;;  %v625_v42 = vrot.slane %v624_v37, 3 }
  0x2a   : > { %505 = vmatpush.bf16.msra.mxu3 %v1463_v47  ;;  %v863_v47 = vld [vmem:[%s1611_s24 + $0x4] sm:$0xe] }
  0x2b   : > { %333 = vmatpush.bf16.msra.mxu1 %v1439_v48  ;;  %273 = vmatmul.bf16.vlgmr.msra.gmra.mxu0 %v215_v53  ;;  %v882_v48 = vunpack.c.l.b16 %v863_v47 }
  0x2c   : > { %590 = vmatpush.bf16.msrb.mxu0 %v1478_v45  ;;  %418 = vmatmul.bf16.vlgmr.msra.gmra.mxu2 %v360_v52  ;;  %v1506_v45 = vld [vmem:[%s1821_s1 + $0x218] sm:$0xff] }
  0x2d   : > { %755 = vmatpush.bf16.msrb.mxu2 %v1494_v46  ;;  %506 = vmatmul.bf16.vlgmr.msra.gmra.mxu3 %v448_v56  ;;  %v1505_v46 = vld [vmem:[%s1821_s1 + $0x210] sm:$0xff] }
  0x2e   : > { %849 = vmatpush.bf16.msrb.mxu3 %v1502_v50  ;;  %334 = vmatmul.bf16.vlgmr.msra.gmra.mxu1 %v1627_v22  ;;  %v1472_v22 = vld [vmem:[%s1821_s1 + $0x108] sm:$0xff]  ;;  %v883_v50 = vpack.c.b16 %v791_v10, %v882_v48 }
  0x2f   : > { %675 = vmatpush.bf16.msrb.mxu1 %v1486_v51  ;;  %v1503_v51 = vld [vmem:[%s1821_s1 + $0x200] sm:$0xff] }
  0x30   : > { %591 = vmatpush.bf16.msrb.mxu0 %v1477_v54  ;;  %v884_v52 = vrot.slane %v883_v50, 1 }
  0x31   : > { %756 = vmatpush.bf16.msrb.mxu2 %v1493_v55 }
  0x32   : > { %850 = vmatpush.bf16.msrb.mxu3 %v1501_v57 }
  0x33   : > { %676 = vmatpush.bf16.msrb.mxu1 %v1485_v58 }
  0x34   : > { %592 = vmatpush.bf16.msrb.mxu0 %v1476_v59 }
  0x35   : > { %757 = vmatpush.bf16.msrb.mxu2 %v1492_v60 }
  0x36   : > { %851 = vmatpush.bf16.msrb.mxu3 %v1500_v61 }
  0x37   : > { %677 = vmatpush.bf16.msrb.mxu1 %v1484_v62 }
  0x38   : > { %593 = vmatpush.bf16.msrb.mxu0 %v1475_v63 }
  0x39   : > { %758 = vmatpush.bf16.msrb.mxu2 %v1491_v0 }
  0x3a   : > { %852 = vmatpush.bf16.msrb.mxu3 %v1499_v2 }
  0x3b   : > { %678 = vmatpush.bf16.msrb.mxu1 %v1483_v3 }
  0x3c   : > { %594 = vmatpush.bf16.msrb.mxu0 %v1474_v7 }
  0x3d   : > { %759 = vmatpush.bf16.msrb.mxu2 %v1490_v8 }
  0x3e   : > { %853 = vmatpush.bf16.msrb.mxu3 %v1498_v11 }
  0x3f   : > { %679 = vmatpush.bf16.msrb.mxu1 %v1482_v12  ;;  %v1520_v12 = vld [vmem:[%s1822_s2] ss:$0 sm:$0xff] }
  0x40   : > { %595 = vmatpush.bf16.msrb.mxu0 %v1473_v14 }
  0x41   : > { %760 = vmatpush.bf16.msrb.mxu2 %v1489_v15 }
  0x42   : > { %854 = vmatpush.bf16.msrb.mxu3 %v1497_v17 }
  0x43   : > { %680 = vmatpush.bf16.msrb.mxu1 %v1481_v18 }
  0x44   : > { %596 = vmatpush.bf16.msrb.mxu0 %v1472_v22 }
  0x45   : > { %761 = vmatpush.bf16.msrb.mxu2 %v1488_v23 }
  0x46   : > { %855 = vmatpush.bf16.msrb.mxu3 %v1496_v25 }
  0x47   : > { %681 = vmatpush.bf16.msrb.mxu1 %v1480_v26 }
  0x48   : > { %597 = vmatpush.bf16.msrb.mxu0 %v1471_v30 }
  0x49   : > { %762 = vmatpush.bf16.msrb.mxu2 %v1487_v31 }
  0x4a   : > { %856 = vmatpush.bf16.msrb.mxu3 %v1495_v35 }
  0x4b   : > { %682 = vmatpush.bf16.msrb.mxu1 %v1479_v36  ;;  %598 = vmatmul.bf16.vlgmr.msrb.gmra.mxu0 %v540_v38 }
  0x4c   : > { %934 = vmatpush.bf16.msra.mxu0 %v1510_v32  ;;  %763 = vmatmul.bf16.vlgmr.msrb.gmra.mxu2 %v689_v39 }
  0x4d   : > { %857 = vmatmul.bf16.vlgmr.msrb.gmra.mxu3 %v799_v41 }
  0x4e   : > { %683 = vmatmul.bf16.vlgmr.msrb.gmra.mxu1 %v625_v42 }
  0x50   : > { %935 = vmatpush.bf16.msra.mxu0 %v1509_v40 }
  0x54   : > { %936 = vmatpush.bf16.msra.mxu0 %v1508_v43 }
  0x58   : > { %937 = vmatpush.bf16.msra.mxu0 %v1507_v44 }
  0x5c   : > { %938 = vmatpush.bf16.msra.mxu0 %v1506_v45 }
  0x60   : > { %939 = vmatpush.bf16.msra.mxu0 %v1505_v46 }
  0x64   : > { %940 = vmatpush.bf16.msra.mxu0 %v1504_v49 }
  0x68   : > { %941 = vmatpush.bf16.msra.mxu0 %v1503_v51 }
  0x6b   : > { %942 = vmatmul.bf16.vlgmr.msra.gmra.mxu0 %v884_v52 }
  0xa8   : > { %v274_v53 = vpop.f32.mrf.mxu0 }
  0xab   : > { %v335_v54 = vpop.f32.mrf.mxu1 }
  0xac   : > { %v336_v63 = vadd.f32 %v335_v54, %v274_v53 }
  0xaf   : > { %v419_v55 = vpop.f32.mrf.mxu2 }
  0xb0   : > { %v507_v56 = vpop.f32.mrf.mxu3  ;;  %v276_v57 = vpop.f32.mrf.mxu0  ;;  %v423_v1 = vadd.f32 %v419_v55, %v336_v63 }
  0xb2   : > { %v511_v5 = vadd.f32 %v507_v56, %v423_v1 }
  0xb3   : > { %v337_v58 = vpop.f32.mrf.mxu1 }
  0xb7   : > { %v421_v59 = vpop.f32.mrf.mxu2 }
  0xb8   : > { %v509_v60 = vpop.f32.mrf.mxu3 }
  0xc8   : > { %v599_v61 = vpop.f32.mrf.mxu0 }
  0xc9   : > { %v603_v7 = vadd.f32 %v599_v61, %v511_v5 }
  0xcb   : > { %v684_v62 = vpop.f32.mrf.mxu1 }
  0xcc   : > { %v688_v9 = vadd.f32 %v684_v62, %v603_v7 }
  0xcf   : > { %v764_v0 = vpop.f32.mrf.mxu2 }
  0xd0   : > { %v858_v2 = vpop.f32.mrf.mxu3  ;;  %v601_v3 = vpop.f32.mrf.mxu0  ;;  %v768_v10 = vadd.f32 %v764_v0, %v688_v9 }
  0xd2   : > { %v862_v11 = vadd.f32 %v858_v2, %v768_v10 }
  0xd3   : > { %v686_v4 = vpop.f32.mrf.mxu1 }
  0xd7   : > { %v766_v6 = vpop.f32.mrf.mxu2 }
  0xd8   : > { %v860_v8 = vpop.f32.mrf.mxu3 }
  0xe8   : > { %v943_v13 = vpop.f32.mrf.mxu0 }
  0xe9   : > { %v947_v14 = vadd.f32 %v943_v13, %v862_v11 }
  0xeb   : > { %v952_v15 = vadd.f32 %v1520_v12, %v947_v14 }
  0xed   : > { %v953_v16 = vmax.f32 %v952_v15, 0.0 }
  0xef   : > { %v955_v17 = vrot.slane %v953_v16, 4  ;;  %v957_v18 = vpack.c.bf16 %v953_v16, %v953_v16 }
  0xf0   : > { %v945_v19 = vpop.f32.mrf.mxu0 }
  0xf1   : > { %v958_v20 = vpack.c.bf16 %v955_v17, %v955_v17  ;;  %959 = vst [vmem:[%s168_s20] sm:$0x1] %v957_v18 }
  0xf3   : > { %960 = vst [vmem:[%s168_s20 + $0x1] sm:$0x1] %v958_v20 }
  0xf4 PF: > { %s13_s12 = sadd.s32 1, %s1527_s12  }
  0xf5   : > { %p10_p4 = scmp.ge.s32.totalorder %s13_s12, 4  }
  0xf7   :  { %12 = sbr.rel (!%p10_p4) target bundleno = 1 (0x1), region = 70 }

</bundles_post_ra>
